<compile_context>
chip_gen: v6e
topology: v6e:2x2x1
jax: 0.10.0
libtpu: 0.0.40
codegen_flags: <defaults>
</compile_context>

<pallas_src>
import functools
import math

import jax
import jax.numpy as jnp
from jax.experimental import pallas as pl
from jax.experimental.pallas import tpu as pltpu

LN_EPS = 1e-5
MATMUL_DTYPE = jnp.bfloat16     # MXU operand dtype (accumulation is always f32)


def _choose_groups(num_groups, seq_len, target_rows=128, max_rows=2048):
    """Largest divisor G of num_groups such that, once G*seq_len reaches `target_rows`
    (enough rows to fill the MXU M dimension), we stop before exceeding `max_rows`
    (VMEM guard for the (G*L, 4C) FFN intermediate and (G, L, L) score tensors) or
    collapsing the grid below 2 steps (v7x has 2 TensorCores; on single-TC v5e/v6e
    this preference is neutral)."""
    best = 1
    for g in range(1, num_groups + 1):
        if num_groups % g:
            continue
        reached = best * seq_len >= target_rows
        if reached and (g * seq_len > max_rows or num_groups // g < 2):
            break
        best = g
    return best


# --------------------------------------------------------------------------------------
# Pallas kernel: one grid step == G token-groups, full transformer block
# --------------------------------------------------------------------------------------
def _transformer_block_kernel(
    x_ref, pos_ref,
    g1_ref, b1_ref,
    wqkv_ref, bqkv_ref,
    wo_ref, bo_ref,
    g2_ref, b2_ref,
    w1_ref, bf1_ref, w2_ref, bf2_ref,
    o_ref,
    *, num_heads, groups):
    x = x_ref[0]                                       # (G*L, C) float32
    GL, C = x.shape
    G = groups
    L = GL // G
    H = num_heads
    hd = C // H
    cdt = wqkv_ref.dtype                               # bf16 matmul operand dtype

    # ---- LayerNorm 1 (f32 statistics) ----
    mu = jnp.mean(x, axis=-1, keepdims=True)
    var = jnp.mean(jnp.square(x - mu), axis=-1, keepdims=True)
    xn = (x - mu) * jax.lax.rsqrt(var + LN_EPS)
    xn = xn * g1_ref[...] + b1_ref[...]

    # ---- add learnable positional embedding, broadcast over the G groups ----
    # (leading-dim reshapes are layout-free: sublane/lane dims are unchanged)
    xp = (xn.reshape(G, L, C) + pos_ref[...][None]).reshape(GL, C).astype(cdt)

    # ---- fused QKV projection (1/sqrt(hd) pre-folded into the q columns) ----
    qkv = jnp.dot(xp, wqkv_ref[...], preferred_element_type=jnp.float32) + bqkv_ref[...]
    q = qkv[:, 0 * C:1 * C].reshape(G, L, C).astype(cdt)
    k = qkv[:, 1 * C:2 * C].reshape(G, L, C).astype(cdt)
    v = qkv[:, 2 * C:3 * C].reshape(G, L, C).astype(cdt)

    # ---- multi-head self-attention, batched over the G token groups ----
    # Static loop over heads (H is tiny); every einsum keeps a single leading batch dim
    # and contracts on the head dim directly, so no kh.T / XLU transposes are built.
    head_outs = []
    for h in range(H):
        sl = slice(h * hd, (h + 1) * hd)
        s = jnp.einsum('bld,bmd->blm', q[:, :, sl], k[:, :, sl],
                       preferred_element_type=jnp.float32)            # (G, L, L)
        s = s - jnp.max(s, axis=-1, keepdims=True)
        p = jnp.exp(s)
        inv = pl.reciprocal(jnp.sum(p, axis=-1, keepdims=True), approx=True)
        oh = jnp.einsum('blm,bmd->bld', p.astype(cdt), v[:, :, sl],
                        preferred_element_type=jnp.float32)            # (G, L, hd)
        head_outs.append(oh * inv)                    # normalize the small head output
    o = jnp.concatenate(head_outs, axis=-1).reshape(GL, C).astype(cdt)

    # ---- single full-width output projection ----
    attn = jnp.dot(o, wo_ref[...], preferred_element_type=jnp.float32) + bo_ref[...]

    # ---- residual 1 (residual is the raw, un-normalized patches) ----
    y = attn + x

    # ---- LayerNorm 2 ----
    mu2 = jnp.mean(y, axis=-1, keepdims=True)
    var2 = jnp.mean(jnp.square(y - mu2), axis=-1, keepdims=True)
    yn = (y - mu2) * jax.lax.rsqrt(var2 + LN_EPS)
    yn = yn * g2_ref[...] + b2_ref[...]

    # ---- FFN (Linear -> GELU -> Linear) + residual 2 ----
    h1 = jnp.dot(yn.astype(cdt), w1_ref[...], preferred_element_type=jnp.float32) + bf1_ref[...]
    h1 = jax.nn.gelu(h1)    # TODO(synk): tanh approximation (PyTorch default is exact erf)
    h2 = jnp.dot(h1.astype(cdt), w2_ref[...], preferred_element_type=jnp.float32) + bf2_ref[...]

    o_ref[0] = (y + h2).astype(o_ref.dtype)


def _run_block_pallas(x_blc, pos, params, num_heads, matmul_dtype=MATMUL_DTYPE):
    B, L, C = x_blc.shape
    hd = C // num_heads
    scale = 1.0 / math.sqrt(hd)
    H4 = params["w1"].shape[1]

    # Fuse Q/K/V into one (C, 3C) weight, fold the attention scale into the q columns,
    # and store matmul weights in bf16 (biases stay f32; they are added post f32 accum).
    wqkv = jnp.concatenate(
        [params["wq"] * scale, params["wk"], params["wv"]], axis=1).astype(matmul_dtype)
    bqkv = jnp.concatenate(
        [params["bq"] * scale, params["bk"], params["bv"]], axis=1)
    wo = params["wo"].astype(matmul_dtype)
    w1 = params["w1"].astype(matmul_dtype)
    w2 = params["w2"].astype(matmul_dtype)

    G = _choose_groups(B, L)
    nb = B // G
    x_in = x_blc.reshape(nb, G * L, C)

    def _full(shape):
        n = len(shape)
        return pl.BlockSpec(shape, lambda i, _n=n: (0,) * _n)

    in_specs = [
        pl.BlockSpec((1, G * L, C), lambda i: (i, 0, 0)),   # x: G token groups per step
        _full((L, C)),                                      # positional embedding (one copy)
        _full((1, C)), _full((1, C)),                       # norm1 gamma/beta
        _full((C, 3 * C)), _full((1, 3 * C)),               # fused Wqkv, bqkv
        _full((C, C)), _full((1, C)),                       # Wo, bo
        _full((1, C)), _full((1, C)),                       # norm2 gamma/beta
        _full((C, H4)), _full((1, H4)),                     # FFN W1, b1
        _full((H4, C)), _full((1, C)),                      # FFN W2, b2
    ]
    # TODO(synk): for large C, request single-buffering on the constant-index weight
    # specs (pipeline_mode=pl.Buffered(1)); negligible at C=48.

    kernel = functools.partial(_transformer_block_kernel,
                               num_heads=num_heads, groups=G)
    out = pl.pallas_call(
        kernel,
        out_shape=jax.ShapeDtypeStruct((nb, G * L, C), jnp.float32),
        grid=(nb,),
        in_specs=in_specs,
        out_specs=pl.BlockSpec((1, G * L, C), lambda i: (i, 0, 0)),
        compiler_params=pltpu.CompilerParams(dimension_semantics=("parallel",)),
    )(x_in, pos,
      params["g1"], params["b1"],
      wqkv, bqkv, wo, params["bo"],
      params["g2"], params["b2"],
      w1, params["bf1"], w2, params["bf2"])
    return out.reshape(B, L, C)


# --------------------------------------------------------------------------------------
# Pure-JAX reference (raw, unfused params; mirrors the kernel's matmul precision)
# --------------------------------------------------------------------------------------
def _run_block_ref(x_blc, pos, params, num_heads, matmul_dtype=MATMUL_DTYPE):
    B, L, C = x_blc.shape
    H = num_heads
    hd = C // H
    cdt = matmul_dtype

    def ln(x, g, b):
        mu = x.mean(-1, keepdims=True)
        var = ((x - mu) ** 2).mean(-1, keepdims=True)
        return (x - mu) * jax.lax.rsqrt(var + LN_EPS) * g + b

    def mm(a, w):
        return jnp.einsum('...k,kn->...n', a.astype(cdt), w.astype(cdt),
                          preferred_element_type=jnp.float32)

    xn = ln(x_blc, params["g1"], params["b1"]) + pos[None]
    q = mm(xn, params["wq"]) + params["bq"]
    k = mm(xn, params["wk"]) + params["bk"]
    v = mm(xn, params["wv"]) + params["bv"]
    scale = 1.0 / math.sqrt(hd)
    qh = (q * scale).reshape(B, L, H, hd)
    kh = k.reshape(B, L, H, hd)
    vh = v.reshape(B, L, H, hd)
    s = jnp.einsum('blhd,bmhd->bhlm', qh.astype(cdt), kh.astype(cdt),
                   preferred_element_type=jnp.float32)
    a = jax.nn.softmax(s, axis=-1)
    o = jnp.einsum('bhlm,bmhd->blhd', a.astype(cdt), vh.astype(cdt),
                   preferred_element_type=jnp.float32).reshape(B, L, C)
    o = mm(o, params["wo"]) + params["bo"]
    y = o + x_blc
    yn = ln(y, params["g2"], params["b2"])
    h1 = jax.nn.gelu(mm(yn, params["w1"]) + params["bf1"])
    return y + mm(h1, params["w2"]) + params["bf2"]


# --------------------------------------------------------------------------------------
# Module wrapper (glue): shift / pad / rearrange, learnable pos, un-rearrange
# --------------------------------------------------------------------------------------
def _make_pos(params, n, p):
    row, col, dep = params["row"], params["col"], params["dep"]
    c3, cd = row.shape[1], dep.shape[1]
    r = jnp.broadcast_to(row[None, :, None, :], (n, p, p, c3))
    c = jnp.broadcast_to(col[None, None, :, :], (n, p, p, c3))
    d = jnp.broadcast_to(dep[:, None, None, :], (n, p, p, cd))
    return jnp.concatenate([r, c, d], axis=-1).reshape(n * p * p, c3 + c3 + cd)


def temporal_transformer_forward(x, params, *, patch_size, num_heads, shift_size=0,
                                 block_fn=_run_block_pallas):
    assert x.ndim == 5, "Input feature map should have 5 dims!"
    b, n, c, h, w = x.shape
    p = patch_size
    if shift_size > 0:
        x = jnp.roll(x, (shift_size, shift_size), axis=(3, 4))
    pad_h = (p - h % p) % p
    pad_w = (p - w % p) % p
    x = jnp.pad(x, ((0, 0), (0, 0), (0, 0), (0, pad_h), (0, pad_w)))
    hp, wp = (h + pad_h) // p, (w + pad_w) // p

    # 'b n c (hp p1) (wp p2) -> (b hp wp) (n p1 p2) c'  (kernel layout)
    xr = x.reshape(b, n, c, hp, p, wp, p)
    xr = jnp.transpose(xr, (0, 3, 5, 1, 4, 6, 2))            # b, hp, wp, n, p1, p2, c
    x_blc = xr.reshape(b * hp * wp, n * p * p, c).astype(jnp.float32)

    pos = _make_pos(params, n, p)                             # (n*p*p, c)

    out = block_fn(x_blc, pos, params, num_heads)             # (B_tok, L, C)

    # '(b hp wp) (n p1 p2) c -> b n c (hp p1) (wp p2)'
    y = out.reshape(b, hp, wp, n, p, p, c)
    y = jnp.transpose(y, (0, 3, 6, 1, 4, 2, 5))               # b, n, c, hp, p1, wp, p2
    y = y.reshape(b, n, c, hp * p, wp * p)
    if pad_h > 0 or pad_w > 0:
        y = y[..., :h, :w]
    if shift_size > 0:
        y = jnp.roll(y, (-shift_size, -shift_size), axis=(-2, -1))
    return y


# --------------------------------------------------------------------------------------
# Deterministic synthetic parameters (shapes per __init__)
# --------------------------------------------------------------------------------------
def init_params(key, c, num_frames, patch_size):
    c3 = c // 3
    cd = c - 2 * c3
    ks = jax.random.split(key, 16)
    u = lambda k, s: jax.random.uniform(k, s, jnp.float32)            # nn.init.uniform_
    g = lambda k, s, sc=0.05: sc * jax.random.normal(k, s, jnp.float32)
    return dict(
        row=u(ks[0], (patch_size, c3)),
        col=u(ks[1], (patch_size, c3)),
        dep=u(ks[2], (num_frames, cd)),
        g1=1.0 + g(ks[3], (1, c)), b1=g(ks[4], (1, c)),
        g2=1.0 + g(ks[5], (1, c)), b2=g(ks[6], (1, c)),
        wq=g(ks[7], (c, c)), bq=g(ks[8], (1, c)),
        wk=g(ks[9], (c, c)), bk=g(ks[10], (1, c)),
        wv=g(ks[11], (c, c)), bv=g(ks[12], (1, c)),
        wo=g(ks[13], (c, c)), bo=jnp.zeros((1, c), jnp.float32),
        w1=g(ks[14], (c, 4 * c)), bf1=jnp.zeros((1, 4 * c), jnp.float32),
        w2=g(ks[15], (4 * c, c)), bf2=jnp.zeros((1, c), jnp.float32),
    )


if __name__ == "__main__":
    # small shapes consistent with the module: channels == embedding_dim, n == num_frames
    b, n, c, h, w = 2, 2, 48, 8, 8          # embedding_dim=48 (divisible by 3 heads)
    patch_size, num_heads = 4, 3            # => B_tok=8, L=32, G=4 -> grid of 2 steps

    key = jax.random.PRNGKey(0)
    kx, kp = jax.random.split(key)
    x = jax.random.normal(kx, (b, n, c, h, w), jnp.float32)
    params = init_params(kp, c, num_frames=n, patch_size=patch_size)

    fwd = jax.jit(functools.partial(temporal_transformer_forward,
                                    patch_size=patch_size, num_heads=num_heads))
    y = jax.block_until_ready(fwd(x, params))
    assert y.shape == (b, n, c, h, w)

    fwd_ref = jax.jit(functools.partial(temporal_transformer_forward,
                                        patch_size=patch_size, num_heads=num_heads,
                                        block_fn=_run_block_ref))
    y_ref = jax.block_until_ready(fwd_ref(x, params))

    # bf16 matmul operands + approx softmax reciprocal + scale folding => compare at a
    # tolerance that absorbs precision-order differences but catches structural errors.
    err = float(jnp.max(jnp.abs(y - y_ref)))
    assert jnp.allclose(y, y_ref, rtol=1e-2, atol=1e-2), \
        f"mismatch vs pure-JAX reference (max abs err {err})"

    print("KERNEL_OK")
</pallas_src>

<mosaic_0001>
module attributes {stable_mosaic.version = 11 : i64} {
  func.func @_transformer_block_kernel(%arg0: i32, %arg1: memref<1x128x48xf32, #tpu.memory_space<vmem>>, %arg2: memref<32x48xf32, #tpu.memory_space<vmem>>, %arg3: memref<1x48xf32, #tpu.memory_space<vmem>>, %arg4: memref<1x48xf32, #tpu.memory_space<vmem>>, %arg5: memref<48x144xbf16, #tpu.memory_space<vmem>>, %arg6: memref<1x144xf32, #tpu.memory_space<vmem>>, %arg7: memref<48x48xbf16, #tpu.memory_space<vmem>>, %arg8: memref<1x48xf32, #tpu.memory_space<vmem>>, %arg9: memref<1x48xf32, #tpu.memory_space<vmem>>, %arg10: memref<1x48xf32, #tpu.memory_space<vmem>>, %arg11: memref<48x192xbf16, #tpu.memory_space<vmem>>, %arg12: memref<1x192xf32, #tpu.memory_space<vmem>>, %arg13: memref<192x48xbf16, #tpu.memory_space<vmem>>, %arg14: memref<1x48xf32, #tpu.memory_space<vmem>>, %arg15: memref<1x128x48xf32, #tpu.memory_space<vmem>>) attributes {dimension_semantics = [#tpu.dimension_semantics<parallel>], iteration_bounds = array<i64: 2>, scalar_prefetch = 0 : i64, scratch_operands = 0 : i64, tpu.core_type = #tpu.core_type<tc>, window_params = [{transform_indices = @transform_0, window_bounds = array<i64: 1, 128, 48>}, {pipeline_mode = #tpu.pipeline_mode<synchronous>, transform_indices = @transform_1, window_bounds = array<i64: 32, 48>}, {pipeline_mode = #tpu.pipeline_mode<synchronous>, transform_indices = @transform_2, window_bounds = array<i64: 1, 48>}, {pipeline_mode = #tpu.pipeline_mode<synchronous>, transform_indices = @transform_3, window_bounds = array<i64: 1, 48>}, {pipeline_mode = #tpu.pipeline_mode<synchronous>, transform_indices = @transform_4, window_bounds = array<i64: 48, 144>}, {pipeline_mode = #tpu.pipeline_mode<synchronous>, transform_indices = @transform_5, window_bounds = array<i64: 1, 144>}, {pipeline_mode = #tpu.pipeline_mode<synchronous>, transform_indices = @transform_6, window_bounds = array<i64: 48, 48>}, {pipeline_mode = #tpu.pipeline_mode<synchronous>, transform_indices = @transform_7, window_bounds = array<i64: 1, 48>}, {pipeline_mode = #tpu.pipeline_mode<synchronous>, transform_indices = @transform_8, window_bounds = array<i64: 1, 48>}, {pipeline_mode = #tpu.pipeline_mode<synchronous>, transform_indices = @transform_9, window_bounds = array<i64: 1, 48>}, {pipeline_mode = #tpu.pipeline_mode<synchronous>, transform_indices = @transform_10, window_bounds = array<i64: 48, 192>}, {pipeline_mode = #tpu.pipeline_mode<synchronous>, transform_indices = @transform_11, window_bounds = array<i64: 1, 192>}, {pipeline_mode = #tpu.pipeline_mode<synchronous>, transform_indices = @transform_12, window_bounds = array<i64: 192, 48>}, {pipeline_mode = #tpu.pipeline_mode<synchronous>, transform_indices = @transform_13, window_bounds = array<i64: 1, 48>}, {transform_indices = @transform_14, window_bounds = array<i64: 1, 128, 48>}]} {
    %c0 = arith.constant 0 : index
    %c0_0 = arith.constant 0 : index
    %c0_1 = arith.constant 0 : index
    %0 = vector.load %arg1[%c0, %c0_0, %c0_1] : memref<1x128x48xf32, #tpu.memory_space<vmem>>, vector<1x128x48xf32>
    %1 = vector.shape_cast %0 : vector<1x128x48xf32> to vector<128x48xf32>
    %cst = arith.constant dense<0.000000e+00> : vector<128xf32>
    %2 = vector.multi_reduction <add>, %1, %cst [1] : vector<128x48xf32> to vector<128xf32>
    %3 = vector.shape_cast %2 : vector<128xf32> to vector<128x1xf32>
    %cst_2 = arith.constant 4.800000e+01 : f32
    %4 = vector.broadcast %cst_2 : f32 to vector<128x1xf32>
    %5 = arith.divf %3, %4 : vector<128x1xf32>
    %6 = vector.broadcast %5 : vector<128x1xf32> to vector<128x48xf32>
    %7 = arith.subf %1, %6 : vector<128x48xf32>
    %8 = arith.mulf %7, %7 : vector<128x48xf32>
    %cst_3 = arith.constant dense<0.000000e+00> : vector<128xf32>
    %9 = vector.multi_reduction <add>, %8, %cst_3 [1] : vector<128x48xf32> to vector<128xf32>
    %10 = vector.shape_cast %9 : vector<128xf32> to vector<128x1xf32>
    %cst_4 = arith.constant 4.800000e+01 : f32
    %11 = vector.broadcast %cst_4 : f32 to vector<128x1xf32>
    %12 = arith.divf %10, %11 : vector<128x1xf32>
    %13 = vector.broadcast %5 : vector<128x1xf32> to vector<128x48xf32>
    %14 = arith.subf %1, %13 : vector<128x48xf32>
    %cst_5 = arith.constant 9.99999974E-6 : f32
    %15 = vector.broadcast %cst_5 : f32 to vector<128x1xf32>
    %16 = arith.addf %12, %15 : vector<128x1xf32>
    %17 = math.rsqrt %16 : vector<128x1xf32>
    %18 = vector.broadcast %17 : vector<128x1xf32> to vector<128x48xf32>
    %19 = arith.mulf %14, %18 : vector<128x48xf32>
    %c0_6 = arith.constant 0 : index
    %c0_7 = arith.constant 0 : index
    %20 = vector.load %arg3[%c0_6, %c0_7] : memref<1x48xf32, #tpu.memory_space<vmem>>, vector<1x48xf32>
    %21 = vector.broadcast %20 : vector<1x48xf32> to vector<128x48xf32>
    %22 = arith.mulf %19, %21 : vector<128x48xf32>
    %c0_8 = arith.constant 0 : index
    %c0_9 = arith.constant 0 : index
    %23 = vector.load %arg4[%c0_8, %c0_9] : memref<1x48xf32, #tpu.memory_space<vmem>>, vector<1x48xf32>
    %24 = vector.broadcast %23 : vector<1x48xf32> to vector<128x48xf32>
    %25 = arith.addf %22, %24 : vector<128x48xf32>
    %26 = vector.shape_cast %25 : vector<128x48xf32> to vector<4x32x48xf32>
    %c0_10 = arith.constant 0 : index
    %c0_11 = arith.constant 0 : index
    %27 = vector.load %arg2[%c0_10, %c0_11] : memref<32x48xf32, #tpu.memory_space<vmem>>, vector<32x48xf32>
    %28 = vector.shape_cast %27 : vector<32x48xf32> to vector<1x32x48xf32>
    %29 = vector.broadcast %28 : vector<1x32x48xf32> to vector<4x32x48xf32>
    %30 = arith.addf %26, %29 : vector<4x32x48xf32>
    %31 = vector.shape_cast %30 : vector<4x32x48xf32> to vector<128x48xf32>
    %32 = arith.truncf %31 : vector<128x48xf32> to vector<128x48xbf16>
    %c0_12 = arith.constant 0 : index
    %c0_13 = arith.constant 0 : index
    %33 = vector.load %arg5[%c0_12, %c0_13] : memref<48x144xbf16, #tpu.memory_space<vmem>>, vector<48x144xbf16>
    %cst_14 = arith.constant dense<0.000000e+00> : vector<128x144xf32>
    %34 = tpu.matmul %32, %33, %cst_14 {dimension_numbers = #tpu.dot_dimension_numbers<[1], [0], [0], [1], [0, 0, 1, 1], [], []>} : vector<128x48xbf16>, vector<48x144xbf16>, vector<128x144xf32> -> vector<128x144xf32>
    %c0_15 = arith.constant 0 : index
    %c0_16 = arith.constant 0 : index
    %35 = vector.load %arg6[%c0_15, %c0_16] : memref<1x144xf32, #tpu.memory_space<vmem>>, vector<1x144xf32>
    %36 = vector.broadcast %35 : vector<1x144xf32> to vector<128x144xf32>
    %37 = arith.addf %34, %36 : vector<128x144xf32>
    %38 = vector.extract_strided_slice %37 {offsets = [0, 0], sizes = [128, 48], strides = [1, 1]} : vector<128x144xf32> to vector<128x48xf32>
    %39 = vector.shape_cast %38 : vector<128x48xf32> to vector<4x32x48xf32>
    %40 = arith.truncf %39 : vector<4x32x48xf32> to vector<4x32x48xbf16>
    %41 = vector.extract_strided_slice %37 {offsets = [0, 48], sizes = [128, 48], strides = [1, 1]} : vector<128x144xf32> to vector<128x48xf32>
    %42 = vector.shape_cast %41 : vector<128x48xf32> to vector<4x32x48xf32>
    %43 = arith.truncf %42 : vector<4x32x48xf32> to vector<4x32x48xbf16>
    %44 = vector.extract_strided_slice %37 {offsets = [0, 96], sizes = [128, 48], strides = [1, 1]} : vector<128x144xf32> to vector<128x48xf32>
    %45 = vector.shape_cast %44 : vector<128x48xf32> to vector<4x32x48xf32>
    %46 = arith.truncf %45 : vector<4x32x48xf32> to vector<4x32x48xbf16>
    %47 = vector.extract_strided_slice %40 {offsets = [0, 0, 0], sizes = [4, 32, 16], strides = [1, 1, 1]} : vector<4x32x48xbf16> to vector<4x32x16xbf16>
    %48 = vector.extract_strided_slice %43 {offsets = [0, 0, 0], sizes = [4, 32, 16], strides = [1, 1, 1]} : vector<4x32x48xbf16> to vector<4x32x16xbf16>
    "tpu.trace_start"() <{level = 10 : i32, message = "bld,bmd->blm"}> : () -> ()
    %cst_17 = arith.constant dense<0.000000e+00> : vector<4x32x32xf32>
    %49 = tpu.matmul %47, %48, %cst_17 {dimension_numbers = #tpu.dot_dimension_numbers<[2], [2], [1], [1], [0, 0, 0, 1, 1, 1], [0], [0]>} : vector<4x32x16xbf16>, vector<4x32x16xbf16>, vector<4x32x32xf32> -> vector<4x32x32xf32>
    "tpu.trace_stop"() : () -> ()
    %cst_18 = arith.constant dense<0xFF800000> : vector<4x32xf32>
    %50 = vector.multi_reduction <maximumf>, %49, %cst_18 [2] : vector<4x32x32xf32> to vector<4x32xf32>
    %51 = vector.shape_cast %50 : vector<4x32xf32> to vector<4x32x1xf32>
    %52 = vector.broadcast %51 : vector<4x32x1xf32> to vector<4x32x32xf32>
    %53 = arith.subf %49, %52 : vector<4x32x32xf32>
    %54 = math.exp %53 : vector<4x32x32xf32>
    %cst_19 = arith.constant dense<0.000000e+00> : vector<4x32xf32>
    %55 = vector.multi_reduction <add>, %54, %cst_19 [2] : vector<4x32x32xf32> to vector<4x32xf32>
    %56 = vector.shape_cast %55 : vector<4x32xf32> to vector<4x32x1xf32>
    %57 = tpu.reciprocal %56 {approx = true} : vector<4x32x1xf32> -> vector<4x32x1xf32>
    %58 = arith.truncf %54 : vector<4x32x32xf32> to vector<4x32x32xbf16>
    %59 = vector.extract_strided_slice %46 {offsets = [0, 0, 0], sizes = [4, 32, 16], strides = [1, 1, 1]} : vector<4x32x48xbf16> to vector<4x32x16xbf16>
    "tpu.trace_start"() <{level = 10 : i32, message = "blm,bmd->bld"}> : () -> ()
    %cst_20 = arith.constant dense<0.000000e+00> : vector<4x32x16xf32>
    %60 = tpu.matmul %58, %59, %cst_20 {dimension_numbers = #tpu.dot_dimension_numbers<[2], [1], [1], [2], [0, 0, 0, 1, 1, 2], [0], [0]>} : vector<4x32x32xbf16>, vector<4x32x16xbf16>, vector<4x32x16xf32> -> vector<4x32x16xf32>
    "tpu.trace_stop"() : () -> ()
    %61 = vector.broadcast %57 : vector<4x32x1xf32> to vector<4x32x16xf32>
    %62 = arith.mulf %60, %61 : vector<4x32x16xf32>
    %63 = vector.extract_strided_slice %40 {offsets = [0, 0, 16], sizes = [4, 32, 16], strides = [1, 1, 1]} : vector<4x32x48xbf16> to vector<4x32x16xbf16>
    %64 = vector.extract_strided_slice %43 {offsets = [0, 0, 16], sizes = [4, 32, 16], strides = [1, 1, 1]} : vector<4x32x48xbf16> to vector<4x32x16xbf16>
    "tpu.trace_start"() <{level = 10 : i32, message = "bld,bmd->blm"}> : () -> ()
    %cst_21 = arith.constant dense<0.000000e+00> : vector<4x32x32xf32>
    %65 = tpu.matmul %63, %64, %cst_21 {dimension_numbers = #tpu.dot_dimension_numbers<[2], [2], [1], [1], [0, 0, 0, 1, 1, 1], [0], [0]>} : vector<4x32x16xbf16>, vector<4x32x16xbf16>, vector<4x32x32xf32> -> vector<4x32x32xf32>
    "tpu.trace_stop"() : () -> ()
    %cst_22 = arith.constant dense<0xFF800000> : vector<4x32xf32>
    %66 = vector.multi_reduction <maximumf>, %65, %cst_22 [2] : vector<4x32x32xf32> to vector<4x32xf32>
    %67 = vector.shape_cast %66 : vector<4x32xf32> to vector<4x32x1xf32>
    %68 = vector.broadcast %67 : vector<4x32x1xf32> to vector<4x32x32xf32>
    %69 = arith.subf %65, %68 : vector<4x32x32xf32>
    %70 = math.exp %69 : vector<4x32x32xf32>
    %cst_23 = arith.constant dense<0.000000e+00> : vector<4x32xf32>
    %71 = vector.multi_reduction <add>, %70, %cst_23 [2] : vector<4x32x32xf32> to vector<4x32xf32>
    %72 = vector.shape_cast %71 : vector<4x32xf32> to vector<4x32x1xf32>
    %73 = tpu.reciprocal %72 {approx = true} : vector<4x32x1xf32> -> vector<4x32x1xf32>
    %74 = arith.truncf %70 : vector<4x32x32xf32> to vector<4x32x32xbf16>
    %75 = vector.extract_strided_slice %46 {offsets = [0, 0, 16], sizes = [4, 32, 16], strides = [1, 1, 1]} : vector<4x32x48xbf16> to vector<4x32x16xbf16>
    "tpu.trace_start"() <{level = 10 : i32, message = "blm,bmd->bld"}> : () -> ()
    %cst_24 = arith.constant dense<0.000000e+00> : vector<4x32x16xf32>
    %76 = tpu.matmul %74, %75, %cst_24 {dimension_numbers = #tpu.dot_dimension_numbers<[2], [1], [1], [2], [0, 0, 0, 1, 1, 2], [0], [0]>} : vector<4x32x32xbf16>, vector<4x32x16xbf16>, vector<4x32x16xf32> -> vector<4x32x16xf32>
    "tpu.trace_stop"() : () -> ()
    %77 = vector.broadcast %73 : vector<4x32x1xf32> to vector<4x32x16xf32>
    %78 = arith.mulf %76, %77 : vector<4x32x16xf32>
    %79 = vector.extract_strided_slice %40 {offsets = [0, 0, 32], sizes = [4, 32, 16], strides = [1, 1, 1]} : vector<4x32x48xbf16> to vector<4x32x16xbf16>
    %80 = vector.extract_strided_slice %43 {offsets = [0, 0, 32], sizes = [4, 32, 16], strides = [1, 1, 1]} : vector<4x32x48xbf16> to vector<4x32x16xbf16>
    "tpu.trace_start"() <{level = 10 : i32, message = "bld,bmd->blm"}> : () -> ()
    %cst_25 = arith.constant dense<0.000000e+00> : vector<4x32x32xf32>
    %81 = tpu.matmul %79, %80, %cst_25 {dimension_numbers = #tpu.dot_dimension_numbers<[2], [2], [1], [1], [0, 0, 0, 1, 1, 1], [0], [0]>} : vector<4x32x16xbf16>, vector<4x32x16xbf16>, vector<4x32x32xf32> -> vector<4x32x32xf32>
    "tpu.trace_stop"() : () -> ()
    %cst_26 = arith.constant dense<0xFF800000> : vector<4x32xf32>
    %82 = vector.multi_reduction <maximumf>, %81, %cst_26 [2] : vector<4x32x32xf32> to vector<4x32xf32>
    %83 = vector.shape_cast %82 : vector<4x32xf32> to vector<4x32x1xf32>
    %84 = vector.broadcast %83 : vector<4x32x1xf32> to vector<4x32x32xf32>
    %85 = arith.subf %81, %84 : vector<4x32x32xf32>
    %86 = math.exp %85 : vector<4x32x32xf32>
    %cst_27 = arith.constant dense<0.000000e+00> : vector<4x32xf32>
    %87 = vector.multi_reduction <add>, %86, %cst_27 [2] : vector<4x32x32xf32> to vector<4x32xf32>
    %88 = vector.shape_cast %87 : vector<4x32xf32> to vector<4x32x1xf32>
    %89 = tpu.reciprocal %88 {approx = true} : vector<4x32x1xf32> -> vector<4x32x1xf32>
    %90 = arith.truncf %86 : vector<4x32x32xf32> to vector<4x32x32xbf16>
    %91 = vector.extract_strided_slice %46 {offsets = [0, 0, 32], sizes = [4, 32, 16], strides = [1, 1, 1]} : vector<4x32x48xbf16> to vector<4x32x16xbf16>
    "tpu.trace_start"() <{level = 10 : i32, message = "blm,bmd->bld"}> : () -> ()
    %cst_28 = arith.constant dense<0.000000e+00> : vector<4x32x16xf32>
    %92 = tpu.matmul %90, %91, %cst_28 {dimension_numbers = #tpu.dot_dimension_numbers<[2], [1], [1], [2], [0, 0, 0, 1, 1, 2], [0], [0]>} : vector<4x32x32xbf16>, vector<4x32x16xbf16>, vector<4x32x16xf32> -> vector<4x32x16xf32>
    "tpu.trace_stop"() : () -> ()
    %93 = vector.broadcast %89 : vector<4x32x1xf32> to vector<4x32x16xf32>
    %94 = arith.mulf %92, %93 : vector<4x32x16xf32>
    %95 = tpu.concatenate %62, %78, %94 in 2 : vector<4x32x16xf32>, vector<4x32x16xf32>, vector<4x32x16xf32> -> vector<4x32x48xf32>
    %96 = vector.shape_cast %95 : vector<4x32x48xf32> to vector<128x48xf32>
    %97 = arith.truncf %96 : vector<128x48xf32> to vector<128x48xbf16>
    %c0_29 = arith.constant 0 : index
    %c0_30 = arith.constant 0 : index
    %98 = vector.load %arg7[%c0_29, %c0_30] : memref<48x48xbf16, #tpu.memory_space<vmem>>, vector<48x48xbf16>
    %cst_31 = arith.constant dense<0.000000e+00> : vector<128x48xf32>
    %99 = tpu.matmul %97, %98, %cst_31 {dimension_numbers = #tpu.dot_dimension_numbers<[1], [0], [0], [1], [0, 0, 1, 1], [], []>} : vector<128x48xbf16>, vector<48x48xbf16>, vector<128x48xf32> -> vector<128x48xf32>
    %c0_32 = arith.constant 0 : index
    %c0_33 = arith.constant 0 : index
    %100 = vector.load %arg8[%c0_32, %c0_33] : memref<1x48xf32, #tpu.memory_space<vmem>>, vector<1x48xf32>
    %101 = vector.broadcast %100 : vector<1x48xf32> to vector<128x48xf32>
    %102 = arith.addf %99, %101 : vector<128x48xf32>
    %103 = arith.addf %102, %1 : vector<128x48xf32>
    %cst_34 = arith.constant dense<0.000000e+00> : vector<128xf32>
    %104 = vector.multi_reduction <add>, %103, %cst_34 [1] : vector<128x48xf32> to vector<128xf32>
    %105 = vector.shape_cast %104 : vector<128xf32> to vector<128x1xf32>
    %cst_35 = arith.constant 4.800000e+01 : f32
    %106 = vector.broadcast %cst_35 : f32 to vector<128x1xf32>
    %107 = arith.divf %105, %106 : vector<128x1xf32>
    %108 = vector.broadcast %107 : vector<128x1xf32> to vector<128x48xf32>
    %109 = arith.subf %103, %108 : vector<128x48xf32>
    %110 = arith.mulf %109, %109 : vector<128x48xf32>
    %cst_36 = arith.constant dense<0.000000e+00> : vector<128xf32>
    %111 = vector.multi_reduction <add>, %110, %cst_36 [1] : vector<128x48xf32> to vector<128xf32>
    %112 = vector.shape_cast %111 : vector<128xf32> to vector<128x1xf32>
    %cst_37 = arith.constant 4.800000e+01 : f32
    %113 = vector.broadcast %cst_37 : f32 to vector<128x1xf32>
    %114 = arith.divf %112, %113 : vector<128x1xf32>
    %115 = vector.broadcast %107 : vector<128x1xf32> to vector<128x48xf32>
    %116 = arith.subf %103, %115 : vector<128x48xf32>
    %cst_38 = arith.constant 9.99999974E-6 : f32
    %117 = vector.broadcast %cst_38 : f32 to vector<128x1xf32>
    %118 = arith.addf %114, %117 : vector<128x1xf32>
    %119 = math.rsqrt %118 : vector<128x1xf32>
    %120 = vector.broadcast %119 : vector<128x1xf32> to vector<128x48xf32>
    %121 = arith.mulf %116, %120 : vector<128x48xf32>
    %c0_39 = arith.constant 0 : index
    %c0_40 = arith.constant 0 : index
    %122 = vector.load %arg9[%c0_39, %c0_40] : memref<1x48xf32, #tpu.memory_space<vmem>>, vector<1x48xf32>
    %123 = vector.broadcast %122 : vector<1x48xf32> to vector<128x48xf32>
    %124 = arith.mulf %121, %123 : vector<128x48xf32>
    %c0_41 = arith.constant 0 : index
    %c0_42 = arith.constant 0 : index
    %125 = vector.load %arg10[%c0_41, %c0_42] : memref<1x48xf32, #tpu.memory_space<vmem>>, vector<1x48xf32>
    %126 = vector.broadcast %125 : vector<1x48xf32> to vector<128x48xf32>
    %127 = arith.addf %124, %126 : vector<128x48xf32>
    %128 = arith.truncf %127 : vector<128x48xf32> to vector<128x48xbf16>
    %c0_43 = arith.constant 0 : index
    %c0_44 = arith.constant 0 : index
    %129 = vector.load %arg11[%c0_43, %c0_44] : memref<48x192xbf16, #tpu.memory_space<vmem>>, vector<48x192xbf16>
    %cst_45 = arith.constant dense<0.000000e+00> : vector<128x192xf32>
    %130 = tpu.matmul %128, %129, %cst_45 {dimension_numbers = #tpu.dot_dimension_numbers<[1], [0], [0], [1], [0, 0, 1, 1], [], []>} : vector<128x48xbf16>, vector<48x192xbf16>, vector<128x192xf32> -> vector<128x192xf32>
    %c0_46 = arith.constant 0 : index
    %c0_47 = arith.constant 0 : index
    %131 = vector.load %arg12[%c0_46, %c0_47] : memref<1x192xf32, #tpu.memory_space<vmem>>, vector<1x192xf32>
    %132 = vector.broadcast %131 : vector<1x192xf32> to vector<128x192xf32>
    %133 = arith.addf %130, %132 : vector<128x192xf32>
    %134 = arith.mulf %133, %133 : vector<128x192xf32>
    %135 = arith.mulf %133, %134 : vector<128x192xf32>
    %cst_48 = arith.constant 4.471500e-02 : f32
    %136 = vector.broadcast %cst_48 : f32 to vector<128x192xf32>
    %137 = arith.mulf %136, %135 : vector<128x192xf32>
    %138 = arith.addf %133, %137 : vector<128x192xf32>
    %cst_49 = arith.constant 0.797884583 : f32
    %139 = vector.broadcast %cst_49 : f32 to vector<128x192xf32>
    %140 = arith.mulf %139, %138 : vector<128x192xf32>
    %141 = math.tanh %140 : vector<128x192xf32>
    %cst_50 = arith.constant 1.000000e+00 : f32
    %142 = vector.broadcast %cst_50 : f32 to vector<128x192xf32>
    %143 = arith.addf %142, %141 : vector<128x192xf32>
    %cst_51 = arith.constant 5.000000e-01 : f32
    %144 = vector.broadcast %cst_51 : f32 to vector<128x192xf32>
    %145 = arith.mulf %144, %143 : vector<128x192xf32>
    %146 = arith.mulf %133, %145 : vector<128x192xf32>
    %147 = arith.truncf %146 : vector<128x192xf32> to vector<128x192xbf16>
    %c0_52 = arith.constant 0 : index
    %c0_53 = arith.constant 0 : index
    %148 = vector.load %arg13[%c0_52, %c0_53] : memref<192x48xbf16, #tpu.memory_space<vmem>>, vector<192x48xbf16>
    %cst_54 = arith.constant dense<0.000000e+00> : vector<128x48xf32>
    %149 = tpu.matmul %147, %148, %cst_54 {dimension_numbers = #tpu.dot_dimension_numbers<[1], [0], [0], [1], [0, 0, 1, 1], [], []>} : vector<128x192xbf16>, vector<192x48xbf16>, vector<128x48xf32> -> vector<128x48xf32>
    %c0_55 = arith.constant 0 : index
    %c0_56 = arith.constant 0 : index
    %150 = vector.load %arg14[%c0_55, %c0_56] : memref<1x48xf32, #tpu.memory_space<vmem>>, vector<1x48xf32>
    %151 = vector.broadcast %150 : vector<1x48xf32> to vector<128x48xf32>
    %152 = arith.addf %149, %151 : vector<128x48xf32>
    %153 = arith.addf %103, %152 : vector<128x48xf32>
    %c0_57 = arith.constant 0 : index
    %c0_58 = arith.constant 0 : index
    %c0_59 = arith.constant 0 : index
    %154 = vector.load %arg15[%c0_57, %c0_58, %c0_59] : memref<1x128x48xf32, #tpu.memory_space<vmem>>, vector<1x128x48xf32>
    %155 = vector.shape_cast %154 : vector<1x128x48xf32> to vector<128x48xf32>
    %156 = vector.shape_cast %153 : vector<128x48xf32> to vector<1x128x48xf32>
    tpu.vector_store %arg15[%c0_57, %c0_58, %c0_59], %156 {strides = array<i32>} : memref<1x128x48xf32, #tpu.memory_space<vmem>>, vector<1x128x48xf32>,
    return
  }
  func.func @transform_0(%arg0: i32) -> (i32, i32, i32) {
    %c0_i32 = arith.constant 0 : i32
    %c0_i32_0 = arith.constant 0 : i32
    %c0_i32_1 = arith.constant 0 : i32
    return %arg0, %c0_i32, %c0_i32_0 : i32, i32, i32
  }
  func.func @transform_1(%arg0: i32) -> (i32, i32) {
    %c0_i32 = arith.constant 0 : i32
    %c0_i32_0 = arith.constant 0 : i32
    %c0_i32_1 = arith.constant 0 : i32
    return %c0_i32, %c0_i32_0 : i32, i32
  }
  func.func @transform_2(%arg0: i32) -> (i32, i32) {
    %c0_i32 = arith.constant 0 : i32
    %c0_i32_0 = arith.constant 0 : i32
    %c0_i32_1 = arith.constant 0 : i32
    return %c0_i32, %c0_i32_0 : i32, i32
  }
  func.func @transform_3(%arg0: i32) -> (i32, i32) {
    %c0_i32 = arith.constant 0 : i32
    %c0_i32_0 = arith.constant 0 : i32
    %c0_i32_1 = arith.constant 0 : i32
    return %c0_i32, %c0_i32_0 : i32, i32
  }
  func.func @transform_4(%arg0: i32) -> (i32, i32) {
    %c0_i32 = arith.constant 0 : i32
    %c0_i32_0 = arith.constant 0 : i32
    %c0_i32_1 = arith.constant 0 : i32
    return %c0_i32, %c0_i32_0 : i32, i32
  }
  func.func @transform_5(%arg0: i32) -> (i32, i32) {
    %c0_i32 = arith.constant 0 : i32
    %c0_i32_0 = arith.constant 0 : i32
    %c0_i32_1 = arith.constant 0 : i32
    return %c0_i32, %c0_i32_0 : i32, i32
  }
  func.func @transform_6(%arg0: i32) -> (i32, i32) {
    %c0_i32 = arith.constant 0 : i32
    %c0_i32_0 = arith.constant 0 : i32
    %c0_i32_1 = arith.constant 0 : i32
    return %c0_i32, %c0_i32_0 : i32, i32
  }
  func.func @transform_7(%arg0: i32) -> (i32, i32) {
    %c0_i32 = arith.constant 0 : i32
    %c0_i32_0 = arith.constant 0 : i32
    %c0_i32_1 = arith.constant 0 : i32
    return %c0_i32, %c0_i32_0 : i32, i32
  }
  func.func @transform_8(%arg0: i32) -> (i32, i32) {
    %c0_i32 = arith.constant 0 : i32
    %c0_i32_0 = arith.constant 0 : i32
    %c0_i32_1 = arith.constant 0 : i32
    return %c0_i32, %c0_i32_0 : i32, i32
  }
  func.func @transform_9(%arg0: i32) -> (i32, i32) {
    %c0_i32 = arith.constant 0 : i32
    %c0_i32_0 = arith.constant 0 : i32
    %c0_i32_1 = arith.constant 0 : i32
    return %c0_i32, %c0_i32_0 : i32, i32
  }
  func.func @transform_10(%arg0: i32) -> (i32, i32) {
    %c0_i32 = arith.constant 0 : i32
    %c0_i32_0 = arith.constant 0 : i32
    %c0_i32_1 = arith.constant 0 : i32
    return %c0_i32, %c0_i32_0 : i32, i32
  }
  func.func @transform_11(%arg0: i32) -> (i32, i32) {
    %c0_i32 = arith.constant 0 : i32
    %c0_i32_0 = arith.constant 0 : i32
    %c0_i32_1 = arith.constant 0 : i32
    return %c0_i32, %c0_i32_0 : i32, i32
  }
  func.func @transform_12(%arg0: i32) -> (i32, i32) {
    %c0_i32 = arith.constant 0 : i32
    %c0_i32_0 = arith.constant 0 : i32
    %c0_i32_1 = arith.constant 0 : i32
    return %c0_i32, %c0_i32_0 : i32, i32
  }
  func.func @transform_13(%arg0: i32) -> (i32, i32) {
    %c0_i32 = arith.constant 0 : i32
    %c0_i32_0 = arith.constant 0 : i32
    %c0_i32_1 = arith.constant 0 : i32
    return %c0_i32, %c0_i32_0 : i32, i32
  }
  func.func @transform_14(%arg0: i32) -> (i32, i32, i32) {
    %c0_i32 = arith.constant 0 : i32
    %c0_i32_0 = arith.constant 0 : i32
    %c0_i32_1 = arith.constant 0 : i32
    return %arg0, %c0_i32, %c0_i32_0 : i32, i32, i32
  }
}

</mosaic_0001>

<bundles_post_ra>
// kernel: temporal_transformer_forward.1
= control target key start
LH: loop header
LB: loop body
LE: loop exit
PB: predicated region body
PF: predicated region fallthrough
CT: control target
= control target key end

     0   :  { %s5478_s29 = smov 0   ;;  %s7527_s0 = inlined_call_operand.vmem [shape: f32[2,128,48], index: 0, kind: input, shape index: {}]   ;;  %s7528_s1 = inlined_call_operand.vmem [shape: f32[32,48], index: 1, kind: input, shape index: {}]   ;;  %s7529_s2 = inlined_call_operand.vmem [shape: f32[1,48], index: 2, kind: input, shape index: {}]   ;;  %s7530_s3 = inlined_call_operand.vmem [shape: f32[1,48], index: 3, kind: input, shape index: {}]   ;;  %s7531_s4 = inlined_call_operand.vmem [shape: bf16[48,144], index: 4, kind: input, shape index: {}]   ;;  %s7532_s5 = inlined_call_operand.vmem [shape: f32[1,144], index: 5, kind: input, shape index: {}]   ;;  %s7533_s6 = inlined_call_operand.vmem [shape: bf16[48,48], index: 6, kind: input, shape index: {}]   ;;  %s7534_s7 = inlined_call_operand.vmem [shape: f32[1,48], index: 7, kind: input, shape index: {}]   ;;  %s7535_s8 = inlined_call_operand.vmem [shape: f32[1,48], index: 8, kind: input, shape index: {}]   ;;  %s7536_s9 = inlined_call_operand.vmem [shape: f32[1,48], index: 9, kind: input, shape index: {}]   ;;  %s7537_s10 = inlined_call_operand.vmem [shape: bf16[48,192], index: 10, kind: input, shape index: {}]   ;;  %s7538_s11 = inlined_call_operand.vmem [shape: f32[1,192], index: 11, kind: input, shape index: {}]   ;;  %s7539_s12 = inlined_call_operand.vmem [shape: bf16[192,48], index: 12, kind: input, shape index: {}]   ;;  %s7540_s13 = inlined_call_operand.vmem [shape: f32[1,48], index: 13, kind: input, shape index: {}]   ;;  %s7541_s14 = inlined_call_operand.vmem [shape: f32[2,128,48], index: 14, kind: output, shape index: {}]  }
   0x1 LB: > { %s4451_s30 = sadd.s32 4294967295, %s5393_s29   ;;  %p4455_p0 = scmp.ge.s32.totalorder %s5393_s29, 1  ;;  %s5393_s29 = sphi %s5478_s29, %s24_s29  }
   0x2   : > { %p412_p1 = scmp.lt.s32.totalorder %s5393_s29, 3 }
   0x4   : > { %p413_p2 = pnand %p4455_p0, %p412_p1 }
   0x6   : > { %416 = sbr.rel (%p413_p2) target bundleno = 3327 (0xcff), region = 76 }
   0xb   : > { %p458_p3 = scmp.lt.s32.totalorder %s4451_s30, 1  ;;  %vm485_vm0 = vcmask 392192   ;;  %vm976_vm1 = vcmask 130048   ;;  %s5396_s21 = smov 80   ;;  %vm1239_vm2 = vcmask 261120   ;;  %vm4242_vm3 = vcmask 523264  }
   0xc   : > { %s5397_s22 = smov 32   ;;  %s5398_s23 = smov 64  }
   0xd   : > { %s7606_s30 = smov (!%p458_p3, %s4451_s30), 1  ;;  %s5399_s24 = smov 112  }
   0xe   : > { %s4575_s15 = sshll.u32 %s7606_s30, 7  ;;  %s5400_s25 = smov 16  }
   0xf   : > { %s5494_s18 = scalar_lea.vmem %s7527_s0, %s4575_s15  ;;  %s5401_s26 = smov 48  }
  0x10   : > { %v469_v0 = vld [vmem:[%s5494_s18] sm:$0xff]  ;;  %v471_v1 = vld [vmem:[%s5494_s18 + $0x10] sm:$0xff]  ;;  %v470_v2 = vld [vmem:[%s5494_s18 + $0x8] sm:$0xff]  ;;  %s5402_s27 = smov 96   ;;  %s7459_s17 = scalar_lea.vmem %s7541_s14, %s4575_s15 }
  0x11   : > { %v486_v3 = vsel %vm485_vm0, %v469_v0, 0.0  ;;  %v492_v4 = vsel %vm485_vm0, %v471_v1, 0.0  ;;  %v472_v5 = vld [vmem:[%s5494_s18 + $0x18] sm:$0xff]  ;;  %v5503_v6 = vld [vmem:[%s5494_s18 + $0x20] sm:$0xff]  ;;  %v5506_v7 = vld [vmem:[%s5494_s18 + $0x28] sm:$0xff]  ;;  %v489_v8 = vsel %vm485_vm0, %v470_v2, 0.0 }
  0x12   : > { %487 = vadd.xlane.f32.xlu0 %v486_v3  ;;  %493 = vadd.xlane.f32.xlu1 %v492_v4  ;;  %v495_v9 = vsel %vm485_vm0, %v472_v5, 0.0  ;;  %v5511_v10 = vld [vmem:[%s5494_s18 + $0x30] sm:$0xff]  ;;  %v5514_v11 = vld [vmem:[%s5494_s18 + $0x38] sm:$0xff]  ;;  %v498_v12 = vsel %vm485_vm0, %v5503_v6, 0.0  ;;  %v501_v13 = vsel %vm485_vm0, %v5506_v7, 0.0  ;;  %v5525_v16 = vld [vmem:[%s5494_s18 + $0x40] sm:$0xff] }
  0x13   : > { %v504_v14 = vsel %vm485_vm0, %v5511_v10, 0.0  ;;  %v507_v15 = vsel %vm485_vm0, %v5514_v11, 0.0  ;;  %v5528_v17 = vld [vmem:[%s5494_s18 + $0x48] sm:$0xff]  ;;  %v510_v18 = vsel %vm485_vm0, %v5525_v16, 0.0  ;;  %v5535_v20 = vld [vmem:[%s5494_s18 + $0x50] sm:$0xff]  ;;  %v5538_v21 = vld [vmem:[%s5494_s18 + $0x58] sm:$0xff] }
  0x14   : > { %v513_v19 = vsel %vm485_vm0, %v5528_v17, 0.0  ;;  %v516_v22 = vsel %vm485_vm0, %v5535_v20, 0.0  ;;  %v519_v23 = vsel %vm485_vm0, %v5538_v21, 0.0  ;;  %v5545_v24 = vld [vmem:[%s5494_s18 + $0x60] sm:$0xff]  ;;  %v5548_v25 = vld [vmem:[%s5494_s18 + $0x68] sm:$0xff]  ;;  %v5555_v28 = vld [vmem:[%s5494_s18 + $0x70] sm:$0xff] }
  0x15   : > { %v522_v26 = vsel %vm485_vm0, %v5545_v24, 0.0  ;;  %v525_v27 = vsel %vm485_vm0, %v5548_v25, 0.0  ;;  %v5558_v29 = vld [vmem:[%s5494_s18 + $0x78] sm:$0xff]  ;;  %v528_v30 = vsel %vm485_vm0, %v5555_v28, 0.0 }
  0x16   : > { %490 = vadd.xlane.f32.xlu0 %v489_v8  ;;  %496 = vadd.xlane.f32.xlu1 %v495_v9  ;;  %v531_v31 = vsel %vm485_vm0, %v5558_v29, 0.0 }
  0x1a   : > { %499 = vadd.xlane.f32.xlu0 %v498_v12  ;;  %502 = vadd.xlane.f32.xlu1 %v501_v13 }
  0x1e   : > { %505 = vadd.xlane.f32.xlu0 %v504_v14  ;;  %508 = vadd.xlane.f32.xlu1 %v507_v15 }
  0x22   : > { %511 = vadd.xlane.f32.xlu0 %v510_v18  ;;  %514 = vadd.xlane.f32.xlu1 %v513_v19 }
  0x26   : > { %517 = vadd.xlane.f32.xlu0 %v516_v22  ;;  %520 = vadd.xlane.f32.xlu1 %v519_v23 }
  0x2a   : > { %523 = vadd.xlane.f32.xlu0 %v522_v26  ;;  %526 = vadd.xlane.f32.xlu1 %v525_v27 }
  0x2e   : > { %529 = vadd.xlane.f32.xlu0 %v528_v30  ;;  %532 = vadd.xlane.f32.xlu1 %v531_v31 }
  0x9b   : > { %v488_v32 = vpop.xlane.xlu0 %487  ;;  %v494_v33 = vpop.xlane.xlu1 %493 }
  0x9c   : > { %v535_v34 = vmul.f32 0.020833334, %v488_v32  ;;  %v537_v35 = vmul.f32 0.020833334, %v494_v33 }
  0x9e   : > { %v5564_v36 = vsub.f32 %v469_v0, %v535_v34  ;;  %v5566_v37 = vsub.f32 %v471_v1, %v537_v35 }
  0x9f   : > { %v491_v38 = vpop.xlane.xlu0 %490  ;;  %v497_v39 = vpop.xlane.xlu1 %496 }
  0xa0   : > { %v536_v40 = vmul.f32 0.020833334, %v491_v38  ;;  %v538_v41 = vmul.f32 0.020833334, %v497_v39  ;;  %v567_v42 = vmul.f32 %v5564_v36, %v5564_v36  ;;  %v569_v43 = vmul.f32 %v5566_v37, %v5566_v37 }
  0xa2   : > { %v5572_v44 = vsub.f32 %v470_v2, %v536_v40  ;;  %v5574_v45 = vsub.f32 %v472_v5, %v538_v41  ;;  %v583_v46 = vsel %vm485_vm0, %v567_v42, 0.0  ;;  %v589_v49 = vsel %vm485_vm0, %v569_v43, 0.0 }
  0xa3   : > { %584 = vadd.xlane.f32.xlu0 %v583_v46  ;;  %v500_v47 = vpop.xlane.xlu0 %499  ;;  %v503_v48 = vpop.xlane.xlu1 %502 }
  0xa4   : > { %v539_v50 = vmul.f32 0.020833334, %v500_v47  ;;  %v540_v51 = vmul.f32 0.020833334, %v503_v48  ;;  %v568_v52 = vmul.f32 %v5572_v44, %v5572_v44  ;;  %v570_v53 = vmul.f32 %v5574_v45, %v5574_v45 }
  0xa6   : > { %v5583_v54 = vsub.f32 %v5503_v6, %v539_v50  ;;  %v5586_v55 = vsub.f32 %v5506_v7, %v540_v51  ;;  %v586_v56 = vsel %vm485_vm0, %v568_v52, 0.0  ;;  %v592_v59 = vsel %vm485_vm0, %v570_v53, 0.0  ;;  %v5020_v53 = vld [vmem:[%s7531_s4 + $0x20] ss:$8 sps:$4 sm:$0xff]  }
  0xa7   : > { %590 = vadd.xlane.f32.xlu0 %v589_v49  ;;  %587 = vadd.xlane.f32.xlu1 %v586_v56  ;;  %v506_v57 = vpop.xlane.xlu0 %505  ;;  %v509_v58 = vpop.xlane.xlu1 %508  ;;  %v5021_v56 = vld [vmem:[%s7531_s4 + $0x14] ss:$8 sps:$4 sm:$0xff]  }
  0xa8   : > { %v541_v60 = vmul.f32 0.020833334, %v506_v57  ;;  %v542_v61 = vmul.f32 0.020833334, %v509_v58  ;;  %v571_v62 = vmul.f32 %v5583_v54, %v5583_v54  ;;  %v572_v63 = vmul.f32 %v5586_v55, %v5586_v55  ;;  %v5023_v57 = vld [vmem:[%s7531_s4 + $0x10] ss:$8 sps:$4 sm:$0xff]  }
  0xa9   : > { %v5024_v58 = vld [vmem:[%s7531_s4 + $0x4] ss:$8 sps:$4 sm:$0xff]  }
  0xaa   : > { %v5595_v0 = vsub.f32 %v5511_v10, %v541_v60  ;;  %v5598_v1 = vsub.f32 %v5514_v11, %v542_v61  ;;  %v595_v2 = vsel %vm485_vm0, %v571_v62, 0.0  ;;  %v598_v5 = vsel %vm485_vm0, %v572_v63, 0.0 }
  0xab   : > { %593 = vadd.xlane.f32.xlu1 %v592_v59  ;;  %596 = vadd.xlane.f32.xlu0 %v595_v2  ;;  %v512_v3 = vpop.xlane.xlu0 %511  ;;  %v515_v4 = vpop.xlane.xlu1 %514  ;;  %v5026_v59 = vld [vmem:[%s7531_s4] ss:$8 sps:$4 sm:$0xff]   ;;  %v7544_v60 = vmov 0  }
  0xac   : > { %v543_v6 = vmul.f32 0.020833334, %v512_v3  ;;  %v544_v7 = vmul.f32 0.020833334, %v515_v4  ;;  %v573_v8 = vmul.f32 %v5595_v0, %v5595_v0  ;;  %v574_v9 = vmul.f32 %v5598_v1, %v5598_v1  ;;  %873 = vmatprep.mubr.bf16.mxu0 %v7544_v60 }
  0xae   : > { %v5607_v10 = vsub.f32 %v5525_v16, %v543_v6  ;;  %v5610_v11 = vsub.f32 %v5528_v17, %v544_v7  ;;  %v601_v12 = vsel %vm485_vm0, %v573_v8, 0.0  ;;  %v604_v15 = vsel %vm485_vm0, %v574_v9, 0.0 }
  0xaf   : > { %599 = vadd.xlane.f32.xlu1 %v598_v5  ;;  %602 = vadd.xlane.f32.xlu0 %v601_v12  ;;  %v518_v13 = vpop.xlane.xlu0 %517  ;;  %v521_v14 = vpop.xlane.xlu1 %520 }
  0xb0   : > { %v545_v18 = vmul.f32 0.020833334, %v518_v13  ;;  %v546_v19 = vmul.f32 0.020833334, %v521_v14  ;;  %v575_v22 = vmul.f32 %v5607_v10, %v5607_v10  ;;  %v576_v16 = vmul.f32 %v5610_v11, %v5610_v11 }
  0xb2   : > { %v5619_v23 = vsub.f32 %v5535_v20, %v545_v18  ;;  %v5622_v17 = vsub.f32 %v5538_v21, %v546_v19  ;;  %v607_v26 = vsel %vm485_vm0, %v575_v22, 0.0  ;;  %v610_v31 = vsel %vm485_vm0, %v576_v16, 0.0 }
  0xb3   : > { %605 = vadd.xlane.f32.xlu1 %v604_v15  ;;  %608 = vadd.xlane.f32.xlu0 %v607_v26  ;;  %v524_v27 = vpop.xlane.xlu0 %523  ;;  %v527_v30 = vpop.xlane.xlu1 %526 }
  0xb4   : > { %v547_v32 = vmul.f32 0.020833334, %v524_v27  ;;  %v548_v33 = vmul.f32 0.020833334, %v527_v30  ;;  %v577_v34 = vmul.f32 %v5619_v23, %v5619_v23  ;;  %v578_v20 = vmul.f32 %v5622_v17, %v5622_v17 }
  0xb6   : > { %v5631_v35 = vsub.f32 %v5545_v24, %v547_v32  ;;  %v5634_v21 = vsub.f32 %v5548_v25, %v548_v33  ;;  %v613_v38 = vsel %vm485_vm0, %v577_v34, 0.0  ;;  %v616_v41 = vsel %vm485_vm0, %v578_v20, 0.0  ;;  %v5678_v32 = vld [vmem:[%s7529_s2] ss:$0 sm:$0xff] }
  0xb7   : > { %611 = vadd.xlane.f32.xlu1 %v610_v31  ;;  %614 = vadd.xlane.f32.xlu0 %v613_v38  ;;  %v530_v39 = vpop.xlane.xlu0 %529  ;;  %v533_v40 = vpop.xlane.xlu1 %532 }
  0xb8   : > { %v549_v42 = vmul.f32 0.020833334, %v530_v39  ;;  %v550_v43 = vmul.f32 0.020833334, %v533_v40  ;;  %v579_v46 = vmul.f32 %v5631_v35, %v5631_v35  ;;  %v580_v24 = vmul.f32 %v5634_v21, %v5634_v21 }
  0xba   : > { %v5643_v47 = vsub.f32 %v5555_v28, %v549_v42  ;;  %v5646_v25 = vsub.f32 %v5558_v29, %v550_v43  ;;  %v619_v48 = vsel %vm485_vm0, %v579_v46, 0.0  ;;  %v622_v49 = vsel %vm485_vm0, %v580_v24, 0.0  ;;  %v5018_v29 = vld [vmem:[%s7531_s4 + $0x24] ss:$8 sps:$4 sm:$0xff]   ;;  %v5685_v42 = vld [vmem:[%s7530_s3] ss:$0 sm:$0xff] }
  0xbb   : > { %617 = vadd.xlane.f32.xlu1 %v616_v41  ;;  %620 = vadd.xlane.f32.xlu0 %v619_v48 }
  0xbc   : > { %v581_v50 = vmul.f32 %v5643_v47, %v5643_v47  ;;  %v582_v51 = vmul.f32 %v5646_v25, %v5646_v25  ;;  %851 = vmatprep.subr.bf16.mxu0 %v5018_v29 }
  0xbd   : > { %852 = vmatpush1.bf16.msra.mxu0 %v5020_v53 }
  0xbe   : > { %v625_v52 = vsel %vm485_vm0, %v581_v50, 0.0  ;;  %v628_v28 = vsel %vm485_vm0, %v582_v51, 0.0  ;;  %853 = vmatprep.subr.bf16.mxu0 %v5021_v56 }
  0xbf   : > { %623 = vadd.xlane.f32.xlu1 %v622_v49  ;;  %626 = vadd.xlane.f32.xlu0 %v625_v52  ;;  %v5694_v52 = vld [vmem:[%s7528_s1] sm:$0xff] }
  0xc1   : > { %854 = vmatpush1.bf16.msra.mxu0 %v5023_v57 }
  0xc2   : > { %855 = vmatprep.subr.bf16.mxu0 %v5024_v58 }
  0xc3   : > { %629 = vadd.xlane.f32.xlu1 %v628_v28  ;;  %v5699_v28 = vld [vmem:[%s7528_s1 + $0x8] sm:$0xff] }
  0xc5   : > { %856 = vmatpush1.bf16.msra.mxu0 %v5026_v59 }
 0x12c   : > { %v585_v61 = vpop.xlane.xlu0 %584 }
 0x12d   : > { %v631_v62 = vmul.f32 0.020833334, %v585_v61 }
 0x12f   : > { %v647_v63 = vadd.f32 1e-05, %v631_v62 }
 0x130   : > { %v588_v2 = vpop.xlane.xlu1 %587  ;;  %v591_v3 = vpop.xlane.xlu0 %590 }
 0x131   : > { %5051 = vrsqrt.f32 %v647_v63  ;;  %v632_v4 = vmul.f32 0.020833334, %v588_v2  ;;  %v633_v5 = vmul.f32 0.020833334, %v591_v3 }
 0x133   : > { %v648_v6 = vadd.f32 1e-05, %v632_v4  ;;  %v649_v7 = vadd.f32 1e-05, %v633_v5 }
 0x134   : > { %v594_v8 = vpop.xlane.xlu1 %593  ;;  %v597_v9 = vpop.xlane.xlu0 %596 }
 0x135   : > { %5053 = vrsqrt.f32 %v648_v6  ;;  %v634_v12 = vmul.f32 0.020833334, %v594_v8  ;;  %v635_v13 = vmul.f32 0.020833334, %v597_v9  ;;  %v5712_v6 = vld [vmem:[%s7528_s1 + $0x18] sm:$0xff] }
 0x136   : > { %5055 = vrsqrt.f32 %v649_v7 }
 0x137   : > { %v650_v14 = vadd.f32 1e-05, %v634_v12  ;;  %v651_v15 = vadd.f32 1e-05, %v635_v13 }
 0x138   : > { %v600_v18 = vpop.xlane.xlu1 %599  ;;  %v603_v22 = vpop.xlane.xlu0 %602 }
 0x139   : > { %5057 = vrsqrt.f32 %v650_v14  ;;  %v636_v19 = vmul.f32 0.020833334, %v600_v18  ;;  %v637_v27 = vmul.f32 0.020833334, %v603_v22 }
 0x13a   : > { %5059 = vrsqrt.f32 %v651_v15 }
 0x13b   : > { %v652_v16 = vadd.f32 1e-05, %v636_v19  ;;  %v653_v38 = vadd.f32 1e-05, %v637_v27 }
 0x13c   : > { %v606_v26 = vpop.xlane.xlu1 %605  ;;  %v609_v39 = vpop.xlane.xlu0 %608 }
 0x13d   : > { %5061 = vrsqrt.f32 %v652_v16  ;;  %v638_v30 = vmul.f32 0.020833334, %v606_v26  ;;  %v639_v48 = vmul.f32 0.020833334, %v609_v39 }
 0x13e   : > { %v5052_v31 = vpop.eup %5051 }
 0x13f   : > { %v654_v33 = vadd.f32 1e-05, %v638_v30  ;;  %v679_v34 = vmul.f32 %v5052_v31, %v5564_v36  ;;  %v655_v58 = vadd.f32 1e-05, %v639_v48 }
 0x140   : > { %v612_v20 = vpop.xlane.xlu1 %611  ;;  %v615_v63 = vpop.xlane.xlu0 %614 }
 0x141   : > { %v702_v40 = vmul.f32 %v5678_v32, %v679_v34  ;;  %5063 = vrsqrt.f32 %v654_v33  ;;  %v640_v46 = vmul.f32 0.020833334, %v612_v20  ;;  %v641_v7 = vmul.f32 0.020833334, %v615_v63 }
 0x142   : > { %v5054_v41 = vpop.eup %5053  ;;  %5065 = vrsqrt.f32 %v653_v38 }
 0x143   : > { %v5056_v43 = vpop.eup %5055  ;;  %v680_v24 = vmul.f32 %v5054_v41, %v5572_v44  ;;  %v725_v49 = vadd.f32 %v5685_v42, %v702_v40  ;;  %v656_v44 = vadd.f32 1e-05, %v640_v46  ;;  %v657_v19 = vadd.f32 1e-05, %v641_v7 }
 0x144   : > { %v681_v50 = vmul.f32 %v5056_v43, %v5566_v37  ;;  %v618_v56 = vpop.xlane.xlu1 %617  ;;  %v621_v26 = vpop.xlane.xlu0 %620 }
 0x145   : > { %v703_v36 = vmul.f32 %v5678_v32, %v680_v24  ;;  %v745_v37 = vadd.f32 %v5694_v52, %v725_v49  ;;  %5067 = vrsqrt.f32 %v656_v44  ;;  %v642_v3 = vmul.f32 0.020833334, %v618_v56 }
 0x146   : > { %v5058_v51 = vpop.eup %5057  ;;  %v704_v61 = vmul.f32 %v5678_v32, %v681_v50  ;;  %5069 = vrsqrt.f32 %v655_v58  ;;  %v643_v34 = vmul.f32 0.020833334, %v621_v26 }
 0x147   : > { %v726_v29 = vadd.f32 %v5685_v42, %v703_v36  ;;  %v682_v53 = vmul.f32 %v5058_v51, %v5574_v45  ;;  %v5060_v57 = vpop.eup %5059  ;;  %v658_v12 = vadd.f32 1e-05, %v642_v3 }
 0x148   : > { %v727_v8 = vadd.f32 %v5685_v42, %v704_v61  ;;  %v683_v9 = vmul.f32 %v5060_v57, %v5583_v54  ;;  %v624_v13 = vpop.xlane.xlu1 %623  ;;  %v659_v24 = vadd.f32 1e-05, %v643_v34  ;;  %v627_v49 = vpop.xlane.xlu0 %626 }
 0x149   : > { %v746_v59 = vadd.f32 %v5699_v28, %v726_v29  ;;  %v705_v2 = vmul.f32 %v5678_v32, %v682_v53  ;;  %v644_v27 = vmul.f32 0.020833334, %v624_v13  ;;  %5071 = vrsqrt.f32 %v658_v12 }
 0x14a   : > { %v5062_v62 = vpop.eup %5061  ;;  %v706_v16 = vmul.f32 %v5678_v32, %v683_v9  ;;  %5073 = vrsqrt.f32 %v657_v19  ;;  %v645_v29 = vmul.f32 0.020833334, %v627_v49 }
 0x14b   : > { %v761_v4 = vpack.c.bf16 %v746_v59, %v745_v37  ;;  %v684_v5 = vmul.f32 %v5062_v62, %v5586_v55  ;;  %v728_v45 = vadd.f32 %v5685_v42, %v705_v2  ;;  %v5721_v55 = vld [vmem:[%s7528_s1 + $0x10] sm:$0xff]  ;;  %v660_v39 = vadd.f32 1e-05, %v644_v27 }
 0x14c   : > { %v747_v22 = vadd.f32 %v5721_v55, %v727_v8  ;;  %v729_v20 = vadd.f32 %v5685_v42, %v706_v16  ;;  %v630_v46 = vpop.xlane.xlu1 %629  ;;  %v661_v61 = vadd.f32 1e-05, %v645_v29 }
 0x14d   : > { %4468 = vmatmul.mubr.msk.bf16.vlgmr.msra.gmra.mxu0 %vm485_vm0, %v761_v4  ;;  %v748_v14 = vadd.f32 %v5712_v6, %v728_v45  ;;  %v707_v15 = vmul.f32 %v5678_v32, %v684_v5  ;;  %5075 = vrsqrt.f32 %v660_v39  ;;  %v646_v50 = vmul.f32 0.020833334, %v630_v46 }
 0x14e   : > { %883 = vmatprep.mubr.bf16.mxu0 %v7544_v60  ;;  %v5064_v18 = vpop.eup %5063  ;;  %5077 = vrsqrt.f32 %v659_v24  ;;  %v777_v46 = vlaneseq  ;;  %v775_v24 = vld [vmem:[%s7532_s5] sm:$0x3] }
 0x14f   : > { %v5066_v54 = vpop.eup %5065  ;;  %v762_v30 = vpack.c.bf16 %v748_v14, %v747_v22  ;;  %v730_v31 = vadd.f32 %v5685_v42, %v707_v15  ;;  %v686_v33 = vmul.f32 %v5064_v18, %v5598_v1  ;;  %v749_v1 = vadd.f32 %v5694_v52, %v729_v20 }
 0x150   : > { %v685_v38 = vmul.f32 %v5066_v54, %v5595_v0  ;;  %v662_v57 = vadd.f32 1e-05, %v646_v50 }
 0x151   : > { %v750_v40 = vadd.f32 %v5699_v28, %v730_v31  ;;  %v709_v41 = vmul.f32 %v5678_v32, %v686_v33 }
 0x152   : > { %v5068_v43 = vpop.eup %5067  ;;  %v708_v48 = vmul.f32 %v5678_v32, %v685_v38  ;;  %5079 = vrsqrt.f32 %v662_v57 }
 0x153   : > { %v5070_v36 = vpop.eup %5069  ;;  %v763_v51 = vpack.c.bf16 %v750_v40, %v749_v1  ;;  %v732_v0 = vadd.f32 %v5685_v42, %v709_v41  ;;  %v688_v44 = vmul.f32 %v5068_v43, %v5610_v11  ;;  %5081 = vrsqrt.f32 %v661_v61 }
 0x154   : > { %v731_v53 = vadd.f32 %v5685_v42, %v708_v48  ;;  %v687_v56 = vmul.f32 %v5070_v36, %v5607_v10 }
 0x155   : > { %4469 = vmatmul.mubr.msk.bf16.gmra.mxu0 %vm485_vm0, %v762_v30  ;;  %v752_v58 = vadd.f32 %v5712_v6, %v732_v0  ;;  %v711_v37 = vmul.f32 %v5678_v32, %v688_v44 }
 0x156   : > { %893 = vmatprep.mubr.bf16.mxu0 %v7544_v60  ;;  %v5072_v59 = vpop.eup %5071  ;;  %v751_v62 = vadd.f32 %v5721_v55, %v731_v53  ;;  %v710_v11 = vmul.f32 %v5678_v32, %v687_v56 }
 0x157   : > { %v5074_v63 = vpop.eup %5073  ;;  %v734_v3 = vadd.f32 %v5685_v42, %v711_v37  ;;  %v690_v10 = vmul.f32 %v5072_v59, %v5622_v17 }
 0x158   : > { %v764_v2 = vpack.c.bf16 %v752_v58, %v751_v62  ;;  %v733_v4 = vadd.f32 %v5685_v42, %v710_v11  ;;  %v689_v5 = vmul.f32 %v5074_v63, %v5619_v23 }
 0x159   : > { %v754_v7 = vadd.f32 %v5699_v28, %v734_v3  ;;  %v713_v8 = vmul.f32 %v5678_v32, %v690_v10 }
 0x15a   : > { %v5076_v45 = vpop.eup %5075  ;;  %v753_v9 = vadd.f32 %v5694_v52, %v733_v4  ;;  %v712_v12 = vmul.f32 %v5678_v32, %v689_v5 }
 0x15b   : > { %v5078_v13 = vpop.eup %5077  ;;  %v736_v14 = vadd.f32 %v5685_v42, %v713_v8  ;;  %v692_v15 = vmul.f32 %v5076_v45, %v5634_v21 }
 0x15c   : > { %v765_v17 = vpack.c.bf16 %v754_v7, %v753_v9  ;;  %v735_v23 = vadd.f32 %v5685_v42, %v712_v12  ;;  %v691_v18 = vmul.f32 %v5078_v13, %v5631_v35 }
 0x15d   : > { %4470 = vmatmul.mubr.msk.bf16.gmra.mxu0 %vm485_vm0, %v763_v51  ;;  %v756_v19 = vadd.f32 %v5712_v6, %v736_v14  ;;  %v715_v22 = vmul.f32 %v5678_v32, %v692_v15 }
 0x15e   : > { %903 = vmatprep.mubr.bf16.mxu0 %v7544_v60  ;;  %v755_v54 = vadd.f32 %v5721_v55, %v735_v23  ;;  %v714_v26 = vmul.f32 %v5678_v32, %v691_v18 }
 0x15f   : > { %v5080_v16 = vpop.eup %5079  ;;  %v738_v21 = vadd.f32 %v5685_v42, %v715_v22 }
 0x160   : > { %v5082_v27 = vpop.eup %5081  ;;  %v766_v30 = vpack.c.bf16 %v756_v19, %v755_v54  ;;  %v694_v31 = vmul.f32 %v5080_v16, %v5646_v25  ;;  %v737_v35 = vadd.f32 %v5685_v42, %v714_v26 }
 0x161   : > { %v693_v33 = vmul.f32 %v5082_v27, %v5643_v47  ;;  %v758_v34 = vadd.f32 %v5699_v28, %v738_v21 }
 0x162   : > { %v717_v20 = vmul.f32 %v5678_v32, %v694_v31  ;;  %v757_v38 = vadd.f32 %v5694_v52, %v737_v35  ;;  %v5784_v52 = vshrl.u32 %v777_v46, 7 }
 0x163   : > { %v716_v39 = vmul.f32 %v5678_v32, %v693_v33 }
 0x164   : > { %v767_v40 = vpack.c.bf16 %v758_v34, %v757_v38  ;;  %v740_v41 = vadd.f32 %v5685_v42, %v717_v20  ;;  %7552 = vst [vmem:[#allocation2_spill] sm:$0xff] %v5784_v52  ;;  %v7543_v32 = vsub.s32 0, %v5784_v52 }
 0x165   : > { %4471 = vmatmul.mubr.msk.bf16.gmra.mxu0 %vm485_vm0, %v764_v2  ;;  %v739_v25 = vadd.f32 %v5685_v42, %v716_v39  ;;  %v7542_v42 = vsub.s32 1, %v5784_v52 }
 0x166   : > { %913 = vmatprep.mubr.bf16.mxu0 %v7544_v60  ;;  %v760_v47 = vadd.f32 %v5712_v6, %v740_v41  ;;  %v5793_v6 = vrot.slane %v775_v24, %v7543_v32 }
 0x167   : > { %v759_v43 = vadd.f32 %v5721_v55, %v739_v25  ;;  %v5797_v48 = vrot.slane %v775_v24, %v7542_v42 }
 0x169   : > { %v768_v28 = vpack.c.bf16 %v760_v47, %v759_v43 }
 0x16d   : > { %4472 = vmatmul.mubr.msk.bf16.gmra.mxu0 %vm485_vm0, %v765_v17 }
 0x16e   : > { %923 = vmatprep.mubr.bf16.mxu0 %v7544_v60 }
 0x175   : > { %4473 = vmatmul.mubr.msk.bf16.gmra.mxu0 %vm485_vm0, %v766_v30 }
 0x176   : > { %933 = vmatprep.mubr.bf16.mxu0 %v7544_v60 }
 0x17d   : > { %4474 = vmatmul.mubr.msk.bf16.gmra.mxu0 %vm485_vm0, %v767_v40 }
 0x17e   : > { %943 = vmatprep.mubr.bf16.mxu0 %v7544_v60 }
 0x185   : > { %4475 = vmatmul.mubr.msk.bf16.gmra.mxu0 %vm485_vm0, %v768_v28 }
 0x20d   : > { %v875_v1 = vpop.f32.mrf.mxu0 }
 0x20e   : > { %v876_v49 = vadd.f32 %v875_v1, %v5793_v6 }
 0x20f   : > { %v877_v55 = vpop.f32.mrf.mxu0 }
 0x210   : > { %v878_v0 = vadd.f32 %v877_v55, %v5797_v48 }
 0x211   : > { %v879_v36 = vpop.f32.mrf.mxu0 }
 0x212   : > { %v880_v50 = vadd.f32 %v879_v36, %v5793_v6 }
 0x213   : > { %v881_v51 = vpop.f32.mrf.mxu0 }
 0x214   : > { %v5802_v44 = vpack.c.bf16 %v880_v50, %v876_v49  ;;  %v882_v29 = vadd.f32 %v881_v51, %v5797_v48 }
 0x215   : > { %v885_v53 = vpop.f32.mrf.mxu0 }
 0x216   : > { %v5805_v56 = vpack.c.bf16 %v882_v29, %v878_v0  ;;  %4688 = vmatprep.mubr.msk.bf16.mxu0 %vm976_vm1, %v5802_v44  ;;  %v886_v12 = vadd.f32 %v885_v53, %v5793_v6 }
 0x217   : > { %v887_v57 = vpop.f32.mrf.mxu0 }
 0x218   : > { %v888_v59 = vadd.f32 %v887_v57, %v5797_v48 }
 0x219   : > { %v889_v58 = vpop.f32.mrf.mxu0 }
 0x21a   : > { %v890_v5 = vadd.f32 %v889_v58, %v5793_v6 }
 0x21b   : > { %v891_v37 = vpop.f32.mrf.mxu0 }
 0x21c   : > { %v892_v61 = vadd.f32 %v891_v37, %v5797_v48  ;;  %v5827_v14 = vpack.c.bf16 %v890_v5, %v886_v12 }
 0x21d   : > { %v895_v62 = vpop.f32.mrf.mxu0 }
 0x21e   : > { %v5811_v11 = vpack.c.bf16 %v892_v61, %v888_v59  ;;  %v896_v3 = vadd.f32 %v895_v62, %v5793_v6 }
 0x21f   : > { %v897_v63 = vpop.f32.mrf.mxu0 }
 0x220   : > { %v898_v45 = vadd.f32 %v897_v63, %v5797_v48 }
 0x221   : > { %v899_v2 = vpop.f32.mrf.mxu0 }
 0x222   : > { %v900_v10 = vadd.f32 %v899_v2, %v5793_v6 }
 0x223   : > { %v901_v4 = vpop.f32.mrf.mxu0 }
 0x224   : > { %v5817_v7 = vpack.c.bf16 %v900_v10, %v896_v3  ;;  %v902_v8 = vadd.f32 %v901_v4, %v5797_v48 }
 0x225   : > { %v905_v9 = vpop.f32.mrf.mxu0 }
 0x226   : > { %v5821_v13 = vpack.c.bf16 %v902_v8, %v898_v45  ;;  %1040 = vrot.lane.b32.xlu1 %v5817_v7, %s5396_s21  ;;  %4696 = vmatprep.mubr.msk.bf16.mxu1 %vm976_vm1, %v5817_v7  ;;  %v906_v23 = vadd.f32 %v905_v9, %v5793_v6 }
 0x227   : > { %v907_v17 = vpop.f32.mrf.mxu0 }
 0x228   : > { %v908_v22 = vadd.f32 %v907_v17, %v5797_v48 }
 0x229   : > { %v909_v15 = vpop.f32.mrf.mxu0 }
 0x22a   : > { %v910_v18 = vadd.f32 %v909_v15, %v5793_v6  ;;  %974 = vrot.lane.b32.xlu1 %v5827_v14, %s5396_s21 }
 0x22b   : > { %v911_v19 = vpop.f32.mrf.mxu0 }
 0x22c   : > { %v5834_v16 = vpack.c.bf16 %v910_v18, %v906_v23  ;;  %v912_v54 = vadd.f32 %v911_v19, %v5797_v48 }
 0x22d   : > { %v915_v26 = vpop.f32.mrf.mxu0 }
 0x22e   : > { %v5837_v27 = vpack.c.bf16 %v912_v54, %v908_v22  ;;  %1042 = vrot.lane.b32.xlu0 %v5834_v16, %s5396_s21  ;;  %v916_v1 = vadd.f32 %v915_v26, %v5793_v6 }
 0x22f   : > { %v917_v30 = vpop.f32.mrf.mxu0 }
 0x230   : > { %v918_v21 = vadd.f32 %v917_v30, %v5797_v48 }
 0x231   : > { %v919_v31 = vpop.f32.mrf.mxu0 }
 0x232   : > { %972 = vrot.lane.b32.xlu0 %v5802_v44, %s5396_s21  ;;  %v920_v47 = vadd.f32 %v919_v31, %v5793_v6 }
 0x233   : > { %v921_v35 = vpop.f32.mrf.mxu0 }
 0x234   : > { %v922_v33 = vadd.f32 %v921_v35, %v5797_v48  ;;  %v5859_v49 = vpack.c.bf16 %v920_v47, %v916_v1 }
 0x235   : > { %v925_v34 = vpop.f32.mrf.mxu0 }
 0x236   : > { %v5845_v20 = vpack.c.bf16 %v922_v33, %v918_v21  ;;  %v926_v40 = vadd.f32 %v925_v34, %v5793_v6 }
 0x237   : > { %v927_v38 = vpop.f32.mrf.mxu0 }
 0x238   : > { %v928_v43 = vadd.f32 %v927_v38, %v5797_v48 }
 0x239   : > { %v929_v39 = vpop.f32.mrf.mxu0 }
 0x23a   : > { %v930_v41 = vadd.f32 %v929_v39, %v5793_v6 }
 0x23b   : > { %v931_v25 = vpop.f32.mrf.mxu0 }
 0x23c   : > { %v5851_v28 = vpack.c.bf16 %v930_v41, %v926_v40  ;;  %v932_v46 = vadd.f32 %v931_v25, %v5797_v48 }
 0x23d   : > { %v935_v24 = vpop.f32.mrf.mxu0 }
 0x23e   : > { %v5855_v55 = vpack.c.bf16 %v932_v46, %v928_v43  ;;  %1109 = vrot.lane.b32.xlu1 %v5851_v28, %s5396_s21  ;;  %v936_v0 = vadd.f32 %v935_v24, %v5793_v6 }
 0x23f   : > { %v937_v36 = vpop.f32.mrf.mxu0 }
 0x240   : > { %v938_v50 = vadd.f32 %v937_v36, %v5797_v48 }
 0x241   : > { %v939_v51 = vpop.f32.mrf.mxu0 }
 0x242   : > { %v940_v29 = vadd.f32 %v939_v51, %v5793_v6  ;;  %1107 = vrot.lane.b32.xlu1 %v5859_v49, %s5396_s21 }
 0x243   : > { %v941_v53 = vpop.f32.mrf.mxu0 }
 0x244   : > { %v5866_v57 = vpack.c.bf16 %v940_v29, %v936_v0  ;;  %v942_v58 = vadd.f32 %v941_v53, %v5797_v48 }
 0x245   : > { %v945_v37 = vpop.f32.mrf.mxu0 }
 0x246   : > { %v5869_v59 = vpack.c.bf16 %v942_v58, %v938_v50  ;;  %1174 = vrot.lane.b32.xlu1 %v5866_v57, %s5396_s21  ;;  %v946_v63 = vadd.f32 %v945_v37, %v5793_v6 }
 0x247   : > { %v5873_v61 = vpop.f32.mrf.mxu0 }
 0x249   : > { %v949_v62 = vpop.f32.mrf.mxu0 }
 0x24a   : > { %v950_v2 = vadd.f32 %v949_v62, %v5793_v6  ;;  %1532 = vrot.lane.b32.xlu1 %v5851_v28, %s5397_s22 }
 0x24b   : > { %v5932_v38 = vpop.f32.mrf.mxu0 }
 0x24c   : > { %v5879_v3 = vpack.c.bf16 %v950_v2, %v946_v63 }
 0x24e   : > { %1408 = vrot.lane.b32.xlu1 %v5802_v44, %s5397_s22  ;;  %1176 = vrot.lane.b32.xlu0 %v5879_v3, %s5396_s21 }
 0x252   : > { %1530 = vrot.lane.b32.xlu1 %v5859_v49, %s5397_s22  ;;  %1410 = vrot.lane.b32.xlu0 %v5827_v14, %s5397_s22 }
 0x256   : > { %1674 = vrot.lane.b32.xlu1 %v5827_v14, %s5398_s23  ;;  %1471 = vrot.lane.b32.xlu0 %v5834_v16, %s5397_s22 }
 0x25a   : > { %1593 = vrot.lane.b32.xlu1 %v5879_v3, %s5397_s22  ;;  %1469 = vrot.lane.b32.xlu0 %v5817_v7, %s5397_s22 }
 0x298   : > { %v1041_v6 = vpop.permute.xlu1 %1040 }
 0x299   : > { %v1051_v12 = vsel %vm976_vm1, %v1041_v6, 0 }
 0x29c   : > { %v975_v10 = vpop.permute.xlu1 %974 }
 0x29d   : > { %4898 = vmatprep.subr.msk.bf16.mxu0 %vm976_vm1, %v975_v10  ;;  %v987_v4 = vsel %vm976_vm1, %v975_v10, 0 }
 0x29e   : > { %4685 = vmatpush3.bf16.xpose.msra.mxu0 %v987_v4 }
 0x2a0   : > { %v1043_v5 = vpop.permute.xlu0 %1042 }
 0x2a1   : > { %4900 = vmatprep.subr.msk.bf16.mxu1 %vm976_vm1, %v1043_v5  ;;  %v1054_v45 = vsel %vm976_vm1, %v1043_v5, 0 }
 0x2a2   : > { %4693 = vmatpush3.bf16.xpose.msra.mxu1 %v1054_v45 }
 0x2a3   : > { %4901 = vmatprep.subr.msk.bf16.mxu1 %vm976_vm1, %v1041_v6 }
 0x2a4   : > { %v973_v8 = vpop.permute.xlu0 %972 }
 0x2a5   : > { %4899 = vmatprep.subr.msk.bf16.mxu0 %vm976_vm1, %v973_v8  ;;  %v984_v9 = vsel %vm976_vm1, %v973_v8, 0 }
 0x2a6   : > { %4687 = vmatpush3.bf16.xpose.msra.mxu0 %v984_v9 }
 0x2aa   : > { %4695 = vmatpush3.bf16.xpose.msra.mxu1 %v1051_v12 }
 0x2ad   : > { %4689 = vmatmul.mubr.msk.bf16.vlgmr.msra.gmra.mxu0 %vm976_vm1, %v5827_v14 }
 0x2b0   : > { %v1110_v17 = vpop.permute.xlu1 %1109 }
 0x2b1   : > { %4697 = vmatmul.mubr.msk.bf16.vlgmr.msra.gmra.mxu1 %vm976_vm1, %v5834_v16  ;;  %4902 = vmatprep.subr.msk.bf16.mxu1 %vm976_vm1, %v1110_v17  ;;  %v1121_v15 = vsel %vm976_vm1, %v1110_v17, 0 }
 0x2b2   : > { %4701 = vmatpush3.bf16.xpose.msra.mxu1 %v1121_v15  ;;  %4704 = vmatprep.mubr.msk.bf16.mxu1 %vm976_vm1, %v5859_v49 }
 0x2b4   : > { %v1108_v23 = vpop.permute.xlu1 %1107 }
 0x2b5   : > { %4903 = vmatprep.subr.msk.bf16.mxu1 %vm976_vm1, %v1108_v23  ;;  %v1118_v18 = vsel %vm976_vm1, %v1108_v23, 0 }
 0x2b8   : > { %v1175_v19 = vpop.permute.xlu1 %1174 }
 0x2b9   : > { %v1185_v31 = vsel %vm976_vm1, %v1175_v19, 0 }
 0x2ba   : > { %4703 = vmatpush3.bf16.xpose.msra.mxu1 %v1118_v18 }
 0x2bc   : > { %v1533_v22 = vpop.permute.xlu1 %1532 }
 0x2c0   : > { %v1177_v54 = vpop.permute.xlu0 %1176  ;;  %v1409_v21 = vpop.permute.xlu1 %1408 }
 0x2c1   : > { %4705 = vmatmul.mubr.msk.bf16.vlgmr.msra.gmra.mxu1 %vm976_vm1, %v5851_v28  ;;  %4904 = vmatprep.subr.msk.bf16.mxu1 %vm976_vm1, %v1177_v54  ;;  %v1188_v26 = vsel %vm976_vm1, %v1177_v54, 0 }
 0x2c2   : > { %4709 = vmatpush3.bf16.xpose.msra.mxu1 %v1188_v26  ;;  %4712 = vmatprep.mubr.msk.bf16.mxu1 %vm976_vm1, %v5866_v57 }
 0x2c3   : > { %4905 = vmatprep.subr.msk.bf16.mxu1 %vm976_vm1, %v1175_v19 }
 0x2c4   : > { %v1411_v30 = vpop.permute.xlu0 %1410  ;;  %v1531_v33 = vpop.permute.xlu1 %1530 }
 0x2c5   : > { %4716 = vmatprep.subr.bf16.mxu0 %v1411_v30 }
 0x2c6   : > { %4717 = vmatpush3.bf16.msra.mxu0 %v1411_v30 }
 0x2c7   : > { %4718 = vmatprep.subr.bf16.mxu0 %v1409_v21 }
 0x2c8   : > { %v5923_v35 = vpop.permute.xlu0 %1471  ;;  %v5928_v34 = vpop.permute.xlu1 %1674 }
 0x2ca   : > { %4711 = vmatpush3.bf16.xpose.msra.mxu1 %v1185_v31  ;;  %4719 = vmatpush3.bf16.msra.mxu0 %v1409_v21 }
 0x2cb   : > { %4724 = vmatprep.subr.bf16.mxu0 %v5923_v35  ;;  %4732 = vmatprep.subr.bf16.mxu1 %v1533_v22 }
 0x2cc   : > { %v6026_v19 = vpop.permute.xlu0 %1469 }
 0x2d1   : > { %4713 = vmatmul.mubr.msk.bf16.vlgmr.msra.gmra.mxu1 %vm976_vm1, %v5879_v3 }
 0x2d2   : > { %4733 = vmatpush3.bf16.msra.mxu1 %v1533_v22  ;;  %v6032_v22 = vpop.permute.xlu1 %1593 }
 0x2d3   : > { %4734 = vmatprep.subr.bf16.mxu1 %v1531_v33 }
 0x2d6   : > { %4735 = vmatpush3.bf16.msra.mxu1 %v1531_v33 }
 0x2d7   : > { %4906 = vmatprep.subr.msk.bf16.mxu1 %vm976_vm1, %v5928_v34 }
 0x36d   : > { %v5934_v39 = vpop.f32.mrf.mxu0 }
 0x36e   : > { %v1246_v40 = vsel %vm1239_vm2, %v5934_v39, -inf }
 0x36f   : > { %1247 = vmax.xlane.f32.xlu0 %v1246_v40  ;;  %v5938_v41 = vpop.f32.mrf.mxu0 }
 0x370   : > { %v1240_v43 = vsel %vm1239_vm2, %v5938_v41, -inf }
 0x371   : > { %v5940_v25 = vpop.f32.mrf.mxu0  ;;  %v5942_v47 = vpop.f32.mrf.mxu1 }
 0x372   : > { %v1249_v46 = vsel %vm1239_vm2, %v5940_v25, -inf  ;;  %v1258_v36 = vsel %vm1239_vm2, %v5942_v47, -inf }
 0x373   : > { %v5948_v24 = vpop.f32.mrf.mxu1  ;;  %1241 = vmax.xlane.f32.xlu0 %v1240_v43  ;;  %1250 = vmax.xlane.f32.xlu1 %v1249_v46  ;;  %v5950_v1 = vpop.f32.mrf.mxu0 }
 0x374   : > { %v1243_v50 = vsel %vm1239_vm2, %v5950_v1, -inf  ;;  %v1252_v0 = vsel %vm1239_vm2, %v5948_v24, -inf }
 0x375   : > { %v5956_v51 = vpop.f32.mrf.mxu1 }
 0x376   : > { %v1261_v29 = vsel %vm1239_vm2, %v5956_v51, -inf }
 0x377   : > { %1259 = vmax.xlane.f32.xlu0 %v1258_v36  ;;  %1244 = vmax.xlane.f32.xlu1 %v1243_v50  ;;  %v5962_v53 = vpop.f32.mrf.mxu1 }
 0x378   : > { %v1255_v58 = vsel %vm1239_vm2, %v5962_v53, -inf }
 0x37b   : > { %1253 = vmax.xlane.f32.xlu0 %v1252_v0  ;;  %1262 = vmax.xlane.f32.xlu1 %v1261_v29 }
 0x37f   : > { %1256 = vmax.xlane.f32.xlu1 %v1255_v58 }
 0x381   : > { %v5966_v37 = vpop.f32.mrf.mxu1 }
 0x382   : > { %v1270_v62 = vsel %vm1239_vm2, %v5966_v37, -inf }
 0x383   : > { %v5970_v63 = vpop.f32.mrf.mxu1  ;;  %1271 = vmax.xlane.f32.xlu0 %v1270_v62 }
 0x384   : > { %v1264_v6 = vsel %vm1239_vm2, %v5970_v63, -inf }
 0x385   : > { %v5972_v2 = vpop.f32.mrf.mxu1 }
 0x386   : > { %v1273_v10 = vsel %vm1239_vm2, %v5972_v2, -inf }
 0x387   : > { %v5978_v4 = vpop.f32.mrf.mxu1  ;;  %1265 = vmax.xlane.f32.xlu0 %v1264_v6  ;;  %1274 = vmax.xlane.f32.xlu1 %v1273_v10 }
 0x388   : > { %v1267_v5 = vsel %vm1239_vm2, %v5978_v4, -inf }
 0x38b   : > { %1268 = vmax.xlane.f32.xlu0 %v1267_v5 }
 0x391   : > { %v5988_v45 = vpop.f32.mrf.mxu1 }
 0x392   : > { %v1282_v12 = vsel %vm1239_vm2, %v5988_v45, -inf }
 0x393   : > { %v5990_v8 = vpop.f32.mrf.mxu1 }
 0x394   : > { %v1276_v23 = vsel %vm1239_vm2, %v5990_v8, -inf }
 0x395   : > { %v5992_v9 = vpop.f32.mrf.mxu1 }
 0x396   : > { %v1285_v17 = vsel %vm1239_vm2, %v5992_v9, -inf }
 0x397   : > { %v5998_v15 = vpop.f32.mrf.mxu1 }
 0x398   : > { %1591 = vrot.lane.b32.xlu1 %v5866_v57, %s5397_s22  ;;  %v1279_v18 = vsel %vm1239_vm2, %v5998_v15, -inf }
 0x39c   : > { %1743 = vrot.lane.b32.xlu1 %v5834_v16, %s5398_s23 }
 0x3a1   : > { %1672 = vrot.lane.b32.xlu0 %v5802_v44, %s5398_s23 }
 0x3c0   : > { %1283 = vmax.xlane.f32.xlu0 %v1282_v12  ;;  %1286 = vmax.xlane.f32.xlu1 %v1285_v17 }
 0x3c4   : > { %1277 = vmax.xlane.f32.xlu0 %v1276_v23  ;;  %1280 = vmax.xlane.f32.xlu1 %v1279_v18 }
 0x3d5   : > { %1670 = vrot.lane.b32.xlu1 %v5827_v14, %s5399_s24 }
 0x3d9   : > { %1810 = vrot.lane.b32.xlu1 %v5859_v49, %s5398_s23 }
 0x3da   : > { %1668 = vrot.lane.b32.xlu0 %v5802_v44, %s5399_s24 }
 0x3dd   : > { %1737 = vrot.lane.b32.xlu1 %v5817_v7, %s5399_s24 }
 0x3de   : > { %1812 = vrot.lane.b32.xlu0 %v5851_v28, %s5398_s23 }
 0x3e1   : > { %1881 = vrot.lane.b32.xlu1 %v5879_v3, %s5398_s23 }
 0x3e2   : > { %1741 = vrot.lane.b32.xlu0 %v5817_v7, %s5398_s23 }
 0x3e5   : > { %1879 = vrot.lane.b32.xlu1 %v5866_v57, %s5398_s23 }
 0x3e6   : > { %1806 = vrot.lane.b32.xlu0 %v5859_v49, %s5399_s24 }
 0x3e9   : > { %1877 = vrot.lane.b32.xlu1 %v5879_v3, %s5399_s24 }
 0x3ea   : > { %1808 = vrot.lane.b32.xlu0 %v5851_v28, %s5399_s24 }
 0x3ed   : > { %2112 = vrot.lane.b32.xlu1 %v5802_v44, %s5400_s25 }
 0x3ee   : > { %1739 = vrot.lane.b32.xlu0 %v5834_v16, %s5399_s24 }
 0x3f1   : > { %2234 = vrot.lane.b32.xlu1 %v5859_v49, %s5400_s25 }
 0x3f2   : > { %1875 = vrot.lane.b32.xlu0 %v5866_v57, %s5399_s24 }
 0x3f5   : > { %2378 = vrot.lane.b32.xlu1 %v5827_v14, %s5401_s26 }
 0x3f6   : > { %2114 = vrot.lane.b32.xlu0 %v5827_v14, %s5400_s25 }
 0x3f8   : > { %v1248_v54 = vpop.xlane.xlu0 %1247 }
 0x3f9   : > { %2297 = vrot.lane.b32.xlu1 %v5879_v3, %s5400_s25  ;;  %v1290_v33 = vsub.f32 %v5934_v39, %v1248_v54 }
 0x3fa   : > { %2236 = vrot.lane.b32.xlu0 %v5851_v28, %s5400_s25 }
 0x3fb   : > { %v1308_v0 = vmul.f32 1.442695, %v1290_v33 }
 0x3fc   : > { %v1251_v26 = vpop.xlane.xlu1 %1250  ;;  %v1242_v30 = vpop.xlane.xlu0 %1241 }
 0x3fd   : > { %v1291_v21 = vsub.f32 %v5940_v25, %v1251_v26  ;;  %v1288_v31 = vsub.f32 %v5938_v41, %v1242_v30 }
 0x3fe   : > { %2175 = vrot.lane.b32.xlu0 %v5834_v16, %s5400_s25 }
 0x3ff   : > { %v1310_v40 = vmul.f32 1.442695, %v1291_v21  ;;  %v1304_v43 = vmul.f32 1.442695, %v1288_v31 }
 0x400   : > { %v1245_v46 = vpop.xlane.xlu1 %1244  ;;  %v1260_v36 = vpop.xlane.xlu0 %1259 }
 0x401   : > { %v1289_v50 = vsub.f32 %v5950_v1, %v1245_v46  ;;  %5083 = vpow2.f32 %v1310_v40  ;;  %v1294_v62 = vsub.f32 %v5942_v47, %v1260_v36 }
 0x402   : > { %2173 = vrot.lane.b32.xlu0 %v5817_v7, %s5400_s25  ;;  %5085 = vpow2.f32 %v1304_v43 }
 0x403   : > { %v1306_v29 = vmul.f32 1.442695, %v1289_v50  ;;  %v1316_v12 = vmul.f32 1.442695, %v1294_v62 }
 0x404   : > { %v1263_v25 = vpop.xlane.xlu1 %1262  ;;  %v1254_v41 = vpop.xlane.xlu0 %1253 }
 0x405   : > { %5087 = vpow2.f32 %v1306_v29  ;;  %v1295_v39 = vsub.f32 %v5956_v51, %v1263_v25  ;;  %v1292_v58 = vsub.f32 %v5948_v24, %v1254_v41 }
 0x406   : > { %5089 = vpow2.f32 %v1308_v0 }
 0x407   : > { %v1318_v6 = vmul.f32 1.442695, %v1295_v39  ;;  %v1312_v10 = vmul.f32 1.442695, %v1292_v58 }
 0x408   : > { %v1257_v1 = vpop.xlane.xlu1 %1256 }
 0x409   : > { %v1293_v5 = vsub.f32 %v5962_v53, %v1257_v1  ;;  %5091 = vpow2.f32 %v1318_v6 }
 0x40a   : > { %5093 = vpow2.f32 %v1312_v10 }
 0x40b   : > { %v1314_v17 = vmul.f32 1.442695, %v1293_v5 }
 0x40c   : > { %v1272_v23 = vpop.xlane.xlu0 %1271 }
 0x40d   : > { %5095 = vpow2.f32 %v1314_v17  ;;  %v1298_v53 = vsub.f32 %v5966_v37, %v1272_v23 }
 0x40e   : > { %5097 = vpow2.f32 %v1316_v12  ;;  %v6050_v18 = vpop.eup %5083 }
 0x40f   : > { %v6052_v24 = vpop.eup %5085 }
 0x410   : > { %v1275_v51 = vpop.xlane.xlu1 %1274  ;;  %v1266_v54 = vpop.xlane.xlu0 %1265 }
 0x411   : > { %v1299_v47 = vsub.f32 %v5972_v2, %v1275_v51  ;;  %v1296_v26 = vsub.f32 %v5970_v63, %v1266_v54  ;;  %v1324_v63 = vmul.f32 1.442695, %v1298_v53 }
 0x412   : > { %v6056_v30 = vpop.eup %5087 }
 0x413   : > { %v6059_v21 = vpop.eup %5089  ;;  %v1326_v31 = vmul.f32 1.442695, %v1299_v47  ;;  %v1400_v33 = vpack.c.bf16 %v6056_v30, %v6052_v24  ;;  %v1320_v40 = vmul.f32 1.442695, %v1296_v26 }
 0x414   : > { %v1269_v43 = vpop.xlane.xlu0 %1268  ;;  %v1401_v46 = vpack.c.bf16 %v6050_v18, %v6059_v21  ;;  %v1592_v25 = vpop.permute.xlu1 %1591 }
 0x415   : > { %v1297_v36 = vsub.f32 %v5978_v4, %v1269_v43  ;;  %4720 = vmatprep.mubr.msk.bf16.mxu0 %vm1239_vm2, %v1400_v33  ;;  %5099 = vpow2.f32 %v1326_v31 }
 0x416   : > { %4721 = vmatmul.mubr.msk.bf16.vlgmr.msra.gmra.mxu0 %vm1239_vm2, %v1401_v46  ;;  %v6069_v2 = vpop.eup %5091  ;;  %5101 = vpow2.f32 %v1320_v40 }
 0x417   : > { %v1322_v37 = vmul.f32 1.442695, %v1297_v36  ;;  %4725 = vmatpush3.bf16.msra.mxu0 %v5923_v35  ;;  %v6072_v50 = vpop.eup %5093 }
 0x418   : > { %4726 = vmatprep.subr.bf16.mxu0 %v6026_v19  ;;  %v1744_v41 = vpop.permute.xlu1 %1743  ;;  %v1673_v1 = vpop.permute.xlu0 %1672 }
 0x419   : > { %5103 = vpow2.f32 %v1322_v37  ;;  %v1683_v5 = vsel %vm976_vm1, %v1673_v1, 0 }
 0x41a   : > { %v6074_v0 = vpop.eup %5095  ;;  %5105 = vpow2.f32 %v1324_v63 }
 0x41b   : > { %v6076_v4 = vpop.eup %5097  ;;  %4727 = vmatpush3.bf16.msra.mxu0 %v6026_v19  ;;  %v1402_v29 = vpack.c.bf16 %v6074_v0, %v6072_v50 }
 0x41c   : > { %4740 = vmatprep.subr.bf16.mxu0 %v6032_v22  ;;  %v1403_v35 = vpack.c.bf16 %v6069_v2, %v6076_v4 }
 0x41d   : > { %4728 = vmatprep.mubr.msk.bf16.mxu0 %vm1239_vm2, %v1402_v29 }
 0x41e   : > { %4729 = vmatmul.mubr.msk.bf16.vlgmr.msra.gmra.mxu0 %vm1239_vm2, %v1403_v35 }
 0x41f   : > { %4741 = vmatpush3.bf16.msra.mxu0 %v6032_v22  ;;  %v1686_v22 = vsel %vm976_vm1, %v5928_v34, 0 }
 0x420   : > { %4742 = vmatprep.subr.bf16.mxu0 %v1592_v25 }
 0x422   : > { %v6087_v39 = vpop.eup %5099 }
 0x423   : > { %4743 = vmatpush3.bf16.msra.mxu0 %v1592_v25  ;;  %v6090_v19 = vpop.eup %5101 }
 0x424   : > { %4908 = vmatprep.subr.msk.bf16.mxu0 %vm976_vm1, %v1744_v41 }
 0x426   : > { %v6092_v58 = vpop.eup %5103 }
 0x427   : > { %v6094_v62 = vpop.eup %5105  ;;  %v1404_v6 = vpack.c.bf16 %v6092_v58, %v6090_v19 }
 0x428   : > { %v1405_v10 = vpack.c.bf16 %v6087_v39, %v6094_v62 }
 0x429   : > { %4736 = vmatprep.mubr.msk.bf16.mxu1 %vm1239_vm2, %v1404_v6 }
 0x42a   : > { %4737 = vmatmul.mubr.msk.bf16.vlgmr.msra.gmra.mxu1 %vm1239_vm2, %v1405_v10 }
 0x42b   : > { %4749 = vmatpush3.bf16.xpose.msra.mxu1 %v1686_v22 }
 0x42c   : > { %4907 = vmatprep.subr.msk.bf16.mxu1 %vm976_vm1, %v1673_v1 }
 0x433   : > { %4751 = vmatpush3.bf16.xpose.msra.mxu1 %v1683_v5 }
 0x449   : > { %v1287_v12 = vpop.xlane.xlu1 %1286  ;;  %v1284_v17 = vpop.xlane.xlu0 %1283 }
 0x44a   : > { %v1303_v23 = vsub.f32 %v5992_v9, %v1287_v12  ;;  %v1302_v51 = vsub.f32 %v5988_v45, %v1284_v17  ;;  %v1755_v17 = vsel %vm976_vm1, %v1744_v41, 0 }
 0x44c   : > { %v1334_v54 = vmul.f32 1.442695, %v1303_v23  ;;  %v1332_v47 = vmul.f32 1.442695, %v1302_v51 }
 0x44d   : > { %v1281_v26 = vpop.xlane.xlu1 %1280  ;;  %v1278_v53 = vpop.xlane.xlu0 %1277 }
 0x44e   : > { %v1301_v31 = vsub.f32 %v5998_v15, %v1281_v26  ;;  %v1300_v34 = vsub.f32 %v5990_v8, %v1278_v53  ;;  %5107 = vpow2.f32 %v1334_v54 }
 0x44f   : > { %5109 = vpow2.f32 %v1332_v47 }
 0x450   : > { %v1330_v33 = vmul.f32 1.442695, %v1301_v31  ;;  %v1328_v40 = vmul.f32 1.442695, %v1300_v34 }
 0x451   : > { %v1671_v43 = vpop.permute.xlu1 %1670  ;;  %v1669_v46 = vpop.permute.xlu0 %1668 }
 0x452   : > { %5111 = vpow2.f32 %v1330_v33  ;;  %4752 = vmatprep.mubr.msk.bf16.mxu1 %vm976_vm1, %v1669_v46 }
 0x453   : > { %5113 = vpow2.f32 %v1328_v40  ;;  %4753 = vmatmul.mubr.msk.bf16.vlgmr.msra.gmra.mxu1 %vm976_vm1, %v1671_v43 }
 0x455   : > { %v1811_v45 = vpop.permute.xlu1 %1810  ;;  %v1813_v9 = vpop.permute.xlu0 %1812 }
 0x456   : > { %4910 = vmatprep.subr.msk.bf16.mxu1 %vm976_vm1, %v1813_v9  ;;  %v1824_v15 = vsel %vm976_vm1, %v1813_v9, 0  ;;  %v1821_v25 = vsel %vm976_vm1, %v1811_v45, 0 }
 0x457   : > { %4765 = vmatpush3.bf16.xpose.msra.mxu1 %v1824_v15 }
 0x458   : > { %4911 = vmatprep.subr.msk.bf16.mxu1 %vm976_vm1, %v1811_v45 }
 0x459   : > { %v1738_v8 = vpop.permute.xlu1 %1737  ;;  %v1742_v36 = vpop.permute.xlu0 %1741 }
 0x45a   : > { %v1752_v47 = vsel %vm976_vm1, %v1742_v36, 0 }
 0x45b   : > { %v6115_v63 = vpop.eup %5107 }
 0x45c   : > { %7553 = vst [vmem:[#allocation3_spill] sm:$0xff] %v6115_v63  ;;  %v6117_v35 = vpop.eup %5109 }
 0x45d   : > { %v1882_v37 = vpop.permute.xlu1 %1881  ;;  %v1807_v29 = vpop.permute.xlu0 %1806  ;;  %7554 = vst [vmem:[#allocation4_spill] sm:$0xff] %v6117_v35  ;;  %v1407_v5 = vpack.c.bf16 %v6115_v63, %v6117_v35 }
 0x45e   : > { %4768 = vmatprep.mubr.msk.bf16.mxu1 %vm976_vm1, %v1807_v29  ;;  %v1893_v31 = vsel %vm976_vm1, %v1882_v37, 0 }
 0x45f   : > { %v6121_v6 = vpop.eup %5111  ;;  %4767 = vmatpush3.bf16.xpose.msra.mxu1 %v1821_v25 }
 0x460   : > { %7555 = vst [vmem:[#allocation5_spill] sm:$0xff] %v6121_v6  ;;  %v6123_v10 = vpop.eup %5113 }
 0x461   : > { %7556 = vst [vmem:[#allocation6_spill] sm:$0xff] %v6123_v10  ;;  %v1809_v22 = vpop.permute.xlu0 %1808  ;;  %v1406_v1 = vpack.c.bf16 %v6121_v6, %v6123_v10  ;;  %v1880_v12 = vpop.permute.xlu1 %1879 }
 0x462   : > { %v1890_v34 = vsel %vm976_vm1, %v1880_v12, 0 }
 0x463   : > { %4744 = vmatprep.mubr.msk.bf16.mxu0 %vm1239_vm2, %v1406_v1 }
 0x464   : > { %4745 = vmatmul.mubr.msk.bf16.vlgmr.msra.gmra.mxu0 %vm1239_vm2, %v1407_v5 }
 0x465   : > { %4757 = vmatpush3.bf16.xpose.msra.mxu0 %v1755_v17  ;;  %4760 = vmatprep.mubr.msk.bf16.mxu0 %vm976_vm1, %v1738_v8  ;;  %v1740_v23 = vpop.permute.xlu0 %1739  ;;  %v1878_v51 = vpop.permute.xlu1 %1877 }
 0x466   : > { %4909 = vmatprep.subr.msk.bf16.mxu0 %vm976_vm1, %v1742_v36  ;;  %4769 = vmatmul.mubr.msk.bf16.vlgmr.msra.gmra.mxu1 %vm976_vm1, %v1809_v22 }
 0x469   : > { %v1876_v54 = vpop.permute.xlu0 %1875  ;;  %v2113_v53 = vpop.permute.xlu1 %2112 }
 0x46d   : > { %4759 = vmatpush3.bf16.xpose.msra.mxu0 %v1752_v47  ;;  %v2115_v26 = vpop.permute.xlu0 %2114  ;;  %v6145_v33 = vpop.permute.xlu1 %2234 }
 0x46e   : > { %4912 = vmatprep.subr.msk.bf16.mxu0 %vm976_vm1, %v1882_v37  ;;  %4780 = vmatprep.subr.bf16.mxu1 %v2115_v26 }
 0x46f   : > { %4781 = vmatpush3.bf16.msra.mxu1 %v2115_v26 }
 0x470   : > { %4782 = vmatprep.subr.bf16.mxu1 %v2113_v53 }
 0x471   : > { %v6137_v41 = vpop.permute.xlu0 %2236  ;;  %v6147_v43 = vpop.permute.xlu1 %2378 }
 0x473   : > { %4783 = vmatpush3.bf16.msra.mxu1 %v2113_v53 }
 0x474   : > { %4761 = vmatmul.mubr.msk.bf16.vlgmr.msra.gmra.mxu0 %vm976_vm1, %v1740_v23  ;;  %4796 = vmatprep.subr.bf16.mxu1 %v6137_v41 }
 0x475   : > { %4773 = vmatpush3.bf16.xpose.msra.mxu0 %v1893_v31  ;;  %4776 = vmatprep.mubr.msk.bf16.mxu0 %vm976_vm1, %v1876_v54  ;;  %v2176_v40 = vpop.permute.xlu0 %2175  ;;  %v6150_v45 = vpop.permute.xlu1 %2297 }
 0x476   : > { %4913 = vmatprep.subr.msk.bf16.mxu0 %vm976_vm1, %v1880_v12 }
 0x479   : > { %v2174_v46 = vpop.permute.xlu0 %2173 }
 0x47d   : > { %4775 = vmatpush3.bf16.xpose.msra.mxu0 %v1890_v34 }
 0x47e   : > { %4788 = vmatprep.subr.bf16.mxu0 %v2176_v40 }
 0x484   : > { %4777 = vmatmul.mubr.msk.bf16.vlgmr.msra.gmra.mxu0 %vm976_vm1, %v1878_v51 }
 0x485   : > { %4789 = vmatpush3.bf16.msra.mxu0 %v2176_v40 }
 0x486   : > { %4790 = vmatprep.subr.bf16.mxu0 %v2174_v46 }
 0x489   : > { %4791 = vmatpush3.bf16.msra.mxu0 %v2174_v46 }
 0x48a   : > { %4804 = vmatprep.subr.bf16.mxu0 %v6150_v45 }
 0x4d6   : > { %v6155_v15 = vpop.f32.mrf.mxu0 }
 0x4d7   : > { %7558 = vst [vmem:[#allocation8_spill] sm:$0xff] %v6155_v15 }
 0x4d8   : > { %v6159_v36 = vpop.f32.mrf.mxu0 }
 0x4d9   : > { %7560 = vst [vmem:[#allocation10_spill] sm:$0xff] %v6159_v36 }
 0x4da   : > { %v6163_v29 = vpop.f32.mrf.mxu0 }
 0x4db   : > { %7562 = vst [vmem:[#allocation12_spill] sm:$0xff] %v6163_v29 }
 0x4dc   : > { %v6169_v1 = vpop.f32.mrf.mxu0 }
 0x4dd   : > { %7564 = vst [vmem:[#allocation14_spill] sm:$0xff] %v6169_v1 }
 0x4de   : > { %v6177_v23 = vpop.f32.mrf.mxu0 }
 0x4df   : > { %7565 = vst [vmem:[#allocation15_spill] sm:$0xff] %v6177_v23 }
 0x4e0   : > { %v6185_v26 = vpop.f32.mrf.mxu0 }
 0x4e1   : > { %7566 = vst [vmem:[#allocation16_spill] sm:$0xff] %v6185_v26 }
 0x4e2   : > { %v6189_v31 = vpop.f32.mrf.mxu0 }
 0x4e3   : > { %7567 = vst [vmem:[#allocation17_spill] sm:$0xff] %v6189_v31 }
 0x4e4   : > { %v6191_v34 = vpop.f32.mrf.mxu0 }
 0x4e5   : > { %7568 = vst [vmem:[#allocation18_spill] sm:$0xff] %v6191_v34 }
 0x4ea   : > { %v6153_v9 = vpop.f32.mrf.mxu1 }
 0x4eb   : > { %7557 = vst [vmem:[#allocation7_spill] sm:$0xff] %v6153_v9 }
 0x4ec   : > { %v6157_v8 = vpop.f32.mrf.mxu1 }
 0x4ed   : > { %7559 = vst [vmem:[#allocation9_spill] sm:$0xff] %v6157_v8 }
 0x4ee   : > { %v6161_v37 = vpop.f32.mrf.mxu1 }
 0x4ef   : > { %7561 = vst [vmem:[#allocation11_spill] sm:$0xff] %v6161_v37 }
 0x4f0   : > { %v6165_v25 = vpop.f32.mrf.mxu1 }
 0x4f1   : > { %7563 = vst [vmem:[#allocation13_spill] sm:$0xff] %v6165_v25 }
 0x513   : > { %v6167_v22 = vpop.f32.mrf.mxu1 }
 0x514   : > { %v1950_v5 = vsel %vm1239_vm2, %v6167_v22, -inf }
 0x515   : > { %1951 = vmax.xlane.f32.xlu0 %v1950_v5  ;;  %v6173_v12 = vpop.f32.mrf.mxu1 }
 0x516   : > { %v1944_v51 = vsel %vm1239_vm2, %v6173_v12, -inf }
 0x517   : > { %v6175_v17 = vpop.f32.mrf.mxu1 }
 0x518   : > { %v1953_v53 = vsel %vm1239_vm2, %v6175_v17, -inf }
 0x519   : > { %1945 = vmax.xlane.f32.xlu0 %v1944_v51  ;;  %v6181_v54 = vpop.f32.mrf.mxu1 }
 0x51a   : > { %v1947_v47 = vsel %vm1239_vm2, %v6181_v54, -inf }
 0x51b   : > { %1948 = vmax.xlane.f32.xlu1 %v1947_v47 }
 0x51d   : > { %1954 = vmax.xlane.f32.xlu0 %v1953_v53 }
 0x524   : > { %v6193_v40 = vpop.f32.mrf.mxu0 }
 0x525   : > { %7569 = vst [vmem:[#allocation19_spill] sm:$0xff] %v6193_v40 }
 0x526   : > { %v6195_v46 = vpop.f32.mrf.mxu1  ;;  %v6199_v51 = vpop.f32.mrf.mxu0 }
 0x527   : > { %v1974_v5 = vsel %vm1239_vm2, %v6195_v46, -inf  ;;  %7570 = vst [vmem:[#allocation20_spill] sm:$0xff] %v6199_v51 }
 0x528   : > { %1975 = vmax.xlane.f32.xlu0 %v1974_v5  ;;  %v6203_v47 = vpop.f32.mrf.mxu0  ;;  %v6211_v60 = vpop.f32.mrf.mxu1 }
 0x529   : > { %7571 = vst [vmem:[#allocation21_spill] sm:$0xff] %v6203_v47  ;;  %v1968_v5 = vsel %vm1239_vm2, %v6211_v60, -inf }
 0x52a   : > { %v6205_v53 = vpop.f32.mrf.mxu0  ;;  %v6219_v47 = vpop.f32.mrf.mxu1 }
 0x52b   : > { %7572 = vst [vmem:[#allocation22_spill] sm:$0xff] %v6205_v53  ;;  %v1977_v53 = vsel %vm1239_vm2, %v6219_v47, -inf }
 0x52c   : > { %2295 = vrot.lane.b32.xlu1 %v5866_v57, %s5400_s25  ;;  %v6227_v37 = vpop.f32.mrf.mxu1 }
 0x534   : > { %v6207_v42 = vpop.f32.mrf.mxu0 }
 0x535   : > { %v1962_v32 = vsel %vm1239_vm2, %v6207_v42, -inf }
 0x536   : > { %1963 = vmax.xlane.f32.xlu0 %v1962_v32  ;;  %v6215_v52 = vpop.f32.mrf.mxu0 }
 0x537   : > { %v1956_v40 = vsel %vm1239_vm2, %v6215_v52, -inf }
 0x538   : > { %v6223_v51 = vpop.f32.mrf.mxu0 }
 0x539   : > { %v1965_v32 = vsel %vm1239_vm2, %v6223_v51, -inf }
 0x53a   : > { %1969 = vmax.xlane.f32.xlu0 %v1968_v5  ;;  %v6231_v5 = vpop.f32.mrf.mxu0 }
 0x53e   : > { %1957 = vmax.xlane.f32.xlu0 %v1956_v40  ;;  %v1971_v40 = vsel %vm1239_vm2, %v6227_v37, -inf }
 0x544   : > { %v6235_v9 = vpop.f32.mrf.mxu0 }
 0x545   : > { %v1986_v8 = vsel %vm1239_vm2, %v6235_v9, -inf }
 0x546   : > { %v6239_v25 = vpop.f32.mrf.mxu0 }
 0x547   : > { %v1980_v23 = vsel %vm1239_vm2, %v6239_v25, -inf }
 0x548   : > { %v6243_v34 = vpop.f32.mrf.mxu0 }
 0x54a   : > { %v6247_v26 = vpop.f32.mrf.mxu0 }
 0x550   : > { %1978 = vmax.xlane.f32.xlu1 %v1977_v53  ;;  %v1959_v53 = vsel %vm1239_vm2, %v6231_v5, -inf }
 0x554   : > { %2376 = vrot.lane.b32.xlu0 %v5802_v44, %s5401_s26  ;;  %1966 = vmax.xlane.f32.xlu1 %v1965_v32  ;;  %v1989_v32 = vsel %vm1239_vm2, %v6243_v34, -inf }
 0x558   : > { %1972 = vmax.xlane.f32.xlu1 %v1971_v40  ;;  %v1983_v40 = vsel %vm1239_vm2, %v6247_v26, -inf }
 0x55c   : > { %1960 = vmax.xlane.f32.xlu1 %v1959_v53 }
 0x560   : > { %1987 = vmax.xlane.f32.xlu1 %v1986_v8 }
 0x564   : > { %1990 = vmax.xlane.f32.xlu1 %v1989_v32 }
 0x568   : > { %1984 = vmax.xlane.f32.xlu1 %v1983_v40 }
 0x573   : > { %1981 = vmax.xlane.f32.xlu0 %v1980_v23 }
 0x579   : > { %2374 = vrot.lane.b32.xlu1 %v5827_v14, %s5402_s27 }
 0x57d   : > { %2445 = vrot.lane.b32.xlu1 %v5817_v7, %s5401_s26 }
 0x581   : > { %2443 = vrot.lane.b32.xlu1 %v5834_v16, %s5402_s27 }
 0x585   : > { %2514 = vrot.lane.b32.xlu1 %v5859_v49, %s5401_s26 }
 0x589   : > { %2372 = vrot.lane.b32.xlu0 %v5802_v44, %s5402_s27  ;;  %2512 = vrot.lane.b32.xlu1 %v5851_v28, %s5402_s27 }
 0x58d   : > { %2447 = vrot.lane.b32.xlu0 %v5834_v16, %s5401_s26  ;;  %2583 = vrot.lane.b32.xlu1 %v5866_v57, %s5401_s26 }
 0x591   : > { %2441 = vrot.lane.b32.xlu0 %v5817_v7, %s5402_s27  ;;  %2581 = vrot.lane.b32.xlu1 %v5879_v3, %s5402_s27 }
 0x595   : > { %2516 = vrot.lane.b32.xlu0 %v5851_v28, %s5401_s26 }
 0x599   : > { %2510 = vrot.lane.b32.xlu0 %v5859_v49, %s5402_s27 }
 0x59d   : > { %2585 = vrot.lane.b32.xlu0 %v5879_v3, %s5401_s26 }
 0x59e   : > { %v1952_v44 = vpop.xlane.xlu0 %1951 }
 0x59f   : > { %v1994_v14 = vsub.f32 %v6167_v22, %v1952_v44 }
 0x5a1   : > { %2579 = vrot.lane.b32.xlu0 %v5866_v57, %s5402_s27  ;;  %v2012_v32 = vmul.f32 1.442695, %v1994_v14 }
 0x5a2   : > { %v1946_v16 = vpop.xlane.xlu0 %1945 }
 0x5a3   : > { %v1992_v8 = vsub.f32 %v6173_v12, %v1946_v16 }
 0x5a4   : > { %v1949_v23 = vpop.xlane.xlu1 %1948 }
 0x5a5   : > { %v2008_v7 = vmul.f32 1.442695, %v1992_v8  ;;  %v1993_v53 = vsub.f32 %v6181_v54, %v1949_v23 }
 0x5a6   : > { %v1955_v40 = vpop.xlane.xlu0 %1954 }
 0x5a7   : > { %v2010_v28 = vmul.f32 1.442695, %v1993_v53  ;;  %v1995_v49 = vsub.f32 %v6175_v17, %v1955_v40  ;;  %5115 = vpow2.f32 %v2008_v7 }
 0x5a8   : > { %v6296_v8 = vpop.permute.xlu1 %2295 }
 0x5a9   : > { %5117 = vpow2.f32 %v2010_v28  ;;  %v2014_v3 = vmul.f32 1.442695, %v1995_v49 }
 0x5aa   : > { %5119 = vpow2.f32 %v2012_v32 }
 0x5ab   : > { %5121 = vpow2.f32 %v2014_v3 }
 0x5b1   : > { %v1976_v14 = vpop.xlane.xlu0 %1975 }
 0x5b4   : > { %v6277_v57 = vpop.eup %5115 }
 0x5b6   : > { %v6279_v22 = vpop.eup %5117 }
 0x5b7   : > { %v6281_v44 = vpop.eup %5119  ;;  %v2104_v12 = vpack.c.bf16 %v6279_v22, %v6277_v57 }
 0x5b8   : > { %v6285_v54 = vpop.eup %5121 }
 0x5b9   : > { %4784 = vmatprep.mubr.msk.bf16.mxu1 %vm1239_vm2, %v2104_v12  ;;  %v2105_v17 = vpack.c.bf16 %v6285_v54, %v6281_v44 }
 0x5bb   : > { %4785 = vmatmul.mubr.msk.bf16.vlgmr.msra.gmra.mxu1 %vm1239_vm2, %v2105_v17 }
 0x5bc   : > { %4797 = vmatpush3.bf16.msra.mxu1 %v6137_v41  ;;  %v2002_v41 = vsub.f32 %v6195_v46, %v1976_v14 }
 0x5bd   : > { %4798 = vmatprep.subr.bf16.mxu1 %v6145_v33 }
 0x5be   : > { %v2028_v6 = vmul.f32 1.442695, %v2002_v41 }
 0x5bf   : > { %v1964_v16 = vpop.xlane.xlu0 %1963 }
 0x5c0   : > { %4799 = vmatpush3.bf16.msra.mxu1 %v6145_v33  ;;  %v1998_v63 = vsub.f32 %v6207_v42, %v1964_v16 }
 0x5c1   : > { %4914 = vmatprep.subr.msk.bf16.mxu1 %vm976_vm1, %v6147_v43 }
 0x5c3   : > { %v1970_v23 = vpop.xlane.xlu0 %1969 }
 0x5c4   : > { %v2000_v53 = vsub.f32 %v6211_v60, %v1970_v23 }
 0x5c6   : > { %v2024_v49 = vmul.f32 1.442695, %v2000_v53 }
 0x5c7   : > { %v1958_v32 = vpop.xlane.xlu0 %1957 }
 0x5c8   : > { %v1996_v33 = vsub.f32 %v6215_v52, %v1958_v32  ;;  %5123 = vpow2.f32 %v2024_v49  ;;  %v2020_v52 = vmul.f32 1.442695, %v1998_v63  ;;  %v2390_v49 = vsel %vm976_vm1, %v6147_v43, 0 }
 0x5ca   : > { %v2016_v60 = vmul.f32 1.442695, %v1996_v33 }
 0x5d5   : > { %v6306_v53 = vpop.eup %5123 }
 0x5d9   : > { %v1979_v7 = vpop.xlane.xlu1 %1978 }
 0x5da   : > { %v2003_v40 = vsub.f32 %v6219_v47, %v1979_v7 }
 0x5dc   : > { %v2030_v3 = vmul.f32 1.442695, %v2003_v40 }
 0x5dd   : > { %v1967_v28 = vpop.xlane.xlu1 %1966 }
 0x5de   : > { %v1999_v12 = vsub.f32 %v6223_v51, %v1967_v28  ;;  %5125 = vpow2.f32 %v2030_v3  ;;  %v2377_v3 = vpop.permute.xlu0 %2376 }
 0x5e0   : > { %v2022_v47 = vmul.f32 1.442695, %v1999_v12 }
 0x5e1   : > { %v1973_v17 = vpop.xlane.xlu1 %1972 }
 0x5e2   : > { %v2001_v31 = vsub.f32 %v6227_v37, %v1973_v17 }
 0x5e4   : > { %v2026_v23 = vmul.f32 1.442695, %v2001_v31 }
 0x5e5   : > { %v1961_v7 = vpop.xlane.xlu1 %1960 }
 0x5e6   : > { %5127 = vpow2.f32 %v2026_v23  ;;  %v1997_v46 = vsub.f32 %v6231_v5, %v1961_v7 }
 0x5e7   : > { %5129 = vpow2.f32 %v2028_v6 }
 0x5e8   : > { %5131 = vpow2.f32 %v2016_v60  ;;  %v2018_v14 = vmul.f32 1.442695, %v1997_v46 }
 0x5e9   : > { %5133 = vpow2.f32 %v2022_v47  ;;  %v1988_v51 = vpop.xlane.xlu1 %1987 }
 0x5ea   : > { %5135 = vpow2.f32 %v2018_v14  ;;  %v2387_v14 = vsel %vm976_vm1, %v2377_v3, 0 }
 0x5eb   : > { %5137 = vpow2.f32 %v2020_v52  ;;  %v6308_v42 = vpop.eup %5125 }
 0x5ed   : > { %v1991_v37 = vpop.xlane.xlu1 %1990 }
 0x5ee   : > { %v2007_v41 = vsub.f32 %v6243_v34, %v1991_v37  ;;  %v2006_v34 = vsub.f32 %v6235_v9, %v1988_v51 }
 0x5f0   : > { %v2038_v23 = vmul.f32 1.442695, %v2007_v41  ;;  %v2036_v46 = vmul.f32 1.442695, %v2006_v34 }
 0x5f1   : > { %v1985_v63 = vpop.xlane.xlu1 %1984 }
 0x5f2   : > { %v2005_v12 = vsub.f32 %v6247_v26, %v1985_v63  ;;  %5139 = vpow2.f32 %v2038_v23 }
 0x5f3   : > { %v6310_v31 = vpop.eup %5127 }
 0x5f4   : > { %v6312_v16 = vpop.eup %5129  ;;  %v2108_v5 = vpack.c.bf16 %v6310_v31, %v6306_v53  ;;  %v2034_v43 = vmul.f32 1.442695, %v2005_v12 }
 0x5f5   : > { %v6316_v6 = vpop.eup %5131  ;;  %v2109_v32 = vpack.c.bf16 %v6308_v42, %v6312_v16  ;;  %v2375_v47 = vpop.permute.xlu1 %2374 }
 0x5f6   : > { %v6320_v40 = vpop.eup %5133  ;;  %4800 = vmatprep.mubr.msk.bf16.mxu1 %vm1239_vm2, %v2108_v5  ;;  %5141 = vpow2.f32 %v2034_v43 }
 0x5f7   : > { %v6323_v28 = vpop.eup %5135  ;;  %4801 = vmatmul.mubr.msk.bf16.vlgmr.msra.gmra.mxu1 %vm1239_vm2, %v2109_v32 }
 0x5f8   : > { %v6329_v33 = vpop.eup %5137  ;;  %4813 = vmatpush3.bf16.xpose.msra.mxu1 %v2390_v49  ;;  %v2106_v17 = vpack.c.bf16 %v6323_v28, %v6316_v6 }
 0x5f9   : > { %4915 = vmatprep.subr.msk.bf16.mxu1 %vm976_vm1, %v2377_v3  ;;  %v2107_v60 = vpack.c.bf16 %v6320_v40, %v6329_v33  ;;  %v2446_v51 = vpop.permute.xlu1 %2445 }
 0x5fa   : > { %4792 = vmatprep.mubr.msk.bf16.mxu0 %vm1239_vm2, %v2106_v17  ;;  %v2456_v43 = vsel %vm976_vm1, %v2446_v51, 0 }
 0x5fb   : > { %4793 = vmatmul.mubr.msk.bf16.vlgmr.msra.gmra.mxu0 %vm1239_vm2, %v2107_v60 }
 0x5fc   : > { %v1982_v7 = vpop.xlane.xlu0 %1981  ;;  %4805 = vmatpush3.bf16.msra.mxu0 %v6150_v45 }
 0x5fd   : > { %v2004_v26 = vsub.f32 %v6239_v25, %v1982_v7  ;;  %4806 = vmatprep.subr.bf16.mxu0 %v6296_v8  ;;  %v2444_v25 = vpop.permute.xlu1 %2443 }
 0x5ff   : > { %v2032_v52 = vmul.f32 1.442695, %v2004_v26  ;;  %v6348_v5 = vpop.eup %5139 }
 0x600   : > { %v2373_v9 = vpop.permute.xlu0 %2372  ;;  %4807 = vmatpush3.bf16.msra.mxu0 %v6296_v8  ;;  %4815 = vmatpush3.bf16.xpose.msra.mxu1 %v2387_v14 }
 0x601   : > { %5143 = vpow2.f32 %v2032_v52  ;;  %4816 = vmatprep.mubr.msk.bf16.mxu1 %vm976_vm1, %v2373_v9  ;;  %v2515_v49 = vpop.permute.xlu1 %2514  ;;  %v952_v9 = vadd.f32 %v5932_v38, %v5797_v48 }
 0x602   : > { %5145 = vpow2.f32 %v2036_v46  ;;  %v2525_v23 = vsel %vm976_vm1, %v2515_v49, 0 }
 0x603   : > { %v6350_v32 = vpop.eup %5141 }
 0x604   : > { %v2448_v45 = vpop.permute.xlu0 %2447 }
 0x605   : > { %4916 = vmatprep.subr.msk.bf16.mxu0 %vm976_vm1, %v2448_v45  ;;  %v2459_v34 = vsel %vm976_vm1, %v2448_v45, 0  ;;  %v2513_v7 = vpop.permute.xlu1 %2512 }
 0x607   : > { %4817 = vmatmul.mubr.msk.bf16.vlgmr.msra.gmra.mxu1 %vm976_vm1, %v2375_v47 }
 0x608   : > { %v2442_v37 = vpop.permute.xlu0 %2441 }
 0x609   : > { %v2584_v52 = vpop.permute.xlu1 %2583 }
 0x60a   : > { %v2594_v14 = vsel %vm976_vm1, %v2584_v52, 0 }
 0x60c   : > { %v2517_v63 = vpop.permute.xlu0 %2516 }
 0x60d   : > { %4918 = vmatprep.subr.msk.bf16.mxu1 %vm976_vm1, %v2517_v63  ;;  %v2528_v8 = vsel %vm976_vm1, %v2517_v63, 0 }
 0x60e   : > { %v6354_v41 = vpop.eup %5143  ;;  %4829 = vmatpush3.bf16.xpose.msra.mxu1 %v2528_v8 }
 0x60f   : > { %v6356_v3 = vpop.eup %5145  ;;  %4919 = vmatprep.subr.msk.bf16.mxu1 %vm976_vm1, %v2515_v49  ;;  %v2110_v12 = vpack.c.bf16 %v6350_v32, %v6354_v41 }
 0x610   : > { %v2511_v17 = vpop.permute.xlu0 %2510  ;;  %v2111_v60 = vpack.c.bf16 %v6348_v5, %v6356_v3 }
 0x611   : > { %4808 = vmatprep.mubr.msk.bf16.mxu0 %vm1239_vm2, %v2110_v12  ;;  %4832 = vmatprep.mubr.msk.bf16.mxu1 %vm976_vm1, %v2511_v17 }
 0x612   : > { %4809 = vmatmul.mubr.msk.bf16.vlgmr.msra.gmra.mxu0 %vm1239_vm2, %v2111_v60 }
 0x613   : > { %4821 = vmatpush3.bf16.xpose.msra.mxu0 %v2459_v34  ;;  %4824 = vmatprep.mubr.msk.bf16.mxu0 %vm976_vm1, %v2442_v37 }
 0x614   : > { %4917 = vmatprep.subr.msk.bf16.mxu0 %vm976_vm1, %v2446_v51  ;;  %v2586_v47 = vpop.permute.xlu0 %2585 }
 0x615   : > { %v2597_v46 = vsel %vm976_vm1, %v2586_v47, 0 }
 0x616   : > { %4831 = vmatpush3.bf16.xpose.msra.mxu1 %v2525_v23 }
 0x617   : > { %4844 = vmatprep.subr.bf16.mxu1 %v5811_v11 }
 0x618   : > { %v2580_v26 = vpop.permute.xlu0 %2579 }
 0x61b   : > { %4823 = vmatpush3.bf16.xpose.msra.mxu0 %v2456_v43 }
 0x61c   : > { %4920 = vmatprep.subr.msk.bf16.mxu0 %vm976_vm1, %v2586_v47 }
 0x61d   : > { %4833 = vmatmul.mubr.msk.bf16.vlgmr.msra.gmra.mxu1 %vm976_vm1, %v2513_v7 }
 0x61e   : > { %4845 = vmatpush3.bf16.msra.mxu1 %v5811_v11  ;;  %v2582_v11 = vpop.permute.xlu1 %2581 }
 0x61f   : > { %4846 = vmatprep.subr.bf16.mxu1 %v5805_v56 }
 0x622   : > { %4825 = vmatmul.mubr.msk.bf16.vlgmr.msra.gmra.mxu0 %vm976_vm1, %v2444_v25  ;;  %4847 = vmatpush3.bf16.msra.mxu1 %v5805_v56  ;;  %v948_v56 = vadd.f32 %v5873_v61, %v5797_v48 }
 0x623   : > { %4837 = vmatpush3.bf16.xpose.msra.mxu0 %v2597_v46  ;;  %4840 = vmatprep.mubr.msk.bf16.mxu0 %vm976_vm1, %v2580_v26 }
 0x624   : > { %4921 = vmatprep.subr.msk.bf16.mxu0 %vm976_vm1, %v2584_v52  ;;  %4860 = vmatprep.subr.bf16.mxu1 %v5855_v55  ;;  %v6391_v51 = vpack.c.bf16 %v952_v9, %v948_v56 }
 0x62b   : > { %4839 = vmatpush3.bf16.xpose.msra.mxu0 %v2594_v14 }
 0x62c   : > { %4852 = vmatprep.subr.bf16.mxu0 %v5837_v27 }
 0x632   : > { %4841 = vmatmul.mubr.msk.bf16.vlgmr.msra.gmra.mxu0 %vm976_vm1, %v2582_v11 }
 0x633   : > { %4853 = vmatpush3.bf16.msra.mxu0 %v5837_v27 }
 0x634   : > { %4854 = vmatprep.subr.bf16.mxu0 %v5821_v13 }
 0x637   : > { %4855 = vmatpush3.bf16.msra.mxu0 %v5821_v13 }
 0x638   : > { %4868 = vmatprep.subr.bf16.mxu0 %v6391_v51 }
 0x67b   : > { %v6395_v45 = vpop.f32.mrf.mxu1 }
 0x67d   : > { %v6397_v25 = vpop.f32.mrf.mxu1 }
 0x67f   : > { %v6399_v38 = vpop.f32.mrf.mxu1 }
 0x681   : > { %v6401_v37 = vpop.f32.mrf.mxu1 }
 0x6b7   : > { %v6403_v27 = vpop.f32.mrf.mxu1 }
 0x6b9   : > { %v6405_v63 = vpop.f32.mrf.mxu1 }
 0x6ba   : > { %7573 = vst [vmem:[#allocation23_spill] sm:$0xff] %v6405_v63 }
 0x6bb   : > { %v6407_v48 = vpop.f32.mrf.mxu1  ;;  %v6411_v8 = vpop.f32.mrf.mxu0 }
 0x6bd   : > { %v6409_v61 = vpop.f32.mrf.mxu1  ;;  %v6417_v12 = vpop.f32.mrf.mxu0 }
 0x6be   : > { %7574 = vst [vmem:[#allocation24_spill] sm:$0xff] %v6409_v61 }
 0x6bf   : > { %v6425_v23 = vpop.f32.mrf.mxu0 }
 0x6c1   : > { %v6431_v7 = vpop.f32.mrf.mxu0 }
 0x6c7   : > { %v6413_v13 = vpop.f32.mrf.mxu1 }
 0x6c8   : > { %v2654_v43 = vsel %vm1239_vm2, %v6413_v13, -inf }
 0x6c9   : > { %v6415_v49 = vpop.f32.mrf.mxu1 }
 0x6ca   : > { %v2648_v17 = vsel %vm1239_vm2, %v6415_v49, -inf }
 0x6cb   : > { %2649 = vmax.xlane.f32.xlu0 %v2648_v17  ;;  %v6421_v60 = vpop.f32.mrf.mxu1 }
 0x6cc   : > { %v2657_v26 = vsel %vm1239_vm2, %v6421_v60, -inf }
 0x6cd   : > { %v6423_v34 = vpop.f32.mrf.mxu1 }
 0x6ce   : > { %v2651_v47 = vsel %vm1239_vm2, %v6423_v34, -inf }
 0x6cf   : > { %2655 = vmax.xlane.f32.xlu0 %v2654_v43  ;;  %2652 = vmax.xlane.f32.xlu1 %v2651_v47 }
 0x6d2   : > { %v6435_v46 = vpop.f32.mrf.mxu0 }
 0x6d3   : > { %2658 = vmax.xlane.f32.xlu0 %v2657_v26 }
 0x6d4   : > { %v6437_v52 = vpop.f32.mrf.mxu0 }
 0x6d5   : > { %7575 = vst [vmem:[#allocation25_spill] sm:$0xff] %v6437_v52 }
 0x6d6   : > { %v6439_v14 = vpop.f32.mrf.mxu0 }
 0x6d8   : > { %v6441_v11 = vpop.f32.mrf.mxu0 }
 0x6d9   : > { %7576 = vst [vmem:[#allocation26_spill] sm:$0xff] %v6441_v11 }
 0x6dd   : > { %v6449_v43 = vpop.f32.mrf.mxu1 }
 0x6de   : > { %v2678_v10 = vsel %vm1239_vm2, %v6449_v43, -inf }
 0x6df   : > { %v6459_v63 = vpop.f32.mrf.mxu1 }
 0x6e1   : > { %v6465_v35 = vpop.f32.mrf.mxu1 }
 0x6e2   : > { %v6443_v9 = vpop.f32.mrf.mxu0  ;;  %v2681_v15 = vsel %vm1239_vm2, %v6465_v35, -inf }
 0x6e3   : > { %v2666_v52 = vsel %vm1239_vm2, %v6443_v9, -inf  ;;  %v6471_v29 = vpop.f32.mrf.mxu1 }
 0x6e4   : > { %v6445_v56 = vpop.f32.mrf.mxu0  ;;  %v2675_v1 = vsel %vm1239_vm2, %v6471_v29, -inf }
 0x6e5   : > { %v2660_v17 = vsel %vm1239_vm2, %v6445_v56, -inf }
 0x6e6   : > { %2661 = vmax.xlane.f32.xlu0 %v2660_v17  ;;  %v6451_v47 = vpop.f32.mrf.mxu0  ;;  %v2672_v17 = vsel %vm1239_vm2, %v6459_v63, -inf }
 0x6e7   : > { %v2669_v61 = vsel %vm1239_vm2, %v6451_v47, -inf }
 0x6e8   : > { %v6453_v26 = vpop.f32.mrf.mxu0 }
 0x6e9   : > { %v2663_v11 = vsel %vm1239_vm2, %v6453_v26, -inf }
 0x6ea   : > { %2667 = vmax.xlane.f32.xlu0 %v2666_v52  ;;  %2664 = vmax.xlane.f32.xlu1 %v2663_v11 }
 0x6ee   : > { %2670 = vmax.xlane.f32.xlu1 %v2669_v61  ;;  %2673 = vmax.xlane.f32.xlu0 %v2672_v17  ;;  %v2043_v17 = vsel %vm1239_vm2, %v6279_v22, 0.0 }
 0x6f2   : > { %2679 = vmax.xlane.f32.xlu0 %v2678_v10  ;;  %2682 = vmax.xlane.f32.xlu1 %v2681_v15  ;;  %v6473_v52 = vpop.f32.mrf.mxu0  ;;  %v2049_v10 = vsel %vm1239_vm2, %v6285_v54, 0.0  ;;  %v2040_v15 = vsel %vm1239_vm2, %v6277_v57, 0.0  ;;  %v2058_v57 = vsel %vm1239_vm2, %v6329_v33, 0.0  ;;  %v2076_v33 = vsel %vm1239_vm2, %v6354_v41, 0.0 }
 0x6f3   : > { %v2690_v36 = vsel %vm1239_vm2, %v6473_v52, -inf  ;;  %v1339_v41 = vsel %vm1239_vm2, %v6056_v30, 0.0  ;;  %v1357_v30 = vsel %vm1239_vm2, %v6069_v2, 0.0 }
 0x6f4   : > { %v6475_v11 = vpop.f32.mrf.mxu0 }
 0x6f5   : > { %v2684_v61 = vsel %vm1239_vm2, %v6475_v11, -inf }
 0x6f6   : > { %2676 = vmax.xlane.f32.xlu1 %v2675_v1  ;;  %2685 = vmax.xlane.f32.xlu0 %v2684_v61  ;;  %v2055_v1 = vsel %vm1239_vm2, %v6323_v28, 0.0  ;;  %v2046_v61 = vsel %vm1239_vm2, %v6281_v44, 0.0  ;;  %v6493_v22 = vpop.f32.mrf.mxu0  ;;  %v2064_v28 = vsel %vm1239_vm2, %v6306_v53, 0.0  ;;  %v2082_v53 = vsel %vm1239_vm2, %v6356_v3, 0.0 }
 0x6f7   : > { %v2693_v54 = vsel %vm1239_vm2, %v6493_v22, -inf  ;;  %v1345_v3 = vsel %vm1239_vm2, %v6050_v18, 0.0 }
 0x6fa   : > { %2044 = vadd.xlane.f32.xlu1 %v2043_v17  ;;  %2691 = vmax.xlane.f32.xlu0 %v2690_v36  ;;  %v2052_v36 = vsel %vm1239_vm2, %v6316_v6, 0.0  ;;  %v6499_v17 = vpop.f32.mrf.mxu0  ;;  %v2061_v6 = vsel %vm1239_vm2, %v6320_v40, 0.0  ;;  %v2079_v40 = vsel %vm1239_vm2, %v6350_v32, 0.0  ;;  %v1348_v32 = vsel %vm1239_vm2, %v6072_v50, 0.0 }
 0x6fb   : > { %v2687_v44 = vsel %vm1239_vm2, %v6499_v17, -inf }
 0x6fe   : > { %2050 = vadd.xlane.f32.xlu1 %v2049_v10  ;;  %2041 = vadd.xlane.f32.xlu0 %v2040_v15  ;;  %v2070_v10 = vsel %vm1239_vm2, %v6312_v16, 0.0  ;;  %v2067_v15 = vsel %vm1239_vm2, %v6310_v31, 0.0  ;;  %v1336_v31 = vsel %vm1239_vm2, %v6052_v24, 0.0  ;;  %v2085_v16 = vsel %vm1239_vm2, %v6348_v5, 0.0 }
 0x6ff   : > { %v1354_v24 = vsel %vm1239_vm2, %v6076_v4, 0.0  ;;  %v1351_v5 = vsel %vm1239_vm2, %v6074_v0, 0.0 }
 0x702   : > { %2056 = vadd.xlane.f32.xlu1 %v2055_v1  ;;  %2047 = vadd.xlane.f32.xlu0 %v2046_v61  ;;  %v2073_v1 = vsel %vm1239_vm2, %v6308_v42, 0.0  ;;  %v1342_v42 = vsel %vm1239_vm2, %v6059_v21, 0.0 }
 0x706   : > { %2053 = vadd.xlane.f32.xlu0 %v2052_v36  ;;  %2694 = vmax.xlane.f32.xlu1 %v2693_v54 }
 0x70a   : > { %2059 = vadd.xlane.f32.xlu0 %v2058_v57  ;;  %2688 = vmax.xlane.f32.xlu1 %v2687_v44 }
 0x70e   : > { %2065 = vadd.xlane.f32.xlu0 %v2064_v28  ;;  %2062 = vadd.xlane.f32.xlu1 %v2061_v6 }
 0x712   : > { %2071 = vadd.xlane.f32.xlu0 %v2070_v10  ;;  %2068 = vadd.xlane.f32.xlu1 %v2067_v15 }
 0x716   : > { %2077 = vadd.xlane.f32.xlu0 %v2076_v33  ;;  %2074 = vadd.xlane.f32.xlu1 %v2073_v1 }
 0x71a   : > { %2083 = vadd.xlane.f32.xlu0 %v2082_v53  ;;  %2080 = vadd.xlane.f32.xlu1 %v2079_v40 }
 0x71e   : > { %1337 = vadd.xlane.f32.xlu0 %v1336_v31  ;;  %2086 = vadd.xlane.f32.xlu1 %v2085_v16 }
 0x722   : > { %1343 = vadd.xlane.f32.xlu0 %v1342_v42  ;;  %1340 = vadd.xlane.f32.xlu1 %v1339_v41 }
 0x726   : > { %1349 = vadd.xlane.f32.xlu0 %v1348_v32  ;;  %1346 = vadd.xlane.f32.xlu1 %v1345_v3 }
 0x72a   : > { %1355 = vadd.xlane.f32.xlu0 %v1354_v24  ;;  %1352 = vadd.xlane.f32.xlu1 %v1351_v5 }
 0x72e   : > { %1358 = vadd.xlane.f32.xlu1 %v1357_v30 }
 0x754   : > { %v2650_v21 = vpop.xlane.xlu0 %2649 }
 0x755   : > { %v2696_v50 = vsub.f32 %v6415_v49, %v2650_v21 }
 0x757   : > { %v2712_v61 = vmul.f32 1.442695, %v2696_v50 }
 0x758   : > { %v2653_v36 = vpop.xlane.xlu1 %2652  ;;  %v2656_v18 = vpop.xlane.xlu0 %2655 }
 0x759   : > { %v2697_v54 = vsub.f32 %v6423_v34, %v2653_v36  ;;  %v2698_v57 = vsub.f32 %v6413_v13, %v2656_v18  ;;  %5147 = vpow2.f32 %v2712_v61 }
 0x75b   : > { %v2714_v4 = vmul.f32 1.442695, %v2697_v54  ;;  %v2716_v44 = vmul.f32 1.442695, %v2698_v57 }
 0x75c   : > { %v2659_v0 = vpop.xlane.xlu0 %2658 }
 0x75d   : > { %5149 = vpow2.f32 %v2714_v4  ;;  %v2699_v28 = vsub.f32 %v6421_v60, %v2659_v0 }
 0x75e   : > { %5151 = vpow2.f32 %v2716_v44 }
 0x75f   : > { %v2718_v6 = vmul.f32 1.442695, %v2699_v28 }
 0x761   : > { %5153 = vpow2.f32 %v2718_v6 }
 0x766   : > { %v6543_v2 = vpop.eup %5147 }
 0x76a   : > { %v6545_v49 = vpop.eup %5149 }
 0x76b   : > { %v2808_v10 = vpack.c.bf16 %v6545_v49, %v6543_v2  ;;  %v6549_v34 = vpop.eup %5151 }
 0x76d   : > { %4848 = vmatprep.mubr.msk.bf16.mxu1 %vm1239_vm2, %v2808_v10 }
 0x76e   : > { %v6552_v13 = vpop.eup %5153 }
 0x76f   : > { %v2662_v15 = vpop.xlane.xlu0 %2661  ;;  %v2809_v60 = vpack.c.bf16 %v6552_v13, %v6549_v34 }
 0x770   : > { %v2700_v33 = vsub.f32 %v6445_v56, %v2662_v15 }
 0x771   : > { %4849 = vmatmul.mubr.msk.bf16.vlgmr.msra.gmra.mxu1 %vm1239_vm2, %v2809_v60 }
 0x772   : > { %4861 = vmatpush3.bf16.msra.mxu1 %v5855_v55  ;;  %v2720_v1 = vmul.f32 1.442695, %v2700_v33 }
 0x773   : > { %v2665_v53 = vpop.xlane.xlu1 %2664  ;;  %v2668_v40 = vpop.xlane.xlu0 %2667  ;;  %4862 = vmatprep.subr.bf16.mxu1 %v5845_v20 }
 0x774   : > { %v2701_v31 = vsub.f32 %v6453_v26, %v2665_v53  ;;  %v2702_v16 = vsub.f32 %v6443_v9, %v2668_v40  ;;  %5155 = vpow2.f32 %v2720_v1 }
 0x776   : > { %v2722_v42 = vmul.f32 1.442695, %v2701_v31  ;;  %4863 = vmatpush3.bf16.msra.mxu1 %v5845_v20  ;;  %v2724_v41 = vmul.f32 1.442695, %v2702_v16 }
 0x777   : > { %v2671_v32 = vpop.xlane.xlu1 %2670  ;;  %v2674_v56 = vpop.xlane.xlu0 %2673 }
 0x778   : > { %5157 = vpow2.f32 %v2722_v42  ;;  %v2703_v3 = vsub.f32 %v6451_v47, %v2671_v32  ;;  %v2704_v55 = vsub.f32 %v6459_v63, %v2674_v56 }
 0x779   : > { %5159 = vpow2.f32 %v2724_v41 }
 0x77a   : > { %v2726_v24 = vmul.f32 1.442695, %v2703_v3  ;;  %v2728_v21 = vmul.f32 1.442695, %v2704_v55 }
 0x77b   : > { %v2683_v5 = vpop.xlane.xlu1 %2682  ;;  %v2680_v30 = vpop.xlane.xlu0 %2679 }
 0x77c   : > { %5161 = vpow2.f32 %v2726_v24  ;;  %v2707_v26 = vsub.f32 %v6465_v35, %v2683_v5  ;;  %v2706_v9 = vsub.f32 %v6449_v43, %v2680_v30 }
 0x77d   : > { %5163 = vpow2.f32 %v2728_v21 }
 0x77e   : > { %v2734_v20 = vmul.f32 1.442695, %v2707_v26  ;;  %v2732_v50 = vmul.f32 1.442695, %v2706_v9 }
 0x77f   : > { %v2677_v61 = vpop.xlane.xlu1 %2676  ;;  %v2686_v36 = vpop.xlane.xlu0 %2685 }
 0x780   : > { %v2705_v18 = vsub.f32 %v6471_v29, %v2677_v61  ;;  %5165 = vpow2.f32 %v2734_v20  ;;  %v2708_v60 = vsub.f32 %v6475_v11, %v2686_v36 }
 0x781   : > { %5167 = vpow2.f32 %v2732_v50  ;;  %v6568_v57 = vpop.eup %5155 }
 0x782   : > { %v2730_v47 = vmul.f32 1.442695, %v2705_v18 }
 0x783   : > { %v2045_v63 = vpop.xlane.xlu1 %2044  ;;  %v2692_v54 = vpop.xlane.xlu0 %2691 }
 0x784   : > { %5169 = vpow2.f32 %v2730_v47  ;;  %v2710_v42 = vsub.f32 %v6473_v52, %v2692_v54 }
 0x785   : > { %v6570_v4 = vpop.eup %5157  ;;  %5171 = vrcp.f32 %v2045_v63 }
 0x786   : > { %v2810_v35 = vpack.c.bf16 %v6570_v4, %v6568_v57  ;;  %v6574_v0 = vpop.eup %5159  ;;  %v2740_v24 = vmul.f32 1.442695, %v2710_v42 }
 0x787   : > { %v2051_v43 = vpop.xlane.xlu1 %2050  ;;  %v2042_v44 = vpop.xlane.xlu0 %2041 }
 0x788   : > { %4856 = vmatprep.mubr.msk.bf16.mxu0 %vm1239_vm2, %v2810_v35  ;;  %5173 = vrcp.f32 %v2042_v44 }
 0x789   : > { %v6577_v29 = vpop.eup %5161  ;;  %5175 = vrcp.f32 %v2051_v43 }
 0x78a   : > { %v2811_v28 = vpack.c.bf16 %v6577_v29, %v6574_v0  ;;  %v6585_v15 = vpop.eup %5163 }
 0x78b   : > { %v6581_v6 = vpop.xlane.xlu1 %2056  ;;  %v2048_v10 = vpop.xlane.xlu0 %2047 }
 0x78c   : > { %4857 = vmatmul.mubr.msk.bf16.vlgmr.msra.gmra.mxu0 %vm1239_vm2, %v2811_v28  ;;  %5177 = vrcp.f32 %v2048_v10 }
 0x78d   : > { %4869 = vmatpush3.bf16.msra.mxu0 %v6391_v51  ;;  %v6589_v33 = vpop.eup %5165  ;;  %v2736_v51 = vmul.f32 1.442695, %v2708_v60  ;;  %v7577_v60 = vmov 0  }
 0x78e   : > { %4870 = vmatprep.subr.bf16.mxu0 %v5869_v59  ;;  %v6593_v40 = vpop.eup %5167 }
 0x78f   : > { %v2695_v1 = vpop.xlane.xlu1 %2694  ;;  %v6591_v53 = vpop.xlane.xlu0 %2053  ;;  %v2813_v3 = vpack.c.bf16 %v6589_v33, %v6593_v40  ;;  %5179 = vpow2.f32 %v2736_v51 }
 0x790   : > { %v2711_v31 = vsub.f32 %v6493_v22, %v2695_v1 }
 0x791   : > { %v6596_v16 = vpop.eup %5169  ;;  %4871 = vmatpush3.bf16.msra.mxu0 %v5869_v59 }
 0x792   : > { %v2812_v11 = vpack.c.bf16 %v6596_v16, %v6585_v15  ;;  %v2742_v41 = vmul.f32 1.442695, %v2711_v31  ;;  %v5172_v22 = vpop.eup %5171 }
 0x793   : > { %v2689_v32 = vpop.xlane.xlu1 %2688  ;;  %v6602_v56 = vpop.xlane.xlu0 %2059 }
 0x794   : > { %v2709_v55 = vsub.f32 %v6499_v17, %v2689_v32  ;;  %4864 = vmatprep.mubr.msk.bf16.mxu1 %vm1239_vm2, %v2812_v11  ;;  %5181 = vpow2.f32 %v2742_v41  ;;  %v2357_v17 = vmul.f32 %v5172_v22, %v6401_v37 }
 0x795   : > { %4865 = vmatmul.mubr.msk.bf16.vlgmr.msra.gmra.mxu1 %vm1239_vm2, %v2813_v3  ;;  %v5174_v52 = vpop.eup %5173 }
 0x796   : > { %v2738_v59 = vmul.f32 1.442695, %v2709_v55  ;;  %v5176_v26 = vpop.eup %5175  ;;  %v2356_v9 = vmul.f32 %v5174_v52, %v6397_v25 }
 0x797   : > { %v6609_v5 = vpop.xlane.xlu1 %2062  ;;  %v6611_v30 = vpop.xlane.xlu0 %2065  ;;  %v2359_v18 = vmul.f32 %v5176_v26, %v6399_v38 }
 0x798   : > { %5183 = vpow2.f32 %v2738_v59  ;;  %v4938_v20 = vpack.i.bf16 %v2357_v17, %v2356_v9  ;;  %v2753_v59 = vsel %vm1239_vm2, %v6552_v13, 0.0  ;;  %v2777_v13 = vsel %vm1239_vm2, %v6589_v33, 0.0 }
 0x799   : > { %5185 = vpow2.f32 %v2740_v24  ;;  %v5178_v21 = vpop.eup %5177  ;;  %v2750_v24 = vsel %vm1239_vm2, %v6549_v34, 0.0  ;;  %v2765_v34 = vsel %vm1239_vm2, %v6577_v29, 0.0  ;;  %v2771_v29 = vsel %vm1239_vm2, %v6596_v16, 0.0 }
 0x79a   : > { %v2358_v36 = vmul.f32 %v5178_v21, %v6395_v45  ;;  %4939 = vrot.lane.b32.xlu0 %v4938_v20, %s5400_s25 }
 0x79b   : > { %v6615_v50 = vpop.xlane.xlu1 %2068  ;;  %v2072_v61 = vpop.xlane.xlu0 %2071 }
 0x79c   : > { %v4943_v47 = vpack.i.bf16 %v2359_v18, %v2358_v36  ;;  %5187 = vrcp.f32 %v2072_v61  ;;  %v5180_v37 = vpop.eup %5179 }
 0x79e   : > { %4944 = vrot.lane.b32.xlu1 %v4943_v47, %s5400_s25 }
 0x79f   : > { %v2075_v63 = vpop.xlane.xlu1 %2074  ;;  %v6621_v25 = vpop.xlane.xlu0 %2077 }
 0x7a0   : > { %5189 = vrcp.f32 %v2075_v63 }
 0x7a1   : > { %v6625_v43 = vpop.eup %5181 }
 0x7a2   : > { %v2789_v63 = vsel %vm1239_vm2, %v6625_v43, 0.0 }
 0x7a3   : > { %v6623_v54 = vpop.xlane.xlu1 %2080  ;;  %v2084_v35 = vpop.xlane.xlu0 %2083 }
 0x7a4   : > { %5191 = vrcp.f32 %v2084_v35  ;;  %v7578_v35 = vld [vmem:[#allocation10_spill] sm:$0xff] }
 0x7a5   : > { %v6627_v44 = vpop.eup %5183 }
 0x7a6   : > { %v5186_v45 = vpop.eup %5185  ;;  %v2814_v38 = vpack.c.bf16 %v6627_v44, %v5180_v37 }
 0x7a7   : > { %v2087_v28 = vpop.xlane.xlu1 %2086  ;;  %v2815_v10 = vpack.c.bf16 %v6625_v43, %v5186_v45  ;;  %v2786_v33 = vsel %vm1239_vm2, %v5186_v45, 0.0  ;;  %v1338_v21 = vpop.xlane.xlu0 %1337  ;;  %v7581_v43 = vld [vmem:[#allocation8_spill] sm:$0xff] }
 0x7a8   : > { %5193 = vrcp.f32 %v2087_v28  ;;  %4872 = vmatprep.mubr.msk.bf16.mxu0 %vm1239_vm2, %v2814_v38  ;;  %v7579_v38 = vld [vmem:[#allocation14_spill] sm:$0xff] }
 0x7a9   : > { %4873 = vmatmul.mubr.msk.bf16.vlgmr.msra.gmra.mxu0 %vm1239_vm2, %v2815_v10  ;;  %v5188_v1 = vpop.eup %5187  ;;  %5195 = vrcp.f32 %v6609_v5 }
 0x7aa   : > { %3754 = vmatprep.mubr.bf16.mxu0 %v7577_v60  ;;  %v6635_v42 = vmul.f32 %v5188_v1, %v6403_v27  ;;  %v1360_v27 = vsel %vm1239_vm2, %v6090_v19, 0.0  ;;  %v1369_v19 = vsel %vm1239_vm2, %v6087_v39, 0.0  ;;  %v2756_v39 = vsel %vm1239_vm2, %v6568_v57, 0.0 }
 0x7ab   : > { %5197 = vrcp.f32 %v6602_v56  ;;  %v2780_v57 = vsel %vm1239_vm2, %v5180_v37, 0.0 }
 0x7ac   : > { %5199 = vrcp.f32 %v6591_v53  ;;  %v1341_v53 = vpop.xlane.xlu1 %1340 }
 0x7ad   : > { %v5190_v31 = vpop.eup %5189  ;;  %5201 = vrcp.f32 %v6581_v6  ;;  %v1344_v6 = vpop.xlane.xlu0 %1343 }
 0x7ae   : > { %v6638_v51 = vmul.f32 %v5190_v31, %v6407_v48  ;;  %v1366_v48 = vsel %vm1239_vm2, %v6094_v62, 0.0  ;;  %v2747_v62 = vsel %vm1239_vm2, %v6545_v49, 0.0  ;;  %v2759_v49 = vsel %vm1239_vm2, %v6570_v4, 0.0 }
 0x7af   : > { %5203 = vrcp.f32 %v1338_v21 }
 0x7b0   : > { %v4983_v11 = vpack.i.bf16 %v6638_v51, %v6635_v42  ;;  %5205 = vrcp.f32 %v1341_v53 }
 0x7b1   : > { %v5192_v41 = vpop.eup %5191  ;;  %5207 = vrcp.f32 %v1344_v6 }
 0x7b2   : > { %v6643_v3 = vmul.f32 %v5192_v41, %v6435_v46  ;;  %v1363_v46 = vsel %vm1239_vm2, %v6092_v58, 0.0  ;;  %v2762_v58 = vsel %vm1239_vm2, %v6574_v0, 0.0  ;;  %v2768_v0 = vsel %vm1239_vm2, %v6585_v15, 0.0 }
 0x7b5   : > { %v5194_v32 = vpop.eup %5193 }
 0x7b6   : > { %v6646_v55 = vmul.f32 %v5194_v32, %v6439_v14  ;;  %v2744_v14 = vsel %vm1239_vm2, %v6543_v2, 0.0  ;;  %v2774_v2 = vsel %vm1239_vm2, %v6593_v40, 0.0  ;;  %v5196_v40 = vpop.eup %5195 }
 0x7b7   : > { %v2363_v56 = vmul.f32 %v5196_v40, %v6425_v23  ;;  %v1347_v23 = vpop.xlane.xlu1 %1346  ;;  %v7586_v40 = vld [vmem:[#allocation23_spill] sm:$0xff] }
 0x7b8   : > { %v5003_v22 = vpack.i.bf16 %v6646_v55, %v6643_v3  ;;  %v5198_v4 = vpop.eup %5197  ;;  %5209 = vrcp.f32 %v1347_v23 }
 0x7b9   : > { %1361 = vadd.xlane.f32.xlu0 %v1360_v27  ;;  %v2362_v15 = vmul.f32 %v5198_v4, %v6411_v8  ;;  %v5200_v16 = vpop.eup %5199  ;;  %v6694_v8 = vpop.xlane.xlu0 %1349  ;;  %v7580_v27 = vld [vmem:[#allocation12_spill] sm:$0xff]  ;;  %5211 = vrcp.f32 %v6615_v50  ;;  %v7588_v50 = vld [vmem:[#allocation25_spill] sm:$0xff] }
 0x7ba   : > { %v5202_v5 = vpop.eup %5201  ;;  %v2360_v26 = vmul.f32 %v5200_v16, %v6417_v12  ;;  %5213 = vrcp.f32 %v6611_v30 }
 0x7bb   : > { %v4953_v52 = vpack.i.bf16 %v2363_v56, %v2362_v15  ;;  %v2361_v9 = vmul.f32 %v5202_v5, %v6431_v7  ;;  %v6696_v20 = vpop.xlane.xlu1 %1352  ;;  %5215 = vrcp.f32 %v6623_v54 }
 0x7bc   : > { %v5204_v12 = vpop.eup %5203  ;;  %5217 = vrcp.f32 %v6621_v25  ;;  %v5027_v25 = vld [vmem:[%s7533_s6 + $0x10] sm:$0xff]  }
 0x7bd   : > { %1367 = vadd.xlane.f32.xlu0 %v1366_v48  ;;  %v4948_v17 = vpack.i.bf16 %v2361_v9, %v2360_v26  ;;  %v6698_v61 = vpop.xlane.xlu0 %1355  ;;  %v5206_v36 = vpop.eup %5205  ;;  %v1652_v45 = vmul.f32 %v5204_v12, %v7578_v35  ;;  %4876 = vmatprep.subr.bf16.mxu1 %v5027_v25 }
 0x7be   : > { %v5208_v18 = vpop.eup %5207  ;;  %v1653_v28 = vmul.f32 %v5206_v36, %v7579_v38  ;;  %4877 = vmatpush3.bf16.msra.mxu1 %v5027_v25  ;;  %v5028_v36 = vld [vmem:[%s7533_s6 + $0x8] sm:$0xff]  }
 0x7bf   : > { %v6700_v7 = vpop.xlane.xlu1 %1358  ;;  %4878 = vmatprep.subr.bf16.mxu1 %v5028_v36 }
 0x7c1   : > { %2751 = vadd.xlane.f32.xlu0 %v2750_v24 }
 0x7c2   : > { %1364 = vadd.xlane.f32.xlu1 %v1363_v46  ;;  %4879 = vmatpush3.bf16.msra.mxu1 %v5028_v36 }
 0x7c5   : > { %2745 = vadd.xlane.f32.xlu0 %v2744_v14  ;;  %v5210_v37 = vpop.eup %5209  ;;  %v1654_v14 = vmul.f32 %v5208_v18, %v7581_v43 }
 0x7c6   : > { %2754 = vadd.xlane.f32.xlu1 %v2753_v59  ;;  %v1655_v48 = vmul.f32 %v5210_v37, %v7580_v27  ;;  %v2783_v59 = vsel %vm1239_vm2, %v6627_v44, 0.0  ;;  %v5212_v44 = vpop.eup %5211  ;;  %v5029_v37 = vld [vmem:[%s7533_s6] sm:$0xff]  }
 0x7c7   : > { %4880 = vmatprep.subr.bf16.mxu1 %v5029_v37 }
 0x7c8   : > { %4881 = vmatpush3.bf16.msra.mxu1 %v5029_v37 }
 0x7c9   : > { %1370 = vadd.xlane.f32.xlu0 %v1369_v19  ;;  %4267 = vmatprep.subr.bf16.mxu1 %v7577_v60 }
 0x7ca   : > { %2748 = vadd.xlane.f32.xlu1 %v2747_v62 }
 0x7cd   : > { %2763 = vadd.xlane.f32.xlu0 %v2762_v58  ;;  %v7582_v58 = vld [vmem:[#allocation6_spill] sm:$0xff] }
 0x7ce   : > { %2766 = vadd.xlane.f32.xlu1 %v2765_v34  ;;  %v1372_v34 = vsel %vm1239_vm2, %v7582_v58, 0.0 }
 0x7d1   : > { %2775 = vadd.xlane.f32.xlu0 %v2774_v2  ;;  %v7583_v2 = vld [vmem:[#allocation4_spill] sm:$0xff] }
 0x7d2   : > { %2778 = vadd.xlane.f32.xlu1 %v2777_v13  ;;  %v1378_v13 = vsel %vm1239_vm2, %v7583_v2, 0.0 }
 0x7d5   : > { %2757 = vadd.xlane.f32.xlu0 %v2756_v39  ;;  %v7584_v39 = vld [vmem:[#allocation3_spill] sm:$0xff] }
 0x7d6   : > { %2760 = vadd.xlane.f32.xlu1 %v2759_v49  ;;  %v1381_v49 = vsel %vm1239_vm2, %v7584_v39, 0.0 }
 0x7d9   : > { %2769 = vadd.xlane.f32.xlu0 %v2768_v0  ;;  %v5214_v0 = vpop.eup %5213 }
 0x7da   : > { %2772 = vadd.xlane.f32.xlu1 %v2771_v29  ;;  %v7585_v29 = vld [vmem:[#allocation24_spill] sm:$0xff]  ;;  %v2364_v4 = vmul.f32 %v5214_v0, %v7586_v40 }
 0x7dd   : > { %2787 = vadd.xlane.f32.xlu0 %v2786_v33  ;;  %v2365_v33 = vmul.f32 %v5212_v44, %v7585_v29 }
 0x7df   : > { %v4978_v15 = vpack.i.bf16 %v2365_v33, %v2364_v4 }
 0x7e1   : > { %2781 = vadd.xlane.f32.xlu0 %v2780_v57  ;;  %v5216_v57 = vpop.eup %5215 }
 0x7e2   : > { %v5218_v56 = vpop.eup %5217 }
 0x7e3   : > { %v2368_v5 = vmul.f32 %v5218_v56, %v7588_v50 }
 0x7eb   : > { %4954 = vrot.lane.b32.xlu1 %v4953_v52, %s5400_s25  ;;  %v7587_v52 = vld [vmem:[#allocation26_spill] sm:$0xff] }
 0x7ec   : > { %v2369_v16 = vmul.f32 %v5216_v57, %v7587_v52 }
 0x7ee   : > { %v4998_v30 = vpack.i.bf16 %v2369_v16, %v2368_v5 }
 0x7f7   : > { %4949 = vrot.lane.b32.xlu0 %v4948_v17, %s5400_s25 }
 0x80c   : > { %v4940_v47 = vpop.permute.xlu0 %4939 }
 0x80d   : > { %v4942_v10 = vunpack.i.h.bf16 %v4940_v47  ;;  %v4941_v1 = vunpack.i.l.bf16 %v4940_v47 }
 0x80f   : > { %2790 = vadd.xlane.f32.xlu1 %v2789_v63  ;;  %v6707_v31 = vsel %vm976_vm1, %v1653_v28, %v4942_v10  ;;  %v6710_v41 = vsel %vm976_vm1, %v1652_v45, %v4941_v1 }
 0x810   : > { %v4945_v32 = vpop.permute.xlu1 %4944 }
 0x811   : > { %v4947_v24 = vunpack.i.h.bf16 %v4945_v32  ;;  %v4946_v46 = vunpack.i.l.bf16 %v4945_v32 }
 0x813   : > { %v6717_v19 = vsel %vm976_vm1, %v1655_v48, %v4947_v24  ;;  %v6720_v62 = vsel %vm976_vm1, %v1654_v14, %v4946_v46  ;;  %2784 = vadd.xlane.f32.xlu1 %v2783_v59 }
 0x816   : > { %1373 = vadd.xlane.f32.xlu0 %v1372_v34 }
 0x81a   : > { %1379 = vadd.xlane.f32.xlu0 %v1378_v13 }
 0x81e   : > { %1382 = vadd.xlane.f32.xlu0 %v1381_v49 }
 0x831   : > { %v4850_v12 = vpop.f32.mrf.mxu1 }
 0x833   : > { %v2856_v63 = vpop.f32.mrf.mxu1 }
 0x834   : > { %4979 = vrot.lane.b32.xlu0 %v4978_v15, %s5400_s25 }
 0x835   : > { %v4851_v28 = vpop.f32.mrf.mxu1 }
 0x837   : > { %v2859_v43 = vpop.f32.mrf.mxu1 }
 0x838   : > { %4999 = vrot.lane.b32.xlu0 %v4998_v30, %s5400_s25 }
 0x842   : > { %v6741_v54 = vpop.xlane.xlu0 %1361 }
 0x846   : > { %v6743_v26 = vpop.xlane.xlu0 %1367 }
 0x84a   : > { %v2752_v9 = vpop.xlane.xlu0 %2751 }
 0x84b   : > { %v6745_v17 = vpop.xlane.xlu1 %1364  ;;  %5219 = vrcp.f32 %v2752_v9 }
 0x84c   : > { %v4858_v1 = vpop.f32.mrf.mxu0 }
 0x84e   : > { %v2746_v21 = vpop.xlane.xlu0 %2745  ;;  %v2911_v58 = vpop.f32.mrf.mxu0 }
 0x84f   : > { %v2755_v53 = vpop.xlane.xlu1 %2754 }
 0x850   : > { %5221 = vrcp.f32 %v2755_v53  ;;  %v4859_v0 = vpop.f32.mrf.mxu0 }
 0x851   : > { %5223 = vrcp.f32 %v2746_v21 }
 0x852   : > { %v6747_v6 = vpop.xlane.xlu0 %1370  ;;  %v2914_v25 = vpop.f32.mrf.mxu0 }
 0x853   : > { %v2749_v23 = vpop.xlane.xlu1 %2748 }
 0x854   : > { %5225 = vrcp.f32 %v2749_v23 }
 0x855   : > { %v4866_v34 = vpop.f32.mrf.mxu1 }
 0x856   : > { %v2764_v18 = vpop.xlane.xlu0 %2763 }
 0x857   : > { %v2767_v47 = vpop.xlane.xlu1 %2766  ;;  %5227 = vrcp.f32 %v2764_v18  ;;  %v2966_v29 = vpop.f32.mrf.mxu1 }
 0x858   : > { %5229 = vrcp.f32 %v2767_v47  ;;  %v5220_v38 = vpop.eup %5219  ;;  %v7589_v47 = vld [vmem:[#allocation5_spill] sm:$0xff] }
 0x859   : > { %v3038_v48 = vmul.f32 %v5220_v38, %v4850_v12  ;;  %v4867_v15 = vpop.f32.mrf.mxu1 }
 0x85a   : > { %v2776_v35 = vpop.xlane.xlu0 %2775 }
 0x85b   : > { %v2779_v45 = vpop.xlane.xlu1 %2778  ;;  %5231 = vrcp.f32 %v2776_v35 }
 0x85c   : > { %5233 = vrcp.f32 %v2779_v45 }
 0x85d   : > { %v5222_v10 = vpop.eup %5221 }
 0x85e   : > { %v2758_v32 = vpop.xlane.xlu0 %2757  ;;  %v3039_v24 = vmul.f32 %v5222_v10, %v4851_v28  ;;  %v5224_v46 = vpop.eup %5223 }
 0x85f   : > { %v2761_v27 = vpop.xlane.xlu1 %2760  ;;  %5235 = vrcp.f32 %v2758_v32  ;;  %v3036_v2 = vmul.f32 %v5224_v46, %v2856_v63  ;;  %v1375_v63 = vsel %vm1239_vm2, %v7589_v47, 0.0  ;;  %v2969_v32 = vpop.f32.mrf.mxu1 }
 0x860   : > { %5237 = vrcp.f32 %v2761_v27  ;;  %v4958_v14 = vpack.i.bf16 %v3039_v24, %v3038_v48 }
 0x861   : > { %v5226_v59 = vpop.eup %5225 }
 0x862   : > { %4959 = vrot.lane.b32.xlu1 %v4958_v14, %s5397_s22  ;;  %v3037_v13 = vmul.f32 %v5226_v59, %v2859_v43  ;;  %v2770_v23 = vpop.xlane.xlu0 %2769 }
 0x863   : > { %v2773_v12 = vpop.xlane.xlu1 %2772  ;;  %5239 = vrcp.f32 %v2770_v23  ;;  %v7593_v23 = vld [vmem:[#allocation18_spill] sm:$0xff] }
 0x864   : > { %v5228_v39 = vpop.eup %5227  ;;  %v4963_v49 = vpack.i.bf16 %v3037_v13, %v3036_v2  ;;  %5241 = vrcp.f32 %v2773_v12 }
 0x865   : > { %v5230_v44 = vpop.eup %5229  ;;  %v3042_v33 = vmul.f32 %v5228_v39, %v4858_v1 }
 0x866   : > { %4964 = vrot.lane.b32.xlu1 %v4963_v49, %s5397_s22  ;;  %v3043_v57 = vmul.f32 %v5230_v44, %v4859_v0  ;;  %v2788_v36 = vpop.xlane.xlu0 %2787 }
 0x867   : > { %v6760_v18 = vpop.permute.xlu1 %4954 }
 0x868   : > { %v5232_v40 = vpop.eup %5231  ;;  %v4968_v4 = vpack.i.bf16 %v3043_v57, %v3042_v33 }
 0x869   : > { %v5234_v56 = vpop.eup %5233  ;;  %v3046_v52 = vmul.f32 %v5232_v40, %v4866_v34  ;;  %v4874_v38 = vpop.f32.mrf.mxu0 }
 0x86a   : > { %4969 = vrot.lane.b32.xlu1 %v4968_v4, %s5397_s22  ;;  %v3047_v16 = vmul.f32 %v5234_v56, %v4867_v15  ;;  %v2782_v37 = vpop.xlane.xlu0 %2781  ;;  %v4957_v15 = vunpack.i.h.bf16 %v6760_v18 }
 0x86b   : > { %5243 = vrcp.f32 %v2782_v37  ;;  %v3021_v10 = vpop.f32.mrf.mxu0 }
 0x86c   : > { %v5236_v50 = vpop.eup %5235  ;;  %v4993_v5 = vpack.i.bf16 %v3047_v16, %v3046_v52  ;;  %v4956_v52 = vunpack.i.l.bf16 %v6760_v18 }
 0x86d   : > { %v5238_v30 = vpop.eup %5237  ;;  %v3040_v9 = vmul.f32 %v5236_v50, %v2911_v58  ;;  %v4875_v27 = vpop.f32.mrf.mxu0 }
 0x86e   : > { %v3041_v21 = vmul.f32 %v5238_v30, %v2914_v25  ;;  %v4950_v4 = vpop.permute.xlu0 %4949  ;;  %v7591_v25 = vld [vmem:[#allocation15_spill] sm:$0xff] }
 0x86f   : > { %v3024_v14 = vpop.f32.mrf.mxu0  ;;  %v4952_v16 = vunpack.i.h.bf16 %v4950_v4 }
 0x870   : > { %v4973_v53 = vpack.i.bf16 %v3041_v21, %v3040_v9  ;;  %v5240_v28 = vpop.eup %5239  ;;  %v7592_v21 = vld [vmem:[#allocation16_spill] sm:$0xff] }
 0x871   : > { %v5242_v1 = vpop.eup %5241  ;;  %v3044_v48 = vmul.f32 %v5240_v28, %v2966_v29 }
 0x872   : > { %4974 = vrot.lane.b32.xlu1 %v4973_v53, %s5397_s22  ;;  %v3045_v24 = vmul.f32 %v5242_v1, %v2969_v32 }
 0x874   : > { %v4988_v59 = vpack.i.bf16 %v3045_v24, %v3044_v48 }
 0x878   : > { %v5244_v46 = vpop.eup %5243 }
 0x879   : > { %v3048_v58 = vmul.f32 %v5244_v46, %v3021_v10 }
 0x896   : > { %1376 = vadd.xlane.f32.xlu1 %v1375_v63 }
 0x898   : > { %v2791_v35 = vpop.xlane.xlu1 %2790 }
 0x89c   : > { %v2785_v45 = vpop.xlane.xlu1 %2784 }
 0x89d   : > { %5245 = vrcp.f32 %v2785_v45 }
 0x89e   : > { %5247 = vrcp.f32 %v2791_v35 }
 0x89f   : > { %5249 = vrcp.f32 %v2788_v36  ;;  %v1374_v48 = vpop.xlane.xlu0 %1373 }
 0x8a0   : > { %5251 = vrcp.f32 %v6694_v8 }
 0x8a1   : > { %5253 = vrcp.f32 %v6698_v61 }
 0x8a2   : > { %5255 = vrcp.f32 %v6700_v7 }
 0x8a3   : > { %5257 = vrcp.f32 %v6696_v20  ;;  %v1380_v24 = vpop.xlane.xlu0 %1379 }
 0x8a4   : > { %5259 = vrcp.f32 %v6741_v54 }
 0x8a5   : > { %5261 = vrcp.f32 %v6745_v17 }
 0x8a6   : > { %5263 = vrcp.f32 %v6743_v26 }
 0x8a7   : > { %4984 = vrot.lane.b32.xlu1 %v4983_v11, %s5400_s25  ;;  %v1383_v46 = vpop.xlane.xlu0 %1382  ;;  %5265 = vrcp.f32 %v6747_v6 }
 0x8a8   : > { %5267 = vrcp.f32 %v1374_v48 }
 0x8aa   : > { %v5246_v43 = vpop.eup %5245 }
 0x8ab   : > { %v3049_v34 = vmul.f32 %v5246_v43, %v3024_v14  ;;  %4989 = vrot.lane.b32.xlu1 %v4988_v59, %s5397_s22  ;;  %v5248_v13 = vpop.eup %5247  ;;  %v4980_v14 = vpop.permute.xlu0 %4979 }
 0x8ac   : > { %v5250_v39 = vpop.eup %5249  ;;  %v3051_v49 = vmul.f32 %v5248_v13, %v4875_v27  ;;  %v4981_v13 = vunpack.i.l.bf16 %v4980_v14 }
 0x8ad   : > { %v5008_v2 = vpack.i.bf16 %v3049_v34, %v3048_v58  ;;  %v3050_v44 = vmul.f32 %v5250_v39, %v4874_v38  ;;  %v5252_v7 = vpop.eup %5251 }
 0x8ae   : > { %v5254_v40 = vpop.eup %5253  ;;  %v1656_v53 = vmul.f32 %v5252_v7, %v7592_v21  ;;  %v7597_v7 = vld [vmem:[#allocation11_spill] sm:$0xff] }
 0x8af   : > { %5009 = vrot.lane.b32.xlu0 %v5008_v2, %s5397_s22  ;;  %4994 = vrot.lane.b32.xlu1 %v4993_v5, %s5397_s22  ;;  %v5013_v42 = vpack.i.bf16 %v3051_v49, %v3050_v44  ;;  %v1658_v9 = vmul.f32 %v5254_v40, %v7591_v25  ;;  %v4982_v2 = vunpack.i.h.bf16 %v4980_v14  ;;  %v5000_v39 = vpop.permute.xlu0 %4999  ;;  %v7594_v49 = vld [vmem:[#allocation9_spill] sm:$0xff]  ;;  %v7599_v25 = vld [vmem:[#allocation22_spill] sm:$0xff] }
 0x8b0   : > { %v7595_v44 = vld [vmem:[#allocation13_spill] sm:$0xff] }
 0x8b1   : > { %v3186_v63 = vsel %vm976_vm1, %v1658_v9, %v4956_v52 }
 0x8b3   : > { %5004 = vrot.lane.b32.xlu1 %v5003_v22, %s5400_s25 }
 0x8b7   : > { %5014 = vrot.lane.b32.xlu1 %v5013_v42, %s5397_s22 }
 0x8d4   : > { %v4960_v51 = vpop.permute.xlu1 %4959 }
 0x8d5   : > { %v4962_v11 = vunpack.i.h.bf16 %v4960_v51  ;;  %v4961_v0 = vunpack.i.l.bf16 %v4960_v51 }
 0x8d7   : > { %v3199_v29 = vsel %vm1239_vm2, %v6717_v19, %v4962_v11  ;;  %v3198_v3 = vsel %vm1239_vm2, %v6720_v62, %v4961_v0  ;;  %v5256_v62 = vpop.eup %5255 }
 0x8d8   : > { %v3213_v55 = vpack.c.bf16 %v3199_v29, %v3198_v3  ;;  %v4965_v22 = vpop.permute.xlu1 %4964  ;;  %v5258_v56 = vpop.eup %5257 }
 0x8d9   : > { %v4967_v33 = vunpack.i.h.bf16 %v4965_v22  ;;  %v4966_v57 = vunpack.i.l.bf16 %v4965_v22  ;;  %v1657_v12 = vmul.f32 %v5258_v56, %v7593_v23  ;;  %v5260_v59 = vpop.eup %5259 }
 0x8da   : > { %v5262_v34 = vpop.eup %5261  ;;  %v1660_v17 = vmul.f32 %v5260_v59, %v7594_v49 }
 0x8db   : > { %v3196_v8 = vsel %vm1239_vm2, %v6710_v41, %v4966_v57  ;;  %v3197_v61 = vsel %vm1239_vm2, %v6707_v31, %v4967_v33  ;;  %v4951_v41 = vunpack.i.l.bf16 %v4950_v4  ;;  %v7590_v31 = vld [vmem:[#allocation17_spill] sm:$0xff]  ;;  %v3185_v18 = vsel %vm976_vm1, %v1657_v12, %v4952_v16  ;;  %v5264_v54 = vpop.eup %5263  ;;  %v7598_v16 = vld [vmem:[#allocation20_spill] sm:$0xff] }
 0x8dc   : > { %v3212_v20 = vpack.c.bf16 %v3197_v61, %v3196_v8  ;;  %v4970_v19 = vpop.permute.xlu1 %4969  ;;  %v1659_v30 = vmul.f32 %v5256_v62, %v7590_v31  ;;  %v1661_v26 = vmul.f32 %v5262_v34, %v7595_v44  ;;  %v5266_v51 = vpop.eup %5265  ;;  %v3188_v29 = vsel %vm976_vm1, %v1660_v17, %v4981_v13  ;;  %v7596_v61 = vld [vmem:[#allocation7_spill] sm:$0xff] }
 0x8dd   : > { %v4972_v50 = vunpack.i.h.bf16 %v4970_v19  ;;  %v4971_v5 = vunpack.i.l.bf16 %v4970_v19  ;;  %v3184_v45 = vsel %vm976_vm1, %v1656_v53, %v4951_v41  ;;  %v5268_v22 = vpop.eup %5267  ;;  %v1663_v40 = vmul.f32 %v5266_v51, %v7597_v7 }
 0x8de   : > { %4882 = vmatprep.mubr.msk.bf16.mxu1 %vm485_vm0, %v3212_v20  ;;  %v3187_v47 = vsel %vm976_vm1, %v1659_v30, %v4957_v15  ;;  %v3189_v0 = vsel %vm976_vm1, %v1661_v26, %v4982_v2  ;;  %v1662_v20 = vmul.f32 %v5264_v54, %v7596_v61  ;;  %v5001_v62 = vunpack.i.l.bf16 %v5000_v39  ;;  %v5371_v26 = vld [vmem:[%s5494_s18] sm:$0xff] }
 0x8df   : > { %4883 = vmatmul.mubr.msk.bf16.vlgmr.msra.gmra.mxu1 %vm485_vm0, %v3213_v55  ;;  %v3203_v38 = vsel %vm1239_vm2, %v3187_v47, %v4972_v50  ;;  %v3202_v28 = vsel %vm1239_vm2, %v3186_v63, %v4971_v5  ;;  %v1664_v41 = vmul.f32 %v5268_v22, %v7598_v16  ;;  %v5002_v30 = vunpack.i.h.bf16 %v5000_v39  ;;  %v6841_v39 = vld [vmem:[%s7534_s7] ss:$0 sm:$0xff]  ;;  %v5376_v16 = vld [vmem:[%s5494_s18 + $0x30] sm:$0xff] }
 0x8e0   : > { %v3215_v27 = vpack.c.bf16 %v3203_v38, %v3202_v28 }
 0x8e4   : > { %v4975_v36 = vpop.permute.xlu1 %4974 }
 0x8e5   : > { %v4977_v37 = vunpack.i.h.bf16 %v4975_v36  ;;  %v4976_v35 = vunpack.i.l.bf16 %v4975_v36 }
 0x8e7   : > { %v3200_v10 = vsel %vm1239_vm2, %v3184_v45, %v4976_v35  ;;  %v3201_v1 = vsel %vm1239_vm2, %v3185_v18, %v4977_v37  ;;  %v3192_v37 = vsel %vm976_vm1, %v1664_v41, %v5001_v62 }
 0x8e8   : > { %v3214_v32 = vpack.c.bf16 %v3201_v1, %v3200_v10  ;;  %v7600_v1 = vld [vmem:[#allocation19_spill] sm:$0xff] }
 0x8ea   : > { %4886 = vmatprep.mubr.msk.bf16.mxu1 %vm485_vm0, %v3214_v32 }
 0x8eb   : > { %4887 = vmatmul.mubr.msk.bf16.gmra.mxu1 %vm485_vm0, %v3215_v27  ;;  %v7601_v27 = vld [vmem:[#allocation21_spill] sm:$0xff] }
 0x91f   : > { %v1377_v43 = vpop.xlane.xlu1 %1376 }
 0x920   : > { %5269 = vrcp.f32 %v1377_v43 }
 0x921   : > { %5271 = vrcp.f32 %v1380_v24  ;;  %v5010_v33 = vpop.permute.xlu0 %5009 }
 0x922   : > { %5273 = vrcp.f32 %v1383_v46  ;;  %v5011_v50 = vunpack.i.l.bf16 %v5010_v33  ;;  %v5012_v12 = vunpack.i.h.bf16 %v5010_v33  ;;  %v5374_v33 = vld [vmem:[%s5494_s18 + $0x18] sm:$0xff] }
 0x923   : > { %v4985_v58 = vpop.permute.xlu1 %4984 }
 0x924   : > { %v4987_v3 = vunpack.i.h.bf16 %v4985_v58  ;;  %v4986_v55 = vunpack.i.l.bf16 %v4985_v58  ;;  %v3208_v18 = vsel %vm1239_vm2, %v3192_v37, %v5011_v50 }
 0x926   : > { %v3191_v5 = vsel %vm976_vm1, %v1663_v40, %v4987_v3  ;;  %v3190_v31 = vsel %vm976_vm1, %v1662_v20, %v4986_v55  ;;  %v5373_v55 = vld [vmem:[%s5494_s18 + $0x8] sm:$0xff] }
 0x927   : > { %v4990_v42 = vpop.permute.xlu1 %4989 }
 0x928   : > { %v4992_v6 = vunpack.i.h.bf16 %v4990_v42  ;;  %v4991_v11 = vunpack.i.l.bf16 %v4990_v42 }
 0x92a   : > { %v3204_v57 = vsel %vm1239_vm2, %v3188_v29, %v4991_v11  ;;  %v3205_v8 = vsel %vm1239_vm2, %v3189_v0, %v4992_v6  ;;  %v5372_v6 = vld [vmem:[%s5494_s18 + $0x10] sm:$0xff] }
 0x92b   : > { %v3216_v4 = vpack.c.bf16 %v3205_v8, %v3204_v57  ;;  %v4995_v19 = vpop.permute.xlu1 %4994 }
 0x92c   : > { %v4997_v56 = vunpack.i.h.bf16 %v4995_v19  ;;  %v4996_v15 = vunpack.i.l.bf16 %v4995_v19 }
 0x92d   : > { %v5270_v52 = vpop.eup %5269  ;;  %4890 = vmatprep.mubr.msk.bf16.mxu1 %vm485_vm0, %v3216_v4 }
 0x92e   : > { %v1665_v9 = vmul.f32 %v5270_v52, %v7599_v25  ;;  %v3207_v21 = vsel %vm1239_vm2, %v3191_v5, %v4997_v56  ;;  %v3206_v53 = vsel %vm1239_vm2, %v3190_v31, %v4996_v15  ;;  %v5272_v23 = vpop.eup %5271  ;;  %v5375_v56 = vld [vmem:[%s5494_s18 + $0x20] sm:$0xff] }
 0x92f   : > { %v3217_v36 = vpack.c.bf16 %v3207_v21, %v3206_v53  ;;  %v5005_v47 = vpop.permute.xlu1 %5004  ;;  %v5274_v63 = vpop.eup %5273  ;;  %v1666_v32 = vmul.f32 %v5272_v23, %v7600_v1 }
 0x930   : > { %v3193_v35 = vsel %vm976_vm1, %v1665_v9, %v5002_v30  ;;  %v5007_v38 = vunpack.i.h.bf16 %v5005_v47  ;;  %v5006_v28 = vunpack.i.l.bf16 %v5005_v47  ;;  %v1667_v48 = vmul.f32 %v5274_v63, %v7601_v27  ;;  %v5377_v30 = vld [vmem:[%s5494_s18 + $0x28] sm:$0xff]  ;;  %v5378_v9 = vld [vmem:[%s5494_s18 + $0x38] sm:$0xff] }
 0x931   : > { %v3209_v45 = vsel %vm1239_vm2, %v3193_v35, %v5012_v12  ;;  %4891 = vmatmul.mubr.msk.bf16.gmra.mxu1 %vm485_vm0, %v3217_v36 }
 0x932   : > { %v3218_v10 = vpack.c.bf16 %v3209_v45, %v3208_v18  ;;  %v3194_v14 = vsel %vm976_vm1, %v1666_v32, %v5006_v28  ;;  %v3195_v59 = vsel %vm976_vm1, %v1667_v48, %v5007_v38  ;;  %v5379_v18 = vld [vmem:[%s5494_s18 + $0x40] sm:$0xff] }
 0x933   : > { %v5015_v24 = vpop.permute.xlu1 %5014 }
 0x934   : > { %v5017_v46 = vunpack.i.h.bf16 %v5015_v24  ;;  %v5016_v43 = vunpack.i.l.bf16 %v5015_v24  ;;  %4894 = vmatprep.mubr.msk.bf16.mxu1 %vm485_vm0, %v3218_v10  ;;  %v5380_v10 = vld [vmem:[%s5494_s18 + $0x50] sm:$0xff]  ;;  %v5381_v24 = vld [vmem:[%s5494_s18 + $0x48] sm:$0xff] }
 0x936   : > { %v3210_v58 = vsel %vm1239_vm2, %v3194_v14, %v5016_v43  ;;  %v3211_v34 = vsel %vm1239_vm2, %v3195_v59, %v5017_v46  ;;  %v5382_v43 = vld [vmem:[%s5494_s18 + $0x58] sm:$0xff] }
 0x937   : > { %v3219_v2 = vpack.c.bf16 %v3211_v34, %v3210_v58 }
 0x939   : > { %4895 = vmatmul.mubr.msk.bf16.gmra.mxu1 %vm485_vm0, %v3219_v2 }
 0x99f   : > { %v4884_v13 = vpop.f32.mrf.mxu1 }
 0x9a0   : > { %v3318_v49 = vadd.f32 %v4884_v13, %v6841_v39 }
 0x9a1   : > { %v3309_v54 = vpop.f32.mrf.mxu1 }
 0x9a2   : > { %v3310_v17 = vadd.f32 %v6841_v39, %v3309_v54  ;;  %v6849_v11 = vadd.f32 %v5372_v6, %v3318_v49  ;;  %v5383_v49 = vld [vmem:[%s5494_s18 + $0x60] sm:$0xff] }
 0x9a3   : > { %v4885_v44 = vpop.f32.mrf.mxu1 }
 0x9a4   : > { %v6846_v42 = vadd.f32 %v5371_v26, %v3310_v17  ;;  %v3321_v0 = vadd.f32 %v4885_v44, %v6841_v39  ;;  %v3394_v61 = vsel %vm485_vm0, %v6849_v11, 0.0 }
 0x9a5   : > { %v3312_v51 = vpop.f32.mrf.mxu1 }
 0x9a6   : > { %v3313_v29 = vadd.f32 %v6841_v39, %v3312_v51  ;;  %v3388_v3 = vsel %vm485_vm0, %v6846_v42, 0.0  ;;  %v6859_v57 = vadd.f32 %v5374_v33, %v3321_v0  ;;  %v5384_v51 = vld [vmem:[%s5494_s18 + $0x70] sm:$0xff] }
 0x9a7   : > { %3389 = vadd.xlane.f32.xlu0 %v3388_v3 }
 0x9a8   : > { %v6856_v22 = vadd.f32 %v5373_v55, %v3313_v29  ;;  %v3397_v19 = vsel %vm485_vm0, %v6859_v57, 0.0  ;;  %v5385_v55 = vld [vmem:[%s5494_s18 + $0x68] sm:$0xff] }
 0x9aa   : > { %v3391_v8 = vsel %vm485_vm0, %v6856_v22, 0.0 }
 0x9ab   : > { %v4888_v20 = vpop.f32.mrf.mxu1  ;;  %3392 = vadd.xlane.f32.xlu1 %v3391_v8  ;;  %3395 = vadd.xlane.f32.xlu0 %v3394_v61  ;;  %v5386_v8 = vld [vmem:[%s5494_s18 + $0x78] sm:$0xff] }
 0x9ac   : > { %v3334_v40 = vadd.f32 %v4888_v20, %v6841_v39 }
 0x9ad   : > { %v3325_v7 = vpop.f32.mrf.mxu1 }
 0x9ae   : > { %v3326_v4 = vadd.f32 %v6841_v39, %v3325_v7  ;;  %v6873_v41 = vadd.f32 %v5376_v16, %v3334_v40 }
 0x9af   : > { %v4889_v62 = vpop.f32.mrf.mxu1  ;;  %3398 = vadd.xlane.f32.xlu0 %v3397_v19 }
 0x9b0   : > { %v6870_v15 = vadd.f32 %v5375_v56, %v3326_v4  ;;  %v3337_v50 = vadd.f32 %v4889_v62, %v6841_v39  ;;  %v3406_v23 = vsel %vm485_vm0, %v6873_v41, 0.0 }
 0x9b1   : > { %v3328_v52 = vpop.f32.mrf.mxu1 }
 0x9b2   : > { %v3329_v5 = vadd.f32 %v6841_v39, %v3328_v52  ;;  %v3400_v31 = vsel %vm485_vm0, %v6870_v15, 0.0  ;;  %v6883_v21 = vadd.f32 %v5378_v9, %v3337_v50 }
 0x9b3   : > { %3401 = vadd.xlane.f32.xlu0 %v3400_v31 }
 0x9b4   : > { %v6880_v25 = vadd.f32 %v5377_v30, %v3329_v5  ;;  %v3409_v12 = vsel %vm485_vm0, %v6883_v21, 0.0 }
 0x9b6   : > { %v3403_v53 = vsel %vm485_vm0, %v6880_v25, 0.0 }
 0x9b7   : > { %3404 = vadd.xlane.f32.xlu1 %v3403_v53  ;;  %3407 = vadd.xlane.f32.xlu0 %v3406_v23 }
 0x9bb   : > { %3410 = vadd.xlane.f32.xlu1 %v3409_v12 }
 0x9f1   : > { %v4892_v36 = vpop.f32.mrf.mxu1 }
 0x9f2   : > { %v3350_v63 = vadd.f32 %v4892_v36, %v6841_v39 }
 0x9f3   : > { %v3341_v47 = vpop.f32.mrf.mxu1 }
 0x9f4   : > { %v3342_v37 = vadd.f32 %v6841_v39, %v3341_v47  ;;  %v6898_v1 = vadd.f32 %v5380_v10, %v3350_v63 }
 0x9f5   : > { %v4893_v35 = vpop.f32.mrf.mxu1 }
 0x9f6   : > { %v6894_v45 = vadd.f32 %v5379_v18, %v3342_v37  ;;  %v3353_v38 = vadd.f32 %v4893_v35, %v6841_v39  ;;  %v3418_v13 = vsel %vm485_vm0, %v6898_v1, 0.0 }
 0x9f7   : > { %v3344_v28 = vpop.f32.mrf.mxu1 }
 0x9f8   : > { %v3345_v32 = vadd.f32 %v6841_v39, %v3344_v28  ;;  %v3412_v27 = vsel %vm485_vm0, %v6894_v45, 0.0  ;;  %v6907_v14 = vadd.f32 %v5382_v43, %v3353_v38 }
 0x9f9   : > { %v4896_v48 = vpop.f32.mrf.mxu1  ;;  %3413 = vadd.xlane.f32.xlu0 %v3412_v27 }
 0x9fa   : > { %v6904_v46 = vadd.f32 %v5381_v24, %v3345_v32  ;;  %v3366_v58 = vadd.f32 %v4896_v48, %v6841_v39  ;;  %v3421_v26 = vsel %vm485_vm0, %v6907_v14, 0.0 }
 0x9fb   : > { %v3357_v59 = vpop.f32.mrf.mxu1 }
 0x9fc   : > { %v3358_v34 = vadd.f32 %v6841_v39, %v3357_v59  ;;  %v3415_v2 = vsel %vm485_vm0, %v6904_v46, 0.0  ;;  %v6921_v6 = vadd.f32 %v5384_v51, %v3366_v58 }
 0x9fd   : > { %v4897_v54 = vpop.f32.mrf.mxu1  ;;  %3416 = vadd.xlane.f32.xlu1 %v3415_v2  ;;  %3419 = vadd.xlane.f32.xlu0 %v3418_v13 }
 0x9fe   : > { %v6916_v17 = vadd.f32 %v5383_v49, %v3358_v34  ;;  %v3369_v0 = vadd.f32 %v4897_v54, %v6841_v39  ;;  %v3430_v7 = vsel %vm485_vm0, %v6921_v6, 0.0 }
 0x9ff   : > { %v3360_v44 = vpop.f32.mrf.mxu1 }
 0xa00   : > { %v3361_v29 = vadd.f32 %v6841_v39, %v3360_v44  ;;  %v3424_v3 = vsel %vm485_vm0, %v6916_v17, 0.0  ;;  %v6931_v61 = vadd.f32 %v5386_v8, %v3369_v0  ;;  %v5033_v8 = vld [vmem:[%s7537_s10 + $0x10] ss:$8 sps:$4 sm:$0xff]  }
 0xa01   : > { %3422 = vadd.xlane.f32.xlu1 %v3421_v26  ;;  %3425 = vadd.xlane.f32.xlu0 %v3424_v3  ;;  %v5030_v3 = vld [vmem:[%s7537_s10 + $0x20] ss:$8 sps:$4 sm:$0xff]  }
 0xa02   : > { %v6928_v33 = vadd.f32 %v5385_v55, %v3361_v29  ;;  %v3433_v39 = vsel %vm485_vm0, %v6931_v61, 0.0  ;;  %v5032_v29 = vld [vmem:[%s7537_s10 + $0x24] ss:$8 sps:$4 sm:$0xff]   ;;  %v5035_v55 = vld [vmem:[%s7537_s10 + $0x14] ss:$8 sps:$4 sm:$0xff]  }
 0xa03   : > { %3732 = vmatprep.subr.bf16.mxu0 %v5032_v29 }
 0xa04   : > { %v3427_v20 = vsel %vm485_vm0, %v6928_v33, 0.0  ;;  %3733 = vmatpush1.bf16.msra.mxu0 %v5030_v3 }
 0xa05   : > { %3428 = vadd.xlane.f32.xlu1 %v3427_v20  ;;  %3431 = vadd.xlane.f32.xlu0 %v3430_v7  ;;  %v5036_v20 = vld [vmem:[%s7537_s10] ss:$8 sps:$4 sm:$0xff]   ;;  %v5038_v7 = vld [vmem:[%s7537_s10 + $0x4] ss:$8 sps:$4 sm:$0xff]  }
 0xa06   : > { %3734 = vmatprep.subr.bf16.mxu0 %v5035_v55 }
 0xa08   : > { %3735 = vmatpush1.bf16.msra.mxu0 %v5033_v8 }
 0xa09   : > { %3434 = vadd.xlane.f32.xlu1 %v3433_v39  ;;  %3736 = vmatprep.subr.bf16.mxu0 %v5038_v7 }
 0xa0c   : > { %3737 = vmatpush1.bf16.msra.mxu0 %v5036_v20 }
 0xa30   : > { %v3390_v40 = vpop.xlane.xlu0 %3389 }
 0xa31   : > { %v3436_v4 = vmul.f32 0.020833334, %v3390_v40 }
 0xa33   : > { %v6940_v19 = vsub.f32 %v6846_v42, %v3436_v4 }
 0xa34   : > { %v3393_v62 = vpop.xlane.xlu1 %3392  ;;  %v3396_v56 = vpop.xlane.xlu0 %3395 }
 0xa35   : > { %v3437_v52 = vmul.f32 0.020833334, %v3393_v62  ;;  %v3438_v16 = vmul.f32 0.020833334, %v3396_v56  ;;  %v3468_v50 = vmul.f32 %v6940_v19, %v6940_v19 }
 0xa37   : > { %v6945_v5 = vsub.f32 %v6856_v22, %v3437_v52  ;;  %v6948_v31 = vsub.f32 %v6849_v11, %v3438_v16  ;;  %v3484_v30 = vsel %vm485_vm0, %v3468_v50, 0.0 }
 0xa38   : > { %3485 = vadd.xlane.f32.xlu0 %v3484_v30  ;;  %v3399_v9 = vpop.xlane.xlu0 %3398 }
 0xa39   : > { %v3439_v53 = vmul.f32 0.020833334, %v3399_v9  ;;  %v3469_v23 = vmul.f32 %v6945_v5, %v6945_v5  ;;  %v3470_v12 = vmul.f32 %v6948_v31, %v6948_v31 }
 0xa3b   : > { %v6956_v36 = vsub.f32 %v6859_v57, %v3439_v53  ;;  %v3487_v47 = vsel %vm485_vm0, %v3469_v23, 0.0  ;;  %v3490_v63 = vsel %vm485_vm0, %v3470_v12, 0.0 }
 0xa3c   : > { %3488 = vadd.xlane.f32.xlu1 %v3487_v47  ;;  %3491 = vadd.xlane.f32.xlu0 %v3490_v63  ;;  %v3402_v37 = vpop.xlane.xlu0 %3401 }
 0xa3d   : > { %v3440_v35 = vmul.f32 0.020833334, %v3402_v37  ;;  %v3471_v18 = vmul.f32 %v6956_v36, %v6956_v36 }
 0xa3f   : > { %v6963_v38 = vsub.f32 %v6870_v15, %v3440_v35  ;;  %v3493_v28 = vsel %vm485_vm0, %v3471_v18, 0.0 }
 0xa40   : > { %v3405_v10 = vpop.xlane.xlu1 %3404  ;;  %3494 = vadd.xlane.f32.xlu1 %v3493_v28  ;;  %v3408_v32 = vpop.xlane.xlu0 %3407 }
 0xa41   : > { %v3441_v27 = vmul.f32 0.020833334, %v3405_v10  ;;  %v3442_v48 = vmul.f32 0.020833334, %v3408_v32  ;;  %v3472_v24 = vmul.f32 %v6963_v38, %v6963_v38 }
 0xa43   : > { %v6969_v43 = vsub.f32 %v6880_v25, %v3441_v27  ;;  %v6972_v59 = vsub.f32 %v6873_v41, %v3442_v48  ;;  %v3496_v58 = vsel %vm485_vm0, %v3472_v24, 0.0 }
 0xa44   : > { %v3411_v34 = vpop.xlane.xlu1 %3410  ;;  %3497 = vadd.xlane.f32.xlu0 %v3496_v58 }
 0xa45   : > { %v3443_v2 = vmul.f32 0.020833334, %v3411_v34  ;;  %v3473_v13 = vmul.f32 %v6969_v43, %v6969_v43  ;;  %v3474_v54 = vmul.f32 %v6972_v59, %v6972_v59 }
 0xa47   : > { %v6980_v49 = vsub.f32 %v6883_v21, %v3443_v2  ;;  %v3499_v44 = vsel %vm485_vm0, %v3473_v13, 0.0  ;;  %v3502_v26 = vsel %vm485_vm0, %v3474_v54, 0.0 }
 0xa48   : > { %3500 = vadd.xlane.f32.xlu1 %v3499_v44  ;;  %3503 = vadd.xlane.f32.xlu0 %v3502_v26 }
 0xa49   : > { %v3475_v51 = vmul.f32 %v6980_v49, %v6980_v49 }
 0xa4b   : > { %v3505_v0 = vsel %vm485_vm0, %v3475_v51, 0.0 }
 0xa4c   : > { %3506 = vadd.xlane.f32.xlu1 %v3505_v0 }
 0xa82   : > { %v3414_v39 = vpop.xlane.xlu0 %3413 }
 0xa83   : > { %v3444_v40 = vmul.f32 0.020833334, %v3414_v39 }
 0xa85   : > { %v7006_v4 = vsub.f32 %v6894_v45, %v3444_v40 }
 0xa86   : > { %v3417_v62 = vpop.xlane.xlu1 %3416  ;;  %v3420_v56 = vpop.xlane.xlu0 %3419 }
 0xa87   : > { %v3445_v52 = vmul.f32 0.020833334, %v3417_v62  ;;  %v3446_v16 = vmul.f32 0.020833334, %v3420_v56  ;;  %v3476_v50 = vmul.f32 %v7006_v4, %v7006_v4 }
 0xa89   : > { %v7011_v30 = vsub.f32 %v6904_v46, %v3445_v52  ;;  %v7014_v9 = vsub.f32 %v6898_v1, %v3446_v16  ;;  %v3508_v53 = vsel %vm485_vm0, %v3476_v50, 0.0 }
 0xa8a   : > { %v3423_v23 = vpop.xlane.xlu1 %3422  ;;  %3509 = vadd.xlane.f32.xlu0 %v3508_v53  ;;  %v3426_v12 = vpop.xlane.xlu0 %3425 }
 0xa8b   : > { %v3447_v47 = vmul.f32 0.020833334, %v3423_v23  ;;  %v3448_v63 = vmul.f32 0.020833334, %v3426_v12  ;;  %v3477_v37 = vmul.f32 %v7011_v30, %v7011_v30  ;;  %v3478_v35 = vmul.f32 %v7014_v9, %v7014_v9 }
 0xa8d   : > { %v7022_v18 = vsub.f32 %v6907_v14, %v3447_v47  ;;  %v7025_v28 = vsub.f32 %v6916_v17, %v3448_v63  ;;  %v3511_v10 = vsel %vm485_vm0, %v3477_v37, 0.0  ;;  %v3514_v32 = vsel %vm485_vm0, %v3478_v35, 0.0  ;;  %v5039_v37 = vld [vmem:[%s7539_s12 + $0x38] sm:$0xff]  }
 0xa8e   : > { %v3429_v27 = vpop.xlane.xlu1 %3428  ;;  %3512 = vadd.xlane.f32.xlu1 %v3511_v10  ;;  %3515 = vadd.xlane.f32.xlu0 %v3514_v32  ;;  %v3432_v48 = vpop.xlane.xlu0 %3431  ;;  %v5040_v10 = vld [vmem:[%s7539_s12 + $0x30] sm:$0xff]  }
 0xa8f   : > { %v3449_v24 = vmul.f32 0.020833334, %v3429_v27  ;;  %v3450_v58 = vmul.f32 0.020833334, %v3432_v48  ;;  %v3479_v34 = vmul.f32 %v7022_v18, %v7022_v18  ;;  %v3480_v2 = vmul.f32 %v7025_v28, %v7025_v28  ;;  %4268 = vmatpush1.bf16.msra.mxu1 %v5039_v37 }
 0xa90   : > { %4269 = vmatprep.subr.bf16.mxu1 %v7577_v60 }
 0xa91   : > { %v7034_v13 = vsub.f32 %v6928_v33, %v3449_v24  ;;  %v7037_v54 = vsub.f32 %v6921_v6, %v3450_v58  ;;  %v3517_v44 = vsel %vm485_vm0, %v3479_v34, 0.0  ;;  %v3520_v26 = vsel %vm485_vm0, %v3480_v2, 0.0 }
 0xa92   : > { %v3435_v51 = vpop.xlane.xlu1 %3434  ;;  %3518 = vadd.xlane.f32.xlu1 %v3517_v44  ;;  %3521 = vadd.xlane.f32.xlu0 %v3520_v26 }
 0xa93   : > { %v3451_v0 = vmul.f32 0.020833334, %v3435_v51  ;;  %v3481_v29 = vmul.f32 %v7034_v13, %v7034_v13  ;;  %v3482_v3 = vmul.f32 %v7037_v54, %v7037_v54  ;;  %4270 = vmatpush1.bf16.msra.mxu1 %v5040_v10 }
 0xa94   : > { %4271 = vmatprep.subr.bf16.mxu1 %v7577_v60 }
 0xa95   : > { %v7046_v55 = vsub.f32 %v6931_v61, %v3451_v0  ;;  %v3523_v8 = vsel %vm485_vm0, %v3481_v29, 0.0  ;;  %v3526_v20 = vsel %vm485_vm0, %v3482_v3, 0.0  ;;  %v7065_v29 = vld [vmem:[%s7535_s8] ss:$0 sm:$0xff] }
 0xa96   : > { %3524 = vadd.xlane.f32.xlu1 %v3523_v8  ;;  %3527 = vadd.xlane.f32.xlu0 %v3526_v20 }
 0xa97   : > { %v3483_v7 = vmul.f32 %v7046_v55, %v7046_v55 }
 0xa99   : > { %v3529_v39 = vsel %vm485_vm0, %v3483_v7, 0.0 }
 0xa9a   : > { %3530 = vadd.xlane.f32.xlu1 %v3529_v39 }
 0xac1   : > { %v3486_v40 = vpop.xlane.xlu0 %3485 }
 0xac2   : > { %v3532_v62 = vmul.f32 0.020833334, %v3486_v40 }
 0xac4   : > { %v3548_v56 = vadd.f32 1e-05, %v3532_v62 }
 0xac5   : > { %v3489_v52 = vpop.xlane.xlu1 %3488  ;;  %v3492_v16 = vpop.xlane.xlu0 %3491 }
 0xac6   : > { %5275 = vrsqrt.f32 %v3548_v56  ;;  %v3533_v50 = vmul.f32 0.020833334, %v3489_v52  ;;  %v3534_v53 = vmul.f32 0.020833334, %v3492_v16 }
 0xac8   : > { %v3549_v23 = vadd.f32 1e-05, %v3533_v50  ;;  %v3550_v12 = vadd.f32 1e-05, %v3534_v53 }
 0xac9   : > { %v3495_v47 = vpop.xlane.xlu1 %3494 }
 0xaca   : > { %5277 = vrsqrt.f32 %v3549_v23  ;;  %v3535_v63 = vmul.f32 0.020833334, %v3495_v47 }
 0xacb   : > { %5279 = vrsqrt.f32 %v3550_v12 }
 0xacc   : > { %v3551_v35 = vadd.f32 1e-05, %v3535_v63 }
 0xacd   : > { %v3498_v32 = vpop.xlane.xlu0 %3497 }
 0xace   : > { %5281 = vrsqrt.f32 %v3551_v35  ;;  %v3536_v27 = vmul.f32 0.020833334, %v3498_v32 }
 0xad0   : > { %v3552_v48 = vadd.f32 1e-05, %v3536_v27 }
 0xad1   : > { %v3501_v24 = vpop.xlane.xlu1 %3500  ;;  %v3504_v58 = vpop.xlane.xlu0 %3503 }
 0xad2   : > { %v3537_v34 = vmul.f32 0.020833334, %v3501_v24  ;;  %v3538_v44 = vmul.f32 0.020833334, %v3504_v58  ;;  %5283 = vrsqrt.f32 %v3552_v48 }
 0xad3   : > { %v5276_v2 = vpop.eup %5275 }
 0xad4   : > { %v3580_v26 = vmul.f32 %v5276_v2, %v6940_v19  ;;  %v3553_v51 = vadd.f32 1e-05, %v3537_v34  ;;  %v3554_v20 = vadd.f32 1e-05, %v3538_v44  ;;  %v7072_v19 = vld [vmem:[%s7536_s9] ss:$0 sm:$0xff] }
 0xad5   : > { %v3507_v0 = vpop.xlane.xlu1 %3506 }
 0xad6   : > { %5285 = vrsqrt.f32 %v3553_v51  ;;  %v3539_v3 = vmul.f32 0.020833334, %v3507_v0  ;;  %v3603_v40 = vmul.f32 %v7065_v29, %v3580_v26 }
 0xad7   : > { %v5278_v8 = vpop.eup %5277 }
 0xad8   : > { %v3581_v7 = vmul.f32 %v5278_v8, %v6945_v5  ;;  %v3555_v39 = vadd.f32 1e-05, %v3539_v3  ;;  %v5280_v62 = vpop.eup %5279  ;;  %v3626_v16 = vadd.f32 %v7072_v19, %v3603_v40 }
 0xad9   : > { %v3582_v5 = vmul.f32 %v5280_v62, %v6948_v31 }
 0xada   : > { %5287 = vrsqrt.f32 %v3555_v39  ;;  %v3604_v56 = vmul.f32 %v7065_v29, %v3581_v7 }
 0xadb   : > { %v5282_v52 = vpop.eup %5281  ;;  %5289 = vrsqrt.f32 %v3554_v20  ;;  %v3605_v47 = vmul.f32 %v7065_v29, %v3582_v5 }
 0xadc   : > { %v3627_v50 = vadd.f32 %v7072_v19, %v3604_v56  ;;  %v3583_v53 = vmul.f32 %v5282_v52, %v6956_v36 }
 0xadd   : > { %v3628_v10 = vadd.f32 %v7072_v19, %v3605_v47 }
 0xade   : > { %v3642_v23 = vpack.c.bf16 %v3627_v50, %v3626_v16  ;;  %v3606_v12 = vmul.f32 %v7065_v29, %v3583_v53 }
 0xadf   : > { %v5284_v63 = vpop.eup %5283 }
 0xae0   : > { %4544 = vmatmul.mubr.msk.bf16.vlgmr.msra.gmra.mxu0 %vm485_vm0, %v3642_v23  ;;  %v3629_v37 = vadd.f32 %v7072_v19, %v3606_v12  ;;  %v3584_v32 = vmul.f32 %v5284_v63, %v6963_v38 }
 0xae1   : > { %3764 = vmatprep.mubr.bf16.mxu0 %v7577_v60 }
 0xae2   : > { %v3643_v36 = vpack.c.bf16 %v3629_v37, %v3628_v10  ;;  %v3607_v58 = vmul.f32 %v7065_v29, %v3584_v32  ;;  %v5041_v10 = vld [vmem:[%s7539_s12 + $0x28] sm:$0xff]  }
 0xae3   : > { %v5286_v35 = vpop.eup %5285  ;;  %4272 = vmatpush1.bf16.msra.mxu1 %v5041_v10 }
 0xae4   : > { %v3585_v31 = vmul.f32 %v5286_v35, %v6969_v43  ;;  %v3630_v44 = vadd.f32 %v7072_v19, %v3607_v58  ;;  %4273 = vmatprep.subr.bf16.mxu1 %v7577_v60 }
 0xae6   : > { %v3608_v27 = vmul.f32 %v7065_v29, %v3585_v31 }
 0xae7   : > { %v5288_v48 = vpop.eup %5287 }
 0xae8   : > { %v5290_v24 = vpop.eup %5289  ;;  %4545 = vmatmul.mubr.msk.bf16.gmra.mxu0 %vm485_vm0, %v3643_v36  ;;  %v3631_v34 = vadd.f32 %v7072_v19, %v3608_v27  ;;  %v3587_v2 = vmul.f32 %v5288_v48, %v6980_v49 }
 0xae9   : > { %3774 = vmatprep.mubr.bf16.mxu0 %v7577_v60  ;;  %v3586_v38 = vmul.f32 %v5290_v24, %v6972_v59  ;;  %v5042_v24 = vld [vmem:[%s7539_s12 + $0x20] sm:$0xff]  }
 0xaea   : > { %v3644_v43 = vpack.c.bf16 %v3631_v34, %v3630_v44  ;;  %v3610_v26 = vmul.f32 %v7065_v29, %v3587_v2  ;;  %4274 = vmatpush1.bf16.msra.mxu1 %v5042_v24  ;;  %v7602_v24 = vld [vmem:[#allocation2_spill] sm:$0xff] }
 0xaeb   : > { %v3609_v51 = vmul.f32 %v7065_v29, %v3586_v38  ;;  %4275 = vmatprep.subr.bf16.mxu1 %v7577_v60 }
 0xaec   : > { %v3633_v0 = vadd.f32 %v7072_v19, %v3610_v26 }
 0xaed   : > { %v3632_v3 = vadd.f32 %v7072_v19, %v3609_v51 }
 0xaef   : > { %v3645_v8 = vpack.c.bf16 %v3633_v0, %v3632_v3 }
 0xaf0   : > { %4546 = vmatmul.mubr.msk.bf16.gmra.mxu0 %vm485_vm0, %v3644_v43  ;;  %v5043_v43 = vld [vmem:[%s7539_s12 + $0x18] sm:$0xff]  }
 0xaf1   : > { %3784 = vmatprep.mubr.bf16.mxu0 %v7577_v60  ;;  %4276 = vmatpush1.bf16.msra.mxu1 %v5043_v43 }
 0xaf2   : > { %4277 = vmatprep.subr.bf16.mxu1 %v7577_v60 }
 0xaf8   : > { %4547 = vmatmul.mubr.msk.bf16.gmra.mxu0 %vm485_vm0, %v3645_v8 }
 0xaf9   : > { %3794 = vmatprep.mubr.bf16.mxu0 %v7577_v60 }
 0xb13   : > { %v3510_v49 = vpop.xlane.xlu0 %3509 }
 0xb14   : > { %v3540_v59 = vmul.f32 0.020833334, %v3510_v49  ;;  %v5044_v49 = vld [vmem:[%s7539_s12 + $0x10] sm:$0xff]  }
 0xb15   : > { %4278 = vmatpush1.bf16.msra.mxu1 %v5044_v49 }
 0xb16   : > { %v3556_v20 = vadd.f32 1e-05, %v3540_v59  ;;  %4279 = vmatprep.subr.bf16.mxu1 %v7577_v60 }
 0xb17   : > { %v3513_v7 = vpop.xlane.xlu1 %3512  ;;  %v3516_v39 = vpop.xlane.xlu0 %3515 }
 0xb18   : > { %5291 = vrsqrt.f32 %v3556_v20  ;;  %v3541_v40 = vmul.f32 0.020833334, %v3513_v7  ;;  %v3542_v62 = vmul.f32 0.020833334, %v3516_v39 }
 0xb1a   : > { %v3557_v56 = vadd.f32 1e-05, %v3541_v40  ;;  %v3558_v52 = vadd.f32 1e-05, %v3542_v62 }
 0xb1b   : > { %v3519_v16 = vpop.xlane.xlu1 %3518  ;;  %v3522_v50 = vpop.xlane.xlu0 %3521 }
 0xb1c   : > { %5293 = vrsqrt.f32 %v3557_v56  ;;  %v3543_v5 = vmul.f32 0.020833334, %v3519_v16  ;;  %v3544_v23 = vmul.f32 0.020833334, %v3522_v50  ;;  %v5046_v16 = vld [vmem:[%s7539_s12] sm:$0xff]  }
 0xb1d   : > { %5295 = vrsqrt.f32 %v3558_v52 }
 0xb1e   : > { %v3559_v53 = vadd.f32 1e-05, %v3543_v5  ;;  %v3560_v63 = vadd.f32 1e-05, %v3544_v23 }
 0xb1f   : > { %v3525_v12 = vpop.xlane.xlu1 %3524  ;;  %v3528_v35 = vpop.xlane.xlu0 %3527 }
 0xb20   : > { %5297 = vrsqrt.f32 %v3559_v53  ;;  %v3545_v47 = vmul.f32 0.020833334, %v3525_v12  ;;  %v3546_v27 = vmul.f32 0.020833334, %v3528_v35 }
 0xb22   : > { %v3561_v37 = vadd.f32 1e-05, %v3545_v47  ;;  %v3562_v2 = vadd.f32 1e-05, %v3546_v27 }
 0xb23   : > { %v3531_v32 = vpop.xlane.xlu1 %3530 }
 0xb24   : > { %5299 = vrsqrt.f32 %v3561_v37  ;;  %v3547_v31 = vmul.f32 0.020833334, %v3531_v32  ;;  %v5048_v32 = vld [vmem:[%s7539_s12 + $0x50] sm:$0xff]  }
 0xb25   : > { %v5292_v36 = vpop.eup %5291  ;;  %5301 = vrsqrt.f32 %v3560_v63 }
 0xb26   : > { %v3588_v48 = vmul.f32 %v5292_v36, %v7006_v4  ;;  %v3563_v58 = vadd.f32 1e-05, %v3547_v31 }
 0xb28   : > { %v3611_v38 = vmul.f32 %v7065_v29, %v3588_v48  ;;  %5303 = vrsqrt.f32 %v3563_v58  ;;  %v3656_v48 = vld [vmem:[%s7538_s11] sm:$0x3]  ;;  %v7603_v58 = vsub.s32 0, %v7602_v24 }
 0xb29   : > { %v5294_v34 = vpop.eup %5293  ;;  %5305 = vrsqrt.f32 %v3562_v2 }
 0xb2a   : > { %v3589_v44 = vmul.f32 %v5294_v34, %v7011_v30  ;;  %v5296_v26 = vpop.eup %5295  ;;  %v3634_v0 = vadd.f32 %v7072_v19, %v3611_v38  ;;  %v7178_v34 = vrot.slane %v3656_v48, %v7603_v58 }
 0xb2b   : > { %v3590_v30 = vmul.f32 %v5296_v26, %v7014_v9  ;;  %v5045_v9 = vld [vmem:[%s7539_s12 + $0x8] sm:$0xff]  }
 0xb2c   : > { %v3612_v4 = vmul.f32 %v7065_v29, %v3589_v44  ;;  %4280 = vmatpush1.bf16.msra.mxu1 %v5045_v9 }
 0xb2d   : > { %v5298_v51 = vpop.eup %5297  ;;  %v3613_v39 = vmul.f32 %v7065_v29, %v3590_v30  ;;  %4281 = vmatprep.subr.bf16.mxu1 %v7577_v60 }
 0xb2e   : > { %v3635_v3 = vadd.f32 %v7072_v19, %v3612_v4  ;;  %v3591_v8 = vmul.f32 %v5298_v51, %v7022_v18 }
 0xb2f   : > { %v3636_v56 = vadd.f32 %v7072_v19, %v3613_v39 }
 0xb30   : > { %v3646_v59 = vpack.c.bf16 %v3635_v3, %v3634_v0  ;;  %v3614_v20 = vmul.f32 %v7065_v29, %v3591_v8  ;;  %4282 = vmatpush1.bf16.msra.mxu1 %v5046_v16 }
 0xb31   : > { %v5300_v7 = vpop.eup %5299  ;;  %4291 = vmatprep.subr.bf16.mxu1 %v7577_v60 }
 0xb32   : > { %4548 = vmatmul.mubr.msk.bf16.gmra.mxu0 %vm485_vm0, %v3646_v59  ;;  %v5302_v18 = vpop.eup %5301  ;;  %v3637_v40 = vadd.f32 %v7072_v19, %v3614_v20  ;;  %v3593_v62 = vmul.f32 %v5300_v7, %v7034_v13 }
 0xb33   : > { %3804 = vmatprep.mubr.bf16.mxu0 %v7577_v60  ;;  %v3592_v52 = vmul.f32 %v5302_v18, %v7025_v28  ;;  %v5047_v28 = vld [vmem:[%s7539_s12 + $0x58] sm:$0xff]  }
 0xb34   : > { %v3647_v50 = vpack.c.bf16 %v3637_v40, %v3636_v56  ;;  %v3616_v5 = vmul.f32 %v7065_v29, %v3593_v62  ;;  %4292 = vmatpush2.bf16.msra.mxu1 %v5047_v28 }
 0xb35   : > { %v5304_v53 = vpop.eup %5303  ;;  %v3615_v13 = vmul.f32 %v7065_v29, %v3592_v52  ;;  %4293 = vmatprep.subr.bf16.mxu1 %v7577_v60 }
 0xb36   : > { %v5306_v23 = vpop.eup %5305  ;;  %v3639_v12 = vadd.f32 %v7072_v19, %v3616_v5  ;;  %v3595_v47 = vmul.f32 %v5304_v53, %v7046_v55 }
 0xb37   : > { %v3638_v63 = vadd.f32 %v7072_v19, %v3615_v13  ;;  %v3594_v37 = vmul.f32 %v5306_v23, %v7037_v54  ;;  %v5049_v54 = vld [vmem:[%s7539_s12 + $0x48] sm:$0xff]  }
 0xb38   : > { %v3618_v10 = vmul.f32 %v7065_v29, %v3595_v47  ;;  %4294 = vmatpush2.bf16.msra.mxu1 %v5048_v32 }
 0xb39   : > { %v3648_v35 = vpack.c.bf16 %v3639_v12, %v3638_v63  ;;  %v3617_v31 = vmul.f32 %v7065_v29, %v3594_v37  ;;  %4295 = vmatprep.subr.bf16.mxu1 %v7577_v60  ;;  %v5050_v29 = vld [vmem:[%s7539_s12 + $0x40] sm:$0xff]  }
 0xb3a   : > { %4549 = vmatmul.mubr.msk.bf16.gmra.mxu0 %vm485_vm0, %v3647_v50  ;;  %v3641_v55 = vadd.f32 %v7072_v19, %v3618_v10 }
 0xb3b   : > { %3814 = vmatprep.mubr.bf16.mxu0 %v7577_v60  ;;  %v3640_v36 = vadd.f32 %v7072_v19, %v3617_v31  ;;  %v7604_v19 = vsub.s32 1, %v7602_v24 }
 0xb3c   : > { %4296 = vmatpush2.bf16.msra.mxu1 %v5049_v54 }
 0xb3d   : > { %v3649_v27 = vpack.c.bf16 %v3641_v55, %v3640_v36  ;;  %4297 = vmatprep.subr.bf16.mxu1 %v7577_v60  ;;  %v7182_v2 = vrot.slane %v3656_v48, %v7604_v19 }
 0xb40   : > { %4298 = vmatpush2.bf16.msra.mxu1 %v5050_v29 }
 0xb42   : > { %4550 = vmatmul.mubr.msk.bf16.gmra.mxu0 %vm485_vm0, %v3648_v35 }
 0xb43   : > { %3824 = vmatprep.mubr.bf16.mxu0 %v7577_v60 }
 0xb4a   : > { %4551 = vmatmul.mubr.msk.bf16.gmra.mxu0 %vm485_vm0, %v3649_v27 }
 0xba0   : > { %v3756_v60 = vpop.f32.mrf.mxu0 }
 0xba1   : > { %v7185_v44 = vadd.f32 %v3756_v60, %v7178_v34 }
 0xba2   : > { %v3758_v38 = vpop.f32.mrf.mxu0 }
 0xba3   : > { %v3835_v43 = vmul.f32 %v7185_v44, %v7185_v44  ;;  %v7190_v26 = vadd.f32 %v3758_v38, %v7182_v2 }
 0xba4   : > { %v3760_v4 = vpop.f32.mrf.mxu0 }
 0xba5   : > { %v3867_v51 = vmul.f32 %v3835_v43, %v7185_v44  ;;  %v3836_v0 = vmul.f32 %v7190_v26, %v7190_v26  ;;  %v7196_v3 = vadd.f32 %v3760_v4, %v7178_v34 }
 0xba6   : > { %v3762_v30 = vpop.f32.mrf.mxu0 }
 0xba7   : > { %v3899_v8 = vmul.f32 0.044715, %v3867_v51  ;;  %v3868_v49 = vmul.f32 %v3836_v0, %v7190_v26  ;;  %v3837_v59 = vmul.f32 %v7196_v3, %v7196_v3  ;;  %v7202_v20 = vadd.f32 %v3762_v30, %v7182_v2 }
 0xba8   : > { %v3766_v7 = vpop.f32.mrf.mxu0 }
 0xba9   : > { %v3931_v39 = vadd.f32 %v3899_v8, %v7185_v44  ;;  %v3900_v9 = vmul.f32 0.044715, %v3868_v49  ;;  %v3869_v18 = vmul.f32 %v3837_v59, %v7196_v3  ;;  %v3838_v40 = vmul.f32 %v7202_v20, %v7202_v20 }
 0xbaa   : > { %v7209_v62 = vadd.f32 %v3766_v7, %v7178_v34  ;;  %v3768_v56 = vpop.f32.mrf.mxu0 }
 0xbab   : > { %v3963_v52 = vmul.f32 0.7978846, %v3931_v39  ;;  %v3932_v16 = vadd.f32 %v3900_v9, %v7190_v26  ;;  %v3901_v50 = vmul.f32 0.044715, %v3869_v18  ;;  %v3870_v5 = vmul.f32 %v3838_v40, %v7202_v20 }
 0xbac   : > { %v3839_v53 = vmul.f32 %v7209_v62, %v7209_v62  ;;  %v7216_v23 = vadd.f32 %v3768_v56, %v7182_v2  ;;  %v3770_v13 = vpop.f32.mrf.mxu0 }
 0xbad   : > { %5307 = vtanh.f32 %v3963_v52  ;;  %v3964_v28 = vmul.f32 0.7978846, %v3932_v16  ;;  %v3933_v12 = vadd.f32 %v3901_v50, %v7196_v3  ;;  %v3902_v47 = vmul.f32 0.044715, %v3870_v5 }
 0xbae   : > { %v3871_v63 = vmul.f32 %v3839_v53, %v7209_v62  ;;  %v3840_v37 = vmul.f32 %v7216_v23, %v7216_v23  ;;  %v7223_v35 = vadd.f32 %v3770_v13, %v7178_v34  ;;  %v3772_v10 = vpop.f32.mrf.mxu0 }
 0xbaf   : > { %5309 = vtanh.f32 %v3964_v28  ;;  %v3965_v32 = vmul.f32 0.7978846, %v3933_v12  ;;  %v3934_v31 = vadd.f32 %v3902_v47, %v7202_v20  ;;  %v7227_v55 = vadd.f32 %v3772_v10, %v7182_v2 }
 0xbb0   : > { %v3903_v54 = vmul.f32 0.044715, %v3871_v63  ;;  %v3872_v36 = vmul.f32 %v3840_v37, %v7216_v23  ;;  %v3841_v27 = vmul.f32 %v7223_v35, %v7223_v35  ;;  %v3776_v29 = vpop.f32.mrf.mxu0 }
 0xbb1   : > { %5311 = vtanh.f32 %v3965_v32  ;;  %v3966_v48 = vmul.f32 0.7978846, %v3934_v31  ;;  %v3842_v24 = vmul.f32 %v7227_v55, %v7227_v55  ;;  %v7235_v58 = vadd.f32 %v3776_v29, %v7178_v34 }
 0xbb2   : > { %v3935_v19 = vadd.f32 %v3903_v54, %v7209_v62  ;;  %v3904_v60 = vmul.f32 0.044715, %v3872_v36  ;;  %v3873_v38 = vmul.f32 %v3841_v27, %v7223_v35  ;;  %v3778_v43 = vpop.f32.mrf.mxu0 }
 0xbb3   : > { %5313 = vtanh.f32 %v3966_v48  ;;  %v3874_v4 = vmul.f32 %v3842_v24, %v7227_v55  ;;  %v3843_v51 = vmul.f32 %v7235_v58, %v7235_v58  ;;  %v7243_v0 = vadd.f32 %v3778_v43, %v7182_v2 }
 0xbb4   : > { %v3967_v30 = vmul.f32 0.7978846, %v3935_v19  ;;  %v3936_v8 = vadd.f32 %v3904_v60, %v7216_v23  ;;  %v3905_v49 = vmul.f32 0.044715, %v3873_v38  ;;  %v3780_v59 = vpop.f32.mrf.mxu0 }
 0xbb5   : > { %v3906_v7 = vmul.f32 0.044715, %v3874_v4  ;;  %v3875_v39 = vmul.f32 %v3843_v51, %v7235_v58  ;;  %v3844_v9 = vmul.f32 %v7243_v0, %v7243_v0  ;;  %v7250_v18 = vadd.f32 %v3780_v59, %v7178_v34 }
 0xbb6   : > { %5315 = vtanh.f32 %v3967_v30  ;;  %v3968_v40 = vmul.f32 0.7978846, %v3936_v8  ;;  %v3937_v56 = vadd.f32 %v3905_v49, %v7223_v35  ;;  %v3782_v52 = vpop.f32.mrf.mxu0 }
 0xbb7   : > { %v3938_v16 = vadd.f32 %v3906_v7, %v7227_v55  ;;  %v3907_v50 = vmul.f32 0.044715, %v3875_v39  ;;  %v3876_v5 = vmul.f32 %v3844_v9, %v7243_v0  ;;  %v3845_v53 = vmul.f32 %v7250_v18, %v7250_v18 }
 0xbb8   : > { %5317 = vtanh.f32 %v3968_v40  ;;  %v3969_v13 = vmul.f32 0.7978846, %v3937_v56  ;;  %v7258_v28 = vadd.f32 %v3782_v52, %v7182_v2  ;;  %v3786_v12 = vpop.f32.mrf.mxu0 }
 0xbb9   : > { %v3970_v47 = vmul.f32 0.7978846, %v3938_v16  ;;  %v3939_v63 = vadd.f32 %v3907_v50, %v7235_v58  ;;  %v3908_v37 = vmul.f32 0.044715, %v3876_v5  ;;  %v3877_v10 = vmul.f32 %v3845_v53, %v7250_v18 }
 0xbba   : > { %v5308_v32 = vpop.eup %5307  ;;  %5319 = vtanh.f32 %v3969_v13  ;;  %v3846_v31 = vmul.f32 %v7258_v28, %v7258_v28  ;;  %v7265_v54 = vadd.f32 %v3786_v12, %v7178_v34  ;;  %v3788_v36 = vpop.f32.mrf.mxu0 }
 0xbbb   : > { %v4027_v27 = vadd.f32 1.0, %v5308_v32  ;;  %5321 = vtanh.f32 %v3970_v47  ;;  %v3971_v29 = vmul.f32 0.7978846, %v3939_v63  ;;  %v3940_v48 = vadd.f32 %v3908_v37, %v7243_v0 }
 0xbbc   : > { %v5310_v24 = vpop.eup %5309  ;;  %v3909_v19 = vmul.f32 0.044715, %v3877_v10  ;;  %v3878_v60 = vmul.f32 %v3846_v31, %v7258_v28  ;;  %v3847_v38 = vmul.f32 %v7265_v54, %v7265_v54  ;;  %v7272_v43 = vadd.f32 %v3788_v36, %v7182_v2  ;;  %v3790_v4 = vpop.f32.mrf.mxu0 }
 0xbbd   : > { %v4028_v51 = vadd.f32 1.0, %v5310_v24  ;;  %5323 = vtanh.f32 %v3971_v29  ;;  %v3972_v30 = vmul.f32 0.7978846, %v3940_v48  ;;  %v4059_v9 = vmul.f32 0.5, %v4027_v27 }
 0xbbe   : > { %v5312_v8 = vpop.eup %5311  ;;  %v3941_v49 = vadd.f32 %v3909_v19, %v7250_v18  ;;  %v3910_v59 = vmul.f32 0.044715, %v3878_v60  ;;  %v3879_v7 = vmul.f32 %v3847_v38, %v7265_v54  ;;  %v3848_v39 = vmul.f32 %v7272_v43, %v7272_v43  ;;  %v3792_v53 = vpop.f32.mrf.mxu0 }
 0xbbf   : > { %v4029_v40 = vadd.f32 1.0, %v5312_v8  ;;  %5325 = vtanh.f32 %v3972_v30  ;;  %v4060_v13 = vmul.f32 0.5, %v4028_v51  ;;  %v7281_v63 = vadd.f32 %v3790_v4, %v7178_v34 }
 0xbc0   : > { %v5314_v56 = vpop.eup %5313  ;;  %v3973_v52 = vmul.f32 0.7978846, %v3941_v49  ;;  %v3942_v16 = vadd.f32 %v3910_v59, %v7258_v28  ;;  %v3911_v50 = vmul.f32 0.044715, %v3879_v7  ;;  %v3880_v5 = vmul.f32 %v3848_v39, %v7272_v43 }
 0xbc1   : > { %v4061_v12 = vmul.f32 0.5, %v4029_v40  ;;  %v4030_v47 = vadd.f32 1.0, %v5314_v56  ;;  %v3849_v27 = vmul.f32 %v7281_v63, %v7281_v63  ;;  %v7287_v29 = vadd.f32 %v3792_v53, %v7182_v2 }
 0xbc2   : > { %5327 = vtanh.f32 %v3973_v52  ;;  %v3974_v37 = vmul.f32 0.7978846, %v3942_v16  ;;  %v3943_v10 = vadd.f32 %v3911_v50, %v7265_v54  ;;  %v3912_v32 = vmul.f32 0.044715, %v3880_v5 }
 0xbc3   : > { %v5316_v31 = vpop.eup %5315  ;;  %v4062_v36 = vmul.f32 0.5, %v4030_v47  ;;  %v4091_v48 = vmul.f32 %v4059_v9, %v7185_v44  ;;  %v4093_v24 = vmul.f32 %v4061_v12, %v7196_v3  ;;  %v4092_v38 = vmul.f32 %v4060_v13, %v7190_v26 }
 0xbc4   : > { %5329 = vtanh.f32 %v3974_v37  ;;  %v3944_v19 = vadd.f32 %v3912_v32, %v7272_v43  ;;  %v3881_v51 = vmul.f32 %v3849_v27, %v7281_v63  ;;  %v3850_v30 = vmul.f32 %v7287_v29, %v7287_v29 }
 0xbc5   : > { %v5318_v60 = vpop.eup %5317  ;;  %v4094_v4 = vmul.f32 %v4062_v36, %v7202_v20  ;;  %v3975_v49 = vmul.f32 0.7978846, %v3943_v10  ;;  %v4031_v7 = vadd.f32 1.0, %v5316_v31  ;;  %v4123_v56 = vpack.c.bf16 %v4093_v24, %v4091_v48 }
 0xbc6   : > { %v4032_v8 = vadd.f32 1.0, %v5318_v60  ;;  %v3976_v59 = vmul.f32 0.7978846, %v3944_v19  ;;  %v3913_v39 = vmul.f32 0.044715, %v3881_v51  ;;  %v3882_v3 = vmul.f32 %v3850_v30, %v7287_v29 }
 0xbc7   : > { %v5320_v44 = vpop.eup %5319  ;;  %v4124_v9 = vpack.c.bf16 %v4094_v4, %v4092_v38  ;;  %v4063_v53 = vmul.f32 0.5, %v4031_v7 }
 0xbc8   : > { %v5322_v40 = vpop.eup %5321  ;;  %v4064_v52 = vmul.f32 0.5, %v4032_v8  ;;  %v4033_v26 = vadd.f32 1.0, %v5320_v44  ;;  %5331 = vtanh.f32 %v3976_v59  ;;  %v3945_v20 = vadd.f32 %v3913_v39, %v7281_v63 }
 0xbc9   : > { %v4034_v16 = vadd.f32 1.0, %v5322_v40  ;;  %v3914_v50 = vmul.f32 0.044715, %v3882_v3  ;;  %4565 = vmatprep.mubr.msk.bf16.mxu1 %vm4242_vm3, %v4124_v9  ;;  %5333 = vtanh.f32 %v3975_v49  ;;  %v4095_v24 = vmul.f32 %v4063_v53, %v7209_v62 }
 0xbca   : > { %v5324_v5 = vpop.eup %5323  ;;  %4300 = vmatmul.mubr.bf16.vlgmr.msra.gmra.mxu1 %v4123_v56  ;;  %v4065_v13 = vmul.f32 0.5, %v4033_v26  ;;  %v3977_v47 = vmul.f32 0.7978846, %v3945_v20  ;;  %v4096_v31 = vmul.f32 %v4064_v52, %v7216_v23 }
 0xbcb   : > { %v4066_v12 = vmul.f32 0.5, %v4034_v16  ;;  %v3946_v37 = vadd.f32 %v3914_v50, %v7287_v29  ;;  %v4035_v38 = vadd.f32 1.0, %v5324_v5 }
 0xbcc   : > { %v5326_v10 = vpop.eup %5325  ;;  %v4097_v32 = vmul.f32 %v4065_v13, %v7223_v35  ;;  %5335 = vtanh.f32 %v3977_v47 }
 0xbcd   : > { %v4098_v36 = vmul.f32 %v4066_v12, %v7227_v55  ;;  %v3978_v27 = vmul.f32 0.7978846, %v3946_v37  ;;  %v4036_v48 = vadd.f32 1.0, %v5326_v10  ;;  %v4067_v49 = vmul.f32 0.5, %v4035_v38 }
 0xbce   : > { %v4125_v4 = vpack.c.bf16 %v4097_v32, %v4095_v24 }
 0xbcf   : > { %v5328_v19 = vpop.eup %5327  ;;  %5337 = vtanh.f32 %v3978_v27  ;;  %v4126_v60 = vpack.c.bf16 %v4098_v36, %v4096_v31  ;;  %v4068_v8 = vmul.f32 0.5, %v4036_v48  ;;  %v4099_v3 = vmul.f32 %v4067_v49, %v7235_v58 }
 0xbd0   : > { %v4037_v51 = vadd.f32 1.0, %v5328_v19 }
 0xbd1   : > { %v5330_v30 = vpop.eup %5329  ;;  %4566 = vmatprep.mubr.msk.bf16.mxu1 %vm4242_vm3, %v4126_v60  ;;  %v4100_v62 = vmul.f32 %v4068_v8, %v7243_v0 }
 0xbd2   : > { %v4038_v35 = vadd.f32 1.0, %v5330_v30  ;;  %4308 = vmatmul.mubr.bf16.gmra.mxu1 %v4125_v4  ;;  %v4069_v23 = vmul.f32 0.5, %v4037_v51 }
 0xbd4   : > { %v4070_v55 = vmul.f32 0.5, %v4038_v35  ;;  %v4101_v59 = vmul.f32 %v4069_v23, %v7250_v18 }
 0xbd5   : > { %v5332_v7 = vpop.eup %5331 }
 0xbd6   : > { %v4102_v44 = vmul.f32 %v4070_v55, %v7258_v28  ;;  %v5334_v39 = vpop.eup %5333  ;;  %v4040_v40 = vadd.f32 1.0, %v5332_v7  ;;  %v4127_v56 = vpack.c.bf16 %v4101_v59, %v4099_v3 }
 0xbd7   : > { %v4039_v26 = vadd.f32 1.0, %v5334_v39 }
 0xbd8   : > { %v4128_v9 = vpack.c.bf16 %v4102_v44, %v4100_v62  ;;  %v4072_v50 = vmul.f32 0.5, %v4040_v40 }
 0xbd9   : > { %v5336_v52 = vpop.eup %5335  ;;  %v4071_v53 = vmul.f32 0.5, %v4039_v26 }
 0xbda   : > { %4567 = vmatprep.mubr.msk.bf16.mxu1 %vm4242_vm3, %v4128_v9  ;;  %v4041_v16 = vadd.f32 1.0, %v5336_v52  ;;  %v4104_v13 = vmul.f32 %v4072_v50, %v7272_v43 }
 0xbdb   : > { %4316 = vmatmul.mubr.bf16.gmra.mxu1 %v4127_v56  ;;  %v4103_v12 = vmul.f32 %v4071_v53, %v7265_v54 }
 0xbdc   : > { %v5338_v20 = vpop.eup %5337  ;;  %v4073_v5 = vmul.f32 0.5, %v4041_v16 }
 0xbdd   : > { %v4042_v18 = vadd.f32 1.0, %v5338_v20 }
 0xbde   : > { %v4105_v28 = vmul.f32 %v4073_v5, %v7281_v63 }
 0xbdf   : > { %v4074_v0 = vmul.f32 0.5, %v4042_v18 }
 0xbe0   : > { %v4129_v37 = vpack.c.bf16 %v4105_v28, %v4103_v12 }
 0xbe1   : > { %v4106_v58 = vmul.f32 %v4074_v0, %v7287_v29 }
 0xbe3   : > { %v4130_v47 = vpack.c.bf16 %v4106_v58, %v4104_v13 }
 0xbe5   : > { %4568 = vmatprep.mubr.msk.bf16.mxu1 %vm4242_vm3, %v4130_v47 }
 0xbe6   : > { %4324 = vmatmul.mubr.bf16.gmra.mxu1 %v4129_v37 }
 0xbf2   : > { %v3796_v10 = vpop.f32.mrf.mxu0 }
 0xbf3   : > { %v7317_v32 = vadd.f32 %v3796_v10, %v7178_v34 }
 0xbf4   : > { %v3798_v31 = vpop.f32.mrf.mxu0 }
 0xbf5   : > { %v3851_v36 = vmul.f32 %v7317_v32, %v7317_v32  ;;  %v7322_v63 = vadd.f32 %v3798_v31, %v7182_v2 }
 0xbf6   : > { %v3800_v43 = vpop.f32.mrf.mxu0 }
 0xbf7   : > { %v3883_v29 = vmul.f32 %v3851_v36, %v7317_v32  ;;  %v3852_v54 = vmul.f32 %v7322_v63, %v7322_v63  ;;  %v7328_v27 = vadd.f32 %v3800_v43, %v7178_v34 }
 0xbf8   : > { %v3802_v48 = vpop.f32.mrf.mxu0 }
 0xbf9   : > { %v3915_v24 = vmul.f32 0.044715, %v3883_v29  ;;  %v3884_v19 = vmul.f32 %v3852_v54, %v7322_v63  ;;  %v3853_v60 = vmul.f32 %v7328_v27, %v7328_v27  ;;  %v7334_v38 = vadd.f32 %v3802_v48, %v7182_v2 }
 0xbfa   : > { %v3806_v4 = vpop.f32.mrf.mxu0 }
 0xbfb   : > { %v3947_v51 = vadd.f32 %v3915_v24, %v7317_v32  ;;  %v3916_v30 = vmul.f32 0.044715, %v3884_v19  ;;  %v3885_v8 = vmul.f32 %v3853_v60, %v7328_v27  ;;  %v3854_v35 = vmul.f32 %v7334_v38, %v7334_v38 }
 0xbfc   : > { %v7341_v23 = vadd.f32 %v3806_v4, %v7178_v34  ;;  %v3808_v49 = vpop.f32.mrf.mxu0 }
 0xbfd   : > { %v3979_v55 = vmul.f32 0.7978846, %v3947_v51  ;;  %v3948_v59 = vadd.f32 %v3916_v30, %v7322_v63  ;;  %v3917_v7 = vmul.f32 0.044715, %v3885_v8  ;;  %v3886_v62 = vmul.f32 %v3854_v35, %v7334_v38 }
 0xbfe   : > { %v3855_v44 = vmul.f32 %v7341_v23, %v7341_v23  ;;  %v7348_v39 = vadd.f32 %v3808_v49, %v7182_v2  ;;  %v3810_v3 = vpop.f32.mrf.mxu0 }
 0xbff   : > { %5339 = vtanh.f32 %v3979_v55  ;;  %v3980_v9 = vmul.f32 0.7978846, %v3948_v59  ;;  %v3949_v40 = vadd.f32 %v3917_v7, %v7328_v27  ;;  %v3918_v56 = vmul.f32 0.044715, %v3886_v62 }
 0xc00   : > { %v3887_v52 = vmul.f32 %v3855_v44, %v7341_v23  ;;  %v3856_v26 = vmul.f32 %v7348_v39, %v7348_v39  ;;  %v7355_v16 = vadd.f32 %v3810_v3, %v7178_v34  ;;  %v3812_v20 = vpop.f32.mrf.mxu0 }
 0xc01   : > { %5341 = vtanh.f32 %v3980_v9  ;;  %v3981_v50 = vmul.f32 0.7978846, %v3949_v40  ;;  %v3950_v18 = vadd.f32 %v3918_v56, %v7334_v38  ;;  %v7359_v5 = vadd.f32 %v3812_v20, %v7182_v2 }
 0xc02   : > { %v3919_v53 = vmul.f32 0.044715, %v3887_v52  ;;  %v3888_v0 = vmul.f32 %v3856_v26, %v7348_v39  ;;  %v3857_v28 = vmul.f32 %v7355_v16, %v7355_v16  ;;  %v3816_v13 = vpop.f32.mrf.mxu0 }
 0xc03   : > { %v3982_v58 = vmul.f32 0.7978846, %v3950_v18  ;;  %v3858_v12 = vmul.f32 %v7359_v5, %v7359_v5  ;;  %v7367_v47 = vadd.f32 %v3816_v13, %v7178_v34  ;;  %5343 = vtanh.f32 %v3981_v50 }
 0xc04   : > { %v3951_v37 = vadd.f32 %v3919_v53, %v7341_v23  ;;  %v3920_v10 = vmul.f32 0.044715, %v3888_v0  ;;  %v3889_v31 = vmul.f32 %v3857_v28, %v7355_v16  ;;  %v3818_v36 = vpop.f32.mrf.mxu0 }
 0xc05   : > { %5345 = vtanh.f32 %v3982_v58  ;;  %v3890_v43 = vmul.f32 %v3858_v12, %v7359_v5  ;;  %v3859_v29 = vmul.f32 %v7367_v47, %v7367_v47  ;;  %v7375_v54 = vadd.f32 %v3818_v36, %v7182_v2 }
 0xc06   : > { %v3983_v48 = vmul.f32 0.7978846, %v3951_v37  ;;  %v3952_v24 = vadd.f32 %v3920_v10, %v7348_v39  ;;  %v3921_v19 = vmul.f32 0.044715, %v3889_v31  ;;  %v3820_v60 = vpop.f32.mrf.mxu0 }
 0xc07   : > { %v3922_v4 = vmul.f32 0.044715, %v3890_v43  ;;  %v3891_v51 = vmul.f32 %v3859_v29, %v7367_v47  ;;  %v3860_v30 = vmul.f32 %v7375_v54, %v7375_v54  ;;  %v7382_v8 = vadd.f32 %v3820_v60, %v7178_v34 }
 0xc08   : > { %5347 = vtanh.f32 %v3983_v48  ;;  %v3984_v35 = vmul.f32 0.7978846, %v3952_v24  ;;  %v3953_v49 = vadd.f32 %v3921_v19, %v7355_v16  ;;  %v3822_v55 = vpop.f32.mrf.mxu0 }
 0xc09   : > { %v3954_v59 = vadd.f32 %v3922_v4, %v7359_v5  ;;  %v3923_v7 = vmul.f32 0.044715, %v3891_v51  ;;  %v3892_v62 = vmul.f32 %v3860_v30, %v7375_v54  ;;  %v3861_v44 = vmul.f32 %v7382_v8, %v7382_v8 }
 0xc0a   : > { %5349 = vtanh.f32 %v3984_v35  ;;  %v3985_v3 = vmul.f32 0.7978846, %v3953_v49  ;;  %v7390_v9 = vadd.f32 %v3822_v55, %v7182_v2  ;;  %v3826_v40 = vpop.f32.mrf.mxu0 }
 0xc0b   : > { %v3986_v56 = vmul.f32 0.7978846, %v3954_v59  ;;  %v3955_v52 = vadd.f32 %v3923_v7, %v7367_v47  ;;  %v3924_v26 = vmul.f32 0.044715, %v3892_v62  ;;  %v3893_v20 = vmul.f32 %v3861_v44, %v7382_v8 }
 0xc0c   : > { %v5340_v50 = vpop.eup %5339  ;;  %5351 = vtanh.f32 %v3985_v3  ;;  %v3862_v18 = vmul.f32 %v7390_v9, %v7390_v9  ;;  %v7397_v53 = vadd.f32 %v3826_v40, %v7178_v34  ;;  %v3828_v0 = vpop.f32.mrf.mxu0 }
 0xc0d   : > { %5353 = vtanh.f32 %v3986_v56  ;;  %v3987_v28 = vmul.f32 0.7978846, %v3955_v52  ;;  %v3956_v13 = vadd.f32 %v3924_v26, %v7375_v54  ;;  %v3925_v58 = vmul.f32 0.044715, %v3893_v20 }
 0xc0e   : > { %v5342_v12 = vpop.eup %5341  ;;  %v3894_v37 = vmul.f32 %v3862_v18, %v7390_v9  ;;  %v3863_v10 = vmul.f32 %v7397_v53, %v7397_v53  ;;  %v7404_v31 = vadd.f32 %v3828_v0, %v7182_v2  ;;  %v3830_v36 = vpop.f32.mrf.mxu0  ;;  %v4043_v43 = vadd.f32 1.0, %v5340_v50 }
 0xc0f   : > { %v4044_v29 = vadd.f32 1.0, %v5342_v12  ;;  %5355 = vtanh.f32 %v3987_v28  ;;  %v3988_v48 = vmul.f32 0.7978846, %v3956_v13  ;;  %v3957_v24 = vadd.f32 %v3925_v58, %v7382_v8 }
 0xc10   : > { %v3926_v19 = vmul.f32 0.044715, %v3894_v37  ;;  %v3895_v60 = vmul.f32 %v3863_v10, %v7397_v53  ;;  %v3864_v4 = vmul.f32 %v7404_v31, %v7404_v31  ;;  %v7411_v51 = vadd.f32 %v3830_v36, %v7178_v34  ;;  %v3832_v30 = vpop.f32.mrf.mxu0  ;;  %v5344_v35 = vpop.eup %5343 }
 0xc11   : > { %v4076_v49 = vmul.f32 0.5, %v4044_v29  ;;  %5357 = vtanh.f32 %v3988_v48  ;;  %v3989_v55 = vmul.f32 0.7978846, %v3957_v24  ;;  %v7414_v59 = vadd.f32 %v3832_v30, %v7182_v2 }
 0xc12   : > { %v5346_v7 = vpop.eup %5345  ;;  %v3958_v62 = vadd.f32 %v3926_v19, %v7390_v9  ;;  %v3927_v44 = vmul.f32 0.044715, %v3895_v60  ;;  %v3896_v3 = vmul.f32 %v3864_v4, %v7404_v31  ;;  %v3865_v40 = vmul.f32 %v7411_v51, %v7411_v51 }
 0xc13   : > { %v4108_v34 = vmul.f32 %v4076_v49, %v7322_v63  ;;  %v4046_v56 = vadd.f32 1.0, %v5346_v7  ;;  %5359 = vtanh.f32 %v3989_v55  ;;  %v3866_v52 = vmul.f32 %v7414_v59, %v7414_v59 }
 0xc14   : > { %v3990_v26 = vmul.f32 0.7978846, %v3958_v62  ;;  %v3959_v2 = vadd.f32 %v3927_v44, %v7397_v53  ;;  %v3928_v20 = vmul.f32 0.044715, %v3896_v3  ;;  %v3897_v50 = vmul.f32 %v3865_v40, %v7411_v51 }
 0xc15   : > { %v5348_v18 = vpop.eup %5347  ;;  %v4078_v0 = vmul.f32 0.5, %v4046_v56  ;;  %v3898_v28 = vmul.f32 %v3866_v52, %v7414_v59  ;;  %v4045_v13 = vadd.f32 1.0, %v5344_v35  ;;  %v4075_v58 = vmul.f32 0.5, %v4043_v43 }
 0xc16   : > { %5361 = vtanh.f32 %v3990_v26  ;;  %v3991_v12 = vmul.f32 0.7978846, %v3959_v2  ;;  %v3960_v63 = vadd.f32 %v3928_v20, %v7404_v31  ;;  %v3929_v37 = vmul.f32 0.044715, %v3897_v50 }
 0xc17   : > { %v5350_v10 = vpop.eup %5349  ;;  %v4110_v36 = vmul.f32 %v4078_v0, %v7334_v38  ;;  %v3930_v29 = vmul.f32 0.044715, %v3898_v28  ;;  %v4077_v48 = vmul.f32 0.5, %v4045_v13  ;;  %v4107_v24 = vmul.f32 %v4075_v58, %v7317_v32 }
 0xc18   : > { %v4048_v19 = vadd.f32 1.0, %v5350_v10  ;;  %5363 = vtanh.f32 %v3991_v12  ;;  %v3992_v60 = vmul.f32 0.7978846, %v3960_v63  ;;  %v3961_v4 = vadd.f32 %v3929_v37, %v7411_v51 }
 0xc19   : > { %v5352_v30 = vpop.eup %5351  ;;  %v3962_v43 = vadd.f32 %v3930_v29, %v7414_v59  ;;  %v4132_v35 = vpack.c.bf16 %v4110_v36, %v4108_v34  ;;  %v4109_v49 = vmul.f32 %v4077_v48, %v7328_v27  ;;  %v4047_v55 = vadd.f32 1.0, %v5348_v18 }
 0xc1a   : > { %v5354_v7 = vpop.eup %5353  ;;  %5365 = vtanh.f32 %v3992_v60  ;;  %v3993_v62 = vmul.f32 0.7978846, %v3961_v4  ;;  %v4049_v38 = vadd.f32 1.0, %v5352_v30  ;;  %v4080_v44 = vmul.f32 0.5, %v4048_v19 }
 0xc1b   : > { %v4050_v3 = vadd.f32 1.0, %v5354_v7  ;;  %v3994_v40 = vmul.f32 0.7978846, %v3962_v43  ;;  %4569 = vmatprep.mubr.msk.bf16.mxu1 %vm4242_vm3, %v4132_v35  ;;  %v4131_v32 = vpack.c.bf16 %v4109_v49, %v4107_v24  ;;  %v4079_v34 = vmul.f32 0.5, %v4047_v55 }
 0xc1c   : > { %v5356_v56 = vpop.eup %5355  ;;  %5367 = vtanh.f32 %v3993_v62  ;;  %v4081_v52 = vmul.f32 0.5, %v4049_v38  ;;  %v4112_v27 = vmul.f32 %v4080_v44, %v7348_v39 }
 0xc1d   : > { %v4082_v26 = vmul.f32 0.5, %v4050_v3  ;;  %5369 = vtanh.f32 %v3994_v40  ;;  %4332 = vmatmul.mubr.bf16.gmra.mxu1 %v4131_v32  ;;  %v4111_v13 = vmul.f32 %v4079_v34, %v7341_v23  ;;  %v4051_v58 = vadd.f32 1.0, %v5356_v56 }
 0xc1e   : > { %v5358_v2 = vpop.eup %5357  ;;  %v4113_v50 = vmul.f32 %v4081_v52, %v7355_v16  ;;  %v7451_v52 = vld [vmem:[%s7540_s13] ss:$0 sm:$0xff] }
 0xc1f   : > { %v4114_v20 = vmul.f32 %v4082_v26, %v7359_v5  ;;  %v4052_v0 = vadd.f32 1.0, %v5358_v2  ;;  %v4083_v39 = vmul.f32 0.5, %v4051_v58 }
 0xc20   : > { %v5360_v18 = vpop.eup %5359  ;;  %v4133_v37 = vpack.c.bf16 %v4113_v50, %v4111_v13 }
 0xc21   : > { %v4134_v28 = vpack.c.bf16 %v4114_v20, %v4112_v27  ;;  %v4053_v12 = vadd.f32 1.0, %v5360_v18  ;;  %v4084_v36 = vmul.f32 0.5, %v4052_v0  ;;  %v4115_v30 = vmul.f32 %v4083_v39, %v7367_v47 }
 0xc23   : > { %v5362_v63 = vpop.eup %5361  ;;  %4570 = vmatprep.mubr.msk.bf16.mxu1 %vm4242_vm3, %v4134_v28  ;;  %v4085_v10 = vmul.f32 0.5, %v4053_v12  ;;  %v4116_v19 = vmul.f32 %v4084_v36, %v7375_v54 }
 0xc24   : > { %v4054_v29 = vadd.f32 1.0, %v5362_v63 }
 0xc25   : > { %v5364_v48 = vpop.eup %5363  ;;  %4340 = vmatmul.mubr.bf16.gmra.mxu1 %v4133_v37  ;;  %v4117_v16 = vmul.f32 %v4085_v10, %v7382_v8 }
 0xc26   : > { %v4086_v5 = vmul.f32 0.5, %v4054_v29  ;;  %v4055_v43 = vadd.f32 1.0, %v5364_v48 }
 0xc27   : > { %v5366_v24 = vpop.eup %5365  ;;  %v4135_v38 = vpack.c.bf16 %v4117_v16, %v4115_v30 }
 0xc28   : > { %v4118_v23 = vmul.f32 %v4086_v5, %v7390_v9  ;;  %v4056_v60 = vadd.f32 1.0, %v5366_v24  ;;  %v4087_v54 = vmul.f32 0.5, %v4055_v43 }
 0xc29   : > { %v5368_v4 = vpop.eup %5367 }
 0xc2a   : > { %v5370_v35 = vpop.eup %5369  ;;  %v4136_v49 = vpack.c.bf16 %v4118_v23, %v4116_v19  ;;  %v4057_v55 = vadd.f32 1.0, %v5368_v4  ;;  %v4088_v7 = vmul.f32 0.5, %v4056_v60  ;;  %v4119_v32 = vmul.f32 %v4087_v54, %v7397_v53 }
 0xc2b   : > { %v4058_v62 = vadd.f32 1.0, %v5370_v35 }
 0xc2c   : > { %4571 = vmatprep.mubr.msk.bf16.mxu1 %vm4242_vm3, %v4136_v49  ;;  %v4089_v44 = vmul.f32 0.5, %v4057_v55  ;;  %v4120_v9 = vmul.f32 %v4088_v7, %v7404_v31 }
 0xc2d   : > { %v4090_v8 = vmul.f32 0.5, %v4058_v62  ;;  %4348 = vmatmul.mubr.bf16.gmra.mxu1 %v4135_v38 }
 0xc2e   : > { %v4121_v47 = vmul.f32 %v4089_v44, %v7411_v51 }
 0xc2f   : > { %v4122_v3 = vmul.f32 %v4090_v8, %v7414_v59 }
 0xc30   : > { %v4137_v56 = vpack.c.bf16 %v4121_v47, %v4119_v32 }
 0xc31   : > { %v4138_v40 = vpack.c.bf16 %v4122_v3, %v4120_v9 }
 0xc33   : > { %4572 = vmatprep.mubr.msk.bf16.mxu1 %vm4242_vm3, %v4138_v40 }
 0xc35   : > { %4356 = vmatmul.mubr.bf16.gmra.mxu1 %v4137_v56 }
 0xc8a   : > { %v4301_v26 = vpop.f32.mrf.mxu1 }
 0xc8b   : > { %v4302_v34 = vadd.f32 %v7451_v52, %v4301_v26 }
 0xc8c   : > { %v4303_v53 = vpop.f32.mrf.mxu1 }
 0xc8d   : > { %v4364_v31 = vadd.f32 %v4302_v34, %v6846_v42 }
 0xc8e   : > { %v4304_v51 = vpop.f32.mrf.mxu1 }
 0xc8f   : > { %4380 = vst.msk [vmem:[%s7459_s17] sm:$0xff] %vm485_vm0, %v4364_v31  ;;  %v4305_v59 = vadd.f32 %v7451_v52, %v4304_v51 }
 0xc90   : > { %v4306_v2 = vpop.f32.mrf.mxu1 }
 0xc91   : > { %v4365_v27 = vadd.f32 %v4305_v59, %v6856_v22 }
 0xc92   : > { %v4309_v20 = vpop.f32.mrf.mxu1 }
 0xc93   : > { %4381 = vst.msk [vmem:[%s7459_s17 + $0x8] sm:$0xff] %vm485_vm0, %v4365_v27  ;;  %v4310_v50 = vadd.f32 %v7451_v52, %v4309_v20 }
 0xc94   : > { %v4311_v18 = vpop.f32.mrf.mxu1 }
 0xc95   : > { %v4366_v0 = vadd.f32 %v4310_v50, %v6849_v11 }
 0xc96   : > { %v4312_v42 = vpop.f32.mrf.mxu1 }
 0xc97   : > { %4382 = vst.msk [vmem:[%s7459_s17 + $0x10] sm:$0xff] %vm485_vm0, %v4366_v0  ;;  %v4313_v28 = vadd.f32 %v7451_v52, %v4312_v42 }
 0xc98   : > { %v4314_v13 = vpop.f32.mrf.mxu1 }
 0xc99   : > { %v4367_v58 = vadd.f32 %v4313_v28, %v6859_v57 }
 0xc9b   : > { %4383 = vst.msk [vmem:[%s7459_s17 + $0x18] sm:$0xff] %vm485_vm0, %v4367_v58  ;;  %v4317_v22 = vpop.f32.mrf.mxu1 }
 0xc9c   : > { %v4318_v12 = vadd.f32 %v7451_v52, %v4317_v22 }
 0xc9d   : > { %v4319_v63 = vpop.f32.mrf.mxu1 }
 0xc9e   : > { %v4368_v37 = vadd.f32 %v4318_v12, %v6870_v15 }
 0xc9f   : > { %v4320_v11 = vpop.f32.mrf.mxu1 }
 0xca0   : > { %4384 = vst.msk [vmem:[%s7459_s17 + $0x20] sm:$0xff] %vm485_vm0, %v4368_v37  ;;  %v4321_v10 = vadd.f32 %v7451_v52, %v4320_v11 }
 0xca1   : > { %v4322_v36 = vpop.f32.mrf.mxu1 }
 0xca2   : > { %v4369_v29 = vadd.f32 %v4321_v10, %v6880_v25 }
 0xca4   : > { %4385 = vst.msk [vmem:[%s7459_s17 + $0x28] sm:$0xff] %vm485_vm0, %v4369_v29 }
 0xca6   : > { %v4325_v57 = vpop.f32.mrf.mxu1 }
 0xca7   : > { %v4326_v48 = vadd.f32 %v7451_v52, %v4325_v57 }
 0xca8   : > { %v4327_v39 = vpop.f32.mrf.mxu1 }
 0xca9   : > { %v4370_v5 = vadd.f32 %v4326_v48, %v6873_v41 }
 0xcaa   : > { %v4328_v24 = vpop.f32.mrf.mxu1 }
 0xcab   : > { %4386 = vst.msk [vmem:[%s7459_s17 + $0x30] sm:$0xff] %vm485_vm0, %v4370_v5  ;;  %v4329_v15 = vadd.f32 %v7451_v52, %v4328_v24 }
 0xcac   : > { %v4330_v16 = vpop.f32.mrf.mxu1 }
 0xcad   : > { %v4371_v19 = vadd.f32 %v4329_v15, %v6883_v21 }
 0xcaf   : > { %4387 = vst.msk [vmem:[%s7459_s17 + $0x38] sm:$0xff] %vm485_vm0, %v4371_v19 }
 0xcdd   : > { %v4333_v25 = vpop.f32.mrf.mxu1 }
 0xcde   : > { %v4334_v23 = vadd.f32 %v7451_v52, %v4333_v25 }
 0xcdf   : > { %v4335_v60 = vpop.f32.mrf.mxu1 }
 0xce0   : > { %v4372_v4 = vadd.f32 %v4334_v23, %v6894_v45 }
 0xce1   : > { %v4336_v30 = vpop.f32.mrf.mxu1 }
 0xce2   : > { %4388 = vst.msk [vmem:[%s7459_s17 + $0x40] sm:$0xff] %vm485_vm0, %v4372_v4  ;;  %v4337_v41 = vadd.f32 %v7451_v52, %v4336_v30 }
 0xce3   : > { %v4338_v43 = vpop.f32.mrf.mxu1 }
 0xce4   : > { %v4373_v35 = vadd.f32 %v4337_v41, %v6904_v46 }
 0xce5   : > { %v4341_v49 = vpop.f32.mrf.mxu1 }
 0xce6   : > { %4389 = vst.msk [vmem:[%s7459_s17 + $0x48] sm:$0xff] %vm485_vm0, %v4373_v35  ;;  %v4342_v21 = vadd.f32 %v7451_v52, %v4341_v49 }
 0xce7   : > { %v4343_v55 = vpop.f32.mrf.mxu1 }
 0xce8   : > { %v4374_v7 = vadd.f32 %v4342_v21, %v6898_v1 }
 0xce9   : > { %v4344_v62 = vpop.f32.mrf.mxu1 }
 0xcea   : > { %4390 = vst.msk [vmem:[%s7459_s17 + $0x50] sm:$0xff] %vm485_vm0, %v4374_v7  ;;  %v4345_v45 = vadd.f32 %v7451_v52, %v4344_v62 }
 0xceb   : > { %v4346_v38 = vpop.f32.mrf.mxu1 }
 0xcec   : > { %v4375_v44 = vadd.f32 %v4345_v45, %v6907_v14 }
 0xced   : > { %v4349_v8 = vpop.f32.mrf.mxu1 }
 0xcee   : > { %4391 = vst.msk [vmem:[%s7459_s17 + $0x58] sm:$0xff] %vm485_vm0, %v4375_v44  ;;  %v4350_v46 = vadd.f32 %v7451_v52, %v4349_v8 }
 0xcef   : > { %v4351_v54 = vpop.f32.mrf.mxu1 }
 0xcf0   : > { %v4376_v9 = vadd.f32 %v4350_v46, %v6916_v17 }
 0xcf1   : > { %v4352_v1 = vpop.f32.mrf.mxu1 }
 0xcf2   : > { %4392 = vst.msk [vmem:[%s7459_s17 + $0x60] sm:$0xff] %vm485_vm0, %v4376_v9  ;;  %v4353_v3 = vadd.f32 %v7451_v52, %v4352_v1 }
 0xcf3   : > { %v4354_v47 = vpop.f32.mrf.mxu1 }
 0xcf4   : > { %v4377_v40 = vadd.f32 %v4353_v3, %v6928_v33 }
 0xcf5   : > { %v4357_v32 = vpop.f32.mrf.mxu1 }
 0xcf6   : > { %4393 = vst.msk [vmem:[%s7459_s17 + $0x68] sm:$0xff] %vm485_vm0, %v4377_v40  ;;  %v4358_v14 = vadd.f32 %v7451_v52, %v4357_v32 }
 0xcf7   : > { %v4359_v56 = vpop.f32.mrf.mxu1 }
 0xcf8   : > { %v4378_v26 = vadd.f32 %v4358_v14, %v6921_v6 }
 0xcf9   : > { %v4360_v34 = vpop.f32.mrf.mxu1 }
 0xcfa   : > { %4394 = vst.msk [vmem:[%s7459_s17 + $0x70] sm:$0xff] %vm485_vm0, %v4378_v26  ;;  %v4361_v17 = vadd.f32 %v7451_v52, %v4360_v34 }
 0xcfb   : > { %v4362_v53 = vpop.f32.mrf.mxu1 }
 0xcfc   : > { %v4379_v31 = vadd.f32 %v4361_v17, %v6931_v61 }
 0xcfe   : > { %4395 = vst.msk [vmem:[%s7459_s17 + $0x78] sm:$0xff] %vm485_vm0, %v4379_v31 }
 0xcff PF: > { %s24_s29 = sadd.s32 1, %s5393_s29  }
 0xd00   : > { %p21_p4 = scmp.ge.s32.totalorder %s24_s29, 4  }
 0xd02   :  { %23 = sbr.rel (!%p21_p4) target bundleno = 1 (0x1), region = 106 }

</bundles_post_ra>
